<compile_context>
chip_gen: v5e
topology: v5e:2x2
jax: 0.10.0
libtpu: 0.0.40
codegen_flags: <defaults>
</compile_context>

<pallas_src>
import functools
import math

import jax
import jax.numpy as jnp
from jax.experimental import pallas as pl
from jax.experimental.pallas import tpu as pltpu


# --------------------------------------------------------------------------
# Pallas kernel: one (batch, output-depth-row, depth-tap) grid step.
# --------------------------------------------------------------------------
def _conv_tap_kernel(x_ref, w_ref, b_ref, o_ref, acc_ref, *, H, W, k1, k2):
    """
    x_ref  : (1, 1, Hp, Wp, Cin)   bf16  replicate-padded slab at wrapped depth
    w_ref  : (1, k1, k2, Cin, Cout) bf16 weights of the current depth tap
    b_ref  : (1, Cout)             f32
    o_ref  : (1, 1, H*W, Cout)     output tile (written on the last depth tap)
    acc_ref: (H*W, Cout)           f32 accumulator, persists across the kd axis
    """
    kd = pl.program_id(2)

    @pl.when(kd == 0)
    def _init():
        acc_ref[...] = jnp.zeros_like(acc_ref)

    acc = acc_ref[...]
    # Statically unrolled in-plane taps: shifted (H, W) windows of the padded slab,
    # each feeding one bf16 MXU dot with f32 accumulation (single chained +=).
    for kh in range(k1):
        for kw in range(k2):
            a = x_ref[0, 0, pl.ds(kh, H), pl.ds(kw, W), :]        # (H, W, Cin)
            a = a.reshape(H * W, a.shape[-1])                     # (H*W, Cin)
            w = w_ref[0, kh, kw, :, :]                            # (Cin, Cout)
            acc = acc + jnp.dot(a, w, preferred_element_type=jnp.float32)
    acc_ref[...] = acc

    @pl.when(kd == pl.num_programs(2) - 1)
    def _finalize():
        o_ref[0, 0, :, :] = (acc + b_ref[...]).astype(o_ref.dtype)


# --------------------------------------------------------------------------
# Wrapper: PrePadDualConv3D.forward
# --------------------------------------------------------------------------
def pre_pad_dual_conv3d(x, weight, bias, kernel_size):
    """x: (B, Cin, D, H, W) f32 NCDHW.  weight: (k0, k1, k2, Cin, Cout).  bias: (Cout,).

    Circular padding of k0//2 along D (angle axis), replicate padding of k1//2 / k2//2
    along H / W (projection plane), then a VALID conv.  Output: (B, Cout, D, H, W).
    """
    k0, k1, k2 = kernel_size
    assert k0 % 2 == 1 and k1 % 2 == 1 and k2 % 2 == 1, "odd kernel sizes only"
    B, Cin, D, H, W = x.shape
    Cout = weight.shape[-1]
    pd, ph, pw = k0 // 2, k1 // 2, k2 // 2
    Hp, Wp = H + 2 * ph, W + 2 * pw

    # NCDHW -> NDHWC (channels on lanes); replicate-pad the projection plane only.
    x_l = jnp.transpose(x, (0, 2, 3, 4, 1))
    x_l = jnp.pad(x_l, ((0, 0), (0, 0), (ph, ph), (pw, pw), (0, 0)), mode="edge")

    # bf16 MXU operands, f32 accumulation inside the kernel; bias stays f32.
    x_bf = x_l.astype(jnp.bfloat16)
    w_bf = weight.astype(jnp.bfloat16)
    b_f32 = bias.reshape(1, Cout).astype(jnp.float32)

    def x_index(b, d, kd):
        # Circular angle padding folded into the index map.  The depth block size is
        # 1, so the returned block index is an element index; (d + kd + D - pd) >= 0.
        return (b, (d + kd + D - pd) % D, 0, 0, 0)

    kernel = functools.partial(_conv_tap_kernel, H=H, W=W, k1=k1, k2=k2)

    out_flat = pl.pallas_call(
        kernel,
        out_shape=jax.ShapeDtypeStruct((B, D, H * W, Cout), x.dtype),
        grid=(B, D, k0),
        in_specs=[
            pl.BlockSpec((1, 1, Hp, Wp, Cin), x_index),
            pl.BlockSpec((1, k1, k2, Cin, Cout), lambda b, d, kd: (kd, 0, 0, 0, 0)),
            pl.BlockSpec((1, Cout), lambda b, d, kd: (0, 0)),
        ],
        out_specs=pl.BlockSpec((1, 1, H * W, Cout), lambda b, d, kd: (b, d, 0, 0)),
        scratch_shapes=[pltpu.VMEM((H * W, Cout), jnp.float32)],
        compiler_params=pltpu.CompilerParams(
            dimension_semantics=("parallel", "parallel", "arbitrary"),
            vmem_limit_bytes=32 * 1024 * 1024,
        ),
    )(x_bf, w_bf, b_f32)

    out = out_flat.reshape(B, D, H, W, Cout)
    return jnp.transpose(out, (0, 4, 1, 2, 3))  # back to NCDHW


# --------------------------------------------------------------------------
# Pure-JAX reference (same bf16-rounded operands, f32 accumulation)
# --------------------------------------------------------------------------
def conv_reference(x, weight, bias, kernel_size):
    k0, k1, k2 = kernel_size
    pd, ph, pw = k0 // 2, k1 // 2, k2 // 2
    B, Cin, D, H, W = x.shape
    Cout = weight.shape[-1]
    x_l = jnp.transpose(x, (0, 2, 3, 4, 1)).astype(jnp.bfloat16).astype(jnp.float32)
    w_f = weight.astype(jnp.bfloat16).astype(jnp.float32)
    xp = jnp.pad(x_l, ((0, 0), (pd, pd), (0, 0), (0, 0), (0, 0)), mode="wrap")   # circular angle pad
    xp = jnp.pad(xp, ((0, 0), (0, 0), (ph, ph), (pw, pw), (0, 0)), mode="edge")  # replicate proj pad
    acc = jnp.zeros((B, D, H, W, Cout), jnp.float32)
    for kd in range(k0):
        for kh in range(k1):
            for kw in range(k2):
                patch = xp[:, kd:kd + D, kh:kh + H, kw:kw + W, :]
                acc = acc + jnp.einsum("bdhwc,co->bdhwo", patch, w_f[kd, kh, kw],
                                       precision=jax.lax.Precision.HIGHEST)
    acc = acc + bias.astype(jnp.float32)
    return jnp.transpose(acc, (0, 4, 1, 2, 3))


if __name__ == "__main__":
    key = jax.random.PRNGKey(0)
    kx, kw = jax.random.split(key)

    B, Cin, Cout = 2, 128, 128
    D, H, W = 8, 16, 16                  # D = angle axis, (H, W) = projection plane
    kernel_size = (3, 3, 3)

    x = jax.random.normal(kx, (B, Cin, D, H, W), jnp.float32)
    fan_in = Cin * kernel_size[0] * kernel_size[1] * kernel_size[2]
    bound = 1.0 / math.sqrt(fan_in)
    weight = jax.random.uniform(kw, (*kernel_size, Cin, Cout), jnp.float32,
                                minval=-bound, maxval=bound)
    bias = jnp.zeros((Cout,), jnp.float32)   # module zeroes the conv bias at init

    fwd = jax.jit(functools.partial(pre_pad_dual_conv3d, kernel_size=kernel_size))
    out = jax.block_until_ready(fwd(x, weight, bias))

    assert out.shape == (B, Cout, D, H, W), out.shape
    assert bool(jnp.all(jnp.isfinite(out)))

    ref = conv_reference(x, weight, bias, kernel_size)
    err = float(jnp.max(jnp.abs(out - ref)))
    assert err < 1e-2, f"max abs error vs reference: {err}"

    print("KERNEL_OK")
</pallas_src>

<mosaic_0001>
module attributes {stable_mosaic.version = 11 : i64} {
  func.func @_conv_tap_kernel(%arg0: i32, %arg1: i32, %arg2: i32, %arg3: memref<1x1x18x18x128xbf16, #tpu.memory_space<vmem>>, %arg4: memref<1x3x3x128x128xbf16, #tpu.memory_space<vmem>>, %arg5: memref<1x128xf32, #tpu.memory_space<vmem>>, %arg6: memref<1x1x256x128xf32, #tpu.memory_space<vmem>>, %arg7: memref<256x128xf32, #tpu.memory_space<vmem>>) attributes {dimension_semantics = [#tpu.dimension_semantics<parallel>, #tpu.dimension_semantics<parallel>, #tpu.dimension_semantics<arbitrary>], iteration_bounds = array<i64: 2, 8, 3>, scalar_prefetch = 0 : i64, scratch_operands = 1 : i64, tpu.core_type = #tpu.core_type<tc>, window_params = [{transform_indices = @transform_0, window_bounds = array<i64: 1, 1, 18, 18, 128>}, {transform_indices = @transform_1, window_bounds = array<i64: 1, 3, 3, 128, 128>}, {pipeline_mode = #tpu.pipeline_mode<synchronous>, transform_indices = @transform_2, window_bounds = array<i64: 1, 128>}, {transform_indices = @transform_3, window_bounds = array<i64: 1, 1, 256, 128>}]} {
    %c0_i32 = arith.constant 0 : i32
    %0 = arith.cmpi eq, %arg2, %c0_i32 : i32
    %1 = arith.extui %0 : i1 to i32
    %c0_i32_0 = arith.constant 0 : i32
    %2 = arith.cmpi ne, %1, %c0_i32_0 : i32
    scf.if %2 {
      %cst_101 = arith.constant 0.000000e+00 : f32
      %71 = vector.broadcast %cst_101 : f32 to vector<256x128xf32>
      %c0_102 = arith.constant 0 : index
      %c0_103 = arith.constant 0 : index
      %72 = vector.load %arg7[%c0_102, %c0_103] : memref<256x128xf32, #tpu.memory_space<vmem>>, vector<256x128xf32>
      tpu.vector_store %arg7[%c0_102, %c0_103], %71 {strides = array<i32>} : memref<256x128xf32, #tpu.memory_space<vmem>>, vector<256x128xf32>,
    } else {
    }
    %c0 = arith.constant 0 : index
    %c0_1 = arith.constant 0 : index
    %3 = vector.load %arg7[%c0, %c0_1] : memref<256x128xf32, #tpu.memory_space<vmem>>, vector<256x128xf32>
    %c0_2 = arith.constant 0 : index
    %c0_3 = arith.constant 0 : index
    %c0_4 = arith.constant 0 : index
    %c0_5 = arith.constant 0 : index
    %c0_6 = arith.constant 0 : index
    %4 = vector.load %arg3[%c0_2, %c0_3, %c0_4, %c0_5, %c0_6] : memref<1x1x18x18x128xbf16, #tpu.memory_space<vmem>>, vector<1x1x16x16x128xbf16>
    %5 = vector.shape_cast %4 : vector<1x1x16x16x128xbf16> to vector<16x16x128xbf16>
    %6 = vector.shape_cast %5 : vector<16x16x128xbf16> to vector<256x128xbf16>
    %c0_7 = arith.constant 0 : index
    %c0_8 = arith.constant 0 : index
    %c0_9 = arith.constant 0 : index
    %c0_10 = arith.constant 0 : index
    %c0_11 = arith.constant 0 : index
    %7 = vector.load %arg4[%c0_7, %c0_8, %c0_9, %c0_10, %c0_11] : memref<1x3x3x128x128xbf16, #tpu.memory_space<vmem>>, vector<1x1x1x128x128xbf16>
    %8 = vector.shape_cast %7 : vector<1x1x1x128x128xbf16> to vector<128x128xbf16>
    %cst = arith.constant dense<0.000000e+00> : vector<256x128xf32>
    %9 = tpu.matmul %6, %8, %cst {dimension_numbers = #tpu.dot_dimension_numbers<[1], [0], [0], [1], [0, 0, 1, 1], [], []>} : vector<256x128xbf16>, vector<128x128xbf16>, vector<256x128xf32> -> vector<256x128xf32>
    %10 = arith.addf %3, %9 : vector<256x128xf32>
    %c0_12 = arith.constant 0 : index
    %c0_13 = arith.constant 0 : index
    %c0_14 = arith.constant 0 : index
    %c1 = arith.constant 1 : index
    %c0_15 = arith.constant 0 : index
    %11 = vector.load %arg3[%c0_12, %c0_13, %c0_14, %c1, %c0_15] : memref<1x1x18x18x128xbf16, #tpu.memory_space<vmem>>, vector<1x1x16x16x128xbf16>
    %12 = vector.shape_cast %11 : vector<1x1x16x16x128xbf16> to vector<16x16x128xbf16>
    %13 = vector.shape_cast %12 : vector<16x16x128xbf16> to vector<256x128xbf16>
    %c0_16 = arith.constant 0 : index
    %c0_17 = arith.constant 0 : index
    %c1_18 = arith.constant 1 : index
    %c0_19 = arith.constant 0 : index
    %c0_20 = arith.constant 0 : index
    %14 = vector.load %arg4[%c0_16, %c0_17, %c1_18, %c0_19, %c0_20] : memref<1x3x3x128x128xbf16, #tpu.memory_space<vmem>>, vector<1x1x1x128x128xbf16>
    %15 = vector.shape_cast %14 : vector<1x1x1x128x128xbf16> to vector<128x128xbf16>
    %cst_21 = arith.constant dense<0.000000e+00> : vector<256x128xf32>
    %16 = tpu.matmul %13, %15, %cst_21 {dimension_numbers = #tpu.dot_dimension_numbers<[1], [0], [0], [1], [0, 0, 1, 1], [], []>} : vector<256x128xbf16>, vector<128x128xbf16>, vector<256x128xf32> -> vector<256x128xf32>
    %17 = arith.addf %10, %16 : vector<256x128xf32>
    %c0_22 = arith.constant 0 : index
    %c0_23 = arith.constant 0 : index
    %c0_24 = arith.constant 0 : index
    %c2 = arith.constant 2 : index
    %c0_25 = arith.constant 0 : index
    %18 = vector.load %arg3[%c0_22, %c0_23, %c0_24, %c2, %c0_25] : memref<1x1x18x18x128xbf16, #tpu.memory_space<vmem>>, vector<1x1x16x16x128xbf16>
    %19 = vector.shape_cast %18 : vector<1x1x16x16x128xbf16> to vector<16x16x128xbf16>
    %20 = vector.shape_cast %19 : vector<16x16x128xbf16> to vector<256x128xbf16>
    %c0_26 = arith.constant 0 : index
    %c0_27 = arith.constant 0 : index
    %c2_28 = arith.constant 2 : index
    %c0_29 = arith.constant 0 : index
    %c0_30 = arith.constant 0 : index
    %21 = vector.load %arg4[%c0_26, %c0_27, %c2_28, %c0_29, %c0_30] : memref<1x3x3x128x128xbf16, #tpu.memory_space<vmem>>, vector<1x1x1x128x128xbf16>
    %22 = vector.shape_cast %21 : vector<1x1x1x128x128xbf16> to vector<128x128xbf16>
    %cst_31 = arith.constant dense<0.000000e+00> : vector<256x128xf32>
    %23 = tpu.matmul %20, %22, %cst_31 {dimension_numbers = #tpu.dot_dimension_numbers<[1], [0], [0], [1], [0, 0, 1, 1], [], []>} : vector<256x128xbf16>, vector<128x128xbf16>, vector<256x128xf32> -> vector<256x128xf32>
    %24 = arith.addf %17, %23 : vector<256x128xf32>
    %c0_32 = arith.constant 0 : index
    %c0_33 = arith.constant 0 : index
    %c1_34 = arith.constant 1 : index
    %c0_35 = arith.constant 0 : index
    %c0_36 = arith.constant 0 : index
    %25 = vector.load %arg3[%c0_32, %c0_33, %c1_34, %c0_35, %c0_36] : memref<1x1x18x18x128xbf16, #tpu.memory_space<vmem>>, vector<1x1x16x16x128xbf16>
    %26 = vector.shape_cast %25 : vector<1x1x16x16x128xbf16> to vector<16x16x128xbf16>
    %27 = vector.shape_cast %26 : vector<16x16x128xbf16> to vector<256x128xbf16>
    %c0_37 = arith.constant 0 : index
    %c1_38 = arith.constant 1 : index
    %c0_39 = arith.constant 0 : index
    %c0_40 = arith.constant 0 : index
    %c0_41 = arith.constant 0 : index
    %28 = vector.load %arg4[%c0_37, %c1_38, %c0_39, %c0_40, %c0_41] : memref<1x3x3x128x128xbf16, #tpu.memory_space<vmem>>, vector<1x1x1x128x128xbf16>
    %29 = vector.shape_cast %28 : vector<1x1x1x128x128xbf16> to vector<128x128xbf16>
    %cst_42 = arith.constant dense<0.000000e+00> : vector<256x128xf32>
    %30 = tpu.matmul %27, %29, %cst_42 {dimension_numbers = #tpu.dot_dimension_numbers<[1], [0], [0], [1], [0, 0, 1, 1], [], []>} : vector<256x128xbf16>, vector<128x128xbf16>, vector<256x128xf32> -> vector<256x128xf32>
    %31 = arith.addf %24, %30 : vector<256x128xf32>
    %c0_43 = arith.constant 0 : index
    %c0_44 = arith.constant 0 : index
    %c1_45 = arith.constant 1 : index
    %c1_46 = arith.constant 1 : index
    %c0_47 = arith.constant 0 : index
    %32 = vector.load %arg3[%c0_43, %c0_44, %c1_45, %c1_46, %c0_47] : memref<1x1x18x18x128xbf16, #tpu.memory_space<vmem>>, vector<1x1x16x16x128xbf16>
    %33 = vector.shape_cast %32 : vector<1x1x16x16x128xbf16> to vector<16x16x128xbf16>
    %34 = vector.shape_cast %33 : vector<16x16x128xbf16> to vector<256x128xbf16>
    %c0_48 = arith.constant 0 : index
    %c1_49 = arith.constant 1 : index
    %c1_50 = arith.constant 1 : index
    %c0_51 = arith.constant 0 : index
    %c0_52 = arith.constant 0 : index
    %35 = vector.load %arg4[%c0_48, %c1_49, %c1_50, %c0_51, %c0_52] : memref<1x3x3x128x128xbf16, #tpu.memory_space<vmem>>, vector<1x1x1x128x128xbf16>
    %36 = vector.shape_cast %35 : vector<1x1x1x128x128xbf16> to vector<128x128xbf16>
    %cst_53 = arith.constant dense<0.000000e+00> : vector<256x128xf32>
    %37 = tpu.matmul %34, %36, %cst_53 {dimension_numbers = #tpu.dot_dimension_numbers<[1], [0], [0], [1], [0, 0, 1, 1], [], []>} : vector<256x128xbf16>, vector<128x128xbf16>, vector<256x128xf32> -> vector<256x128xf32>
    %38 = arith.addf %31, %37 : vector<256x128xf32>
    %c0_54 = arith.constant 0 : index
    %c0_55 = arith.constant 0 : index
    %c1_56 = arith.constant 1 : index
    %c2_57 = arith.constant 2 : index
    %c0_58 = arith.constant 0 : index
    %39 = vector.load %arg3[%c0_54, %c0_55, %c1_56, %c2_57, %c0_58] : memref<1x1x18x18x128xbf16, #tpu.memory_space<vmem>>, vector<1x1x16x16x128xbf16>
    %40 = vector.shape_cast %39 : vector<1x1x16x16x128xbf16> to vector<16x16x128xbf16>
    %41 = vector.shape_cast %40 : vector<16x16x128xbf16> to vector<256x128xbf16>
    %c0_59 = arith.constant 0 : index
    %c1_60 = arith.constant 1 : index
    %c2_61 = arith.constant 2 : index
    %c0_62 = arith.constant 0 : index
    %c0_63 = arith.constant 0 : index
    %42 = vector.load %arg4[%c0_59, %c1_60, %c2_61, %c0_62, %c0_63] : memref<1x3x3x128x128xbf16, #tpu.memory_space<vmem>>, vector<1x1x1x128x128xbf16>
    %43 = vector.shape_cast %42 : vector<1x1x1x128x128xbf16> to vector<128x128xbf16>
    %cst_64 = arith.constant dense<0.000000e+00> : vector<256x128xf32>
    %44 = tpu.matmul %41, %43, %cst_64 {dimension_numbers = #tpu.dot_dimension_numbers<[1], [0], [0], [1], [0, 0, 1, 1], [], []>} : vector<256x128xbf16>, vector<128x128xbf16>, vector<256x128xf32> -> vector<256x128xf32>
    %45 = arith.addf %38, %44 : vector<256x128xf32>
    %c0_65 = arith.constant 0 : index
    %c0_66 = arith.constant 0 : index
    %c2_67 = arith.constant 2 : index
    %c0_68 = arith.constant 0 : index
    %c0_69 = arith.constant 0 : index
    %46 = vector.load %arg3[%c0_65, %c0_66, %c2_67, %c0_68, %c0_69] : memref<1x1x18x18x128xbf16, #tpu.memory_space<vmem>>, vector<1x1x16x16x128xbf16>
    %47 = vector.shape_cast %46 : vector<1x1x16x16x128xbf16> to vector<16x16x128xbf16>
    %48 = vector.shape_cast %47 : vector<16x16x128xbf16> to vector<256x128xbf16>
    %c0_70 = arith.constant 0 : index
    %c2_71 = arith.constant 2 : index
    %c0_72 = arith.constant 0 : index
    %c0_73 = arith.constant 0 : index
    %c0_74 = arith.constant 0 : index
    %49 = vector.load %arg4[%c0_70, %c2_71, %c0_72, %c0_73, %c0_74] : memref<1x3x3x128x128xbf16, #tpu.memory_space<vmem>>, vector<1x1x1x128x128xbf16>
    %50 = vector.shape_cast %49 : vector<1x1x1x128x128xbf16> to vector<128x128xbf16>
    %cst_75 = arith.constant dense<0.000000e+00> : vector<256x128xf32>
    %51 = tpu.matmul %48, %50, %cst_75 {dimension_numbers = #tpu.dot_dimension_numbers<[1], [0], [0], [1], [0, 0, 1, 1], [], []>} : vector<256x128xbf16>, vector<128x128xbf16>, vector<256x128xf32> -> vector<256x128xf32>
    %52 = arith.addf %45, %51 : vector<256x128xf32>
    %c0_76 = arith.constant 0 : index
    %c0_77 = arith.constant 0 : index
    %c2_78 = arith.constant 2 : index
    %c1_79 = arith.constant 1 : index
    %c0_80 = arith.constant 0 : index
    %53 = vector.load %arg3[%c0_76, %c0_77, %c2_78, %c1_79, %c0_80] : memref<1x1x18x18x128xbf16, #tpu.memory_space<vmem>>, vector<1x1x16x16x128xbf16>
    %54 = vector.shape_cast %53 : vector<1x1x16x16x128xbf16> to vector<16x16x128xbf16>
    %55 = vector.shape_cast %54 : vector<16x16x128xbf16> to vector<256x128xbf16>
    %c0_81 = arith.constant 0 : index
    %c2_82 = arith.constant 2 : index
    %c1_83 = arith.constant 1 : index
    %c0_84 = arith.constant 0 : index
    %c0_85 = arith.constant 0 : index
    %56 = vector.load %arg4[%c0_81, %c2_82, %c1_83, %c0_84, %c0_85] : memref<1x3x3x128x128xbf16, #tpu.memory_space<vmem>>, vector<1x1x1x128x128xbf16>
    %57 = vector.shape_cast %56 : vector<1x1x1x128x128xbf16> to vector<128x128xbf16>
    %cst_86 = arith.constant dense<0.000000e+00> : vector<256x128xf32>
    %58 = tpu.matmul %55, %57, %cst_86 {dimension_numbers = #tpu.dot_dimension_numbers<[1], [0], [0], [1], [0, 0, 1, 1], [], []>} : vector<256x128xbf16>, vector<128x128xbf16>, vector<256x128xf32> -> vector<256x128xf32>
    %59 = arith.addf %52, %58 : vector<256x128xf32>
    %c0_87 = arith.constant 0 : index
    %c0_88 = arith.constant 0 : index
    %c2_89 = arith.constant 2 : index
    %c2_90 = arith.constant 2 : index
    %c0_91 = arith.constant 0 : index
    %60 = vector.load %arg3[%c0_87, %c0_88, %c2_89, %c2_90, %c0_91] : memref<1x1x18x18x128xbf16, #tpu.memory_space<vmem>>, vector<1x1x16x16x128xbf16>
    %61 = vector.shape_cast %60 : vector<1x1x16x16x128xbf16> to vector<16x16x128xbf16>
    %62 = vector.shape_cast %61 : vector<16x16x128xbf16> to vector<256x128xbf16>
    %c0_92 = arith.constant 0 : index
    %c2_93 = arith.constant 2 : index
    %c2_94 = arith.constant 2 : index
    %c0_95 = arith.constant 0 : index
    %c0_96 = arith.constant 0 : index
    %63 = vector.load %arg4[%c0_92, %c2_93, %c2_94, %c0_95, %c0_96] : memref<1x3x3x128x128xbf16, #tpu.memory_space<vmem>>, vector<1x1x1x128x128xbf16>
    %64 = vector.shape_cast %63 : vector<1x1x1x128x128xbf16> to vector<128x128xbf16>
    %cst_97 = arith.constant dense<0.000000e+00> : vector<256x128xf32>
    %65 = tpu.matmul %62, %64, %cst_97 {dimension_numbers = #tpu.dot_dimension_numbers<[1], [0], [0], [1], [0, 0, 1, 1], [], []>} : vector<256x128xbf16>, vector<128x128xbf16>, vector<256x128xf32> -> vector<256x128xf32>
    %66 = arith.addf %59, %65 : vector<256x128xf32>
    %c0_98 = arith.constant 0 : index
    %c0_99 = arith.constant 0 : index
    %67 = vector.load %arg7[%c0_98, %c0_99] : memref<256x128xf32, #tpu.memory_space<vmem>>, vector<256x128xf32>
    tpu.vector_store %arg7[%c0_98, %c0_99], %66 {strides = array<i32>} : memref<256x128xf32, #tpu.memory_space<vmem>>, vector<256x128xf32>,
    %c2_i32 = arith.constant 2 : i32
    %68 = arith.cmpi eq, %arg2, %c2_i32 : i32
    %69 = arith.extui %68 : i1 to i32
    %c0_i32_100 = arith.constant 0 : i32
    %70 = arith.cmpi ne, %69, %c0_i32_100 : i32
    scf.if %70 {
      %c0_101 = arith.constant 0 : index
      %c0_102 = arith.constant 0 : index
      %71 = vector.load %arg5[%c0_101, %c0_102] : memref<1x128xf32, #tpu.memory_space<vmem>>, vector<1x128xf32>
      %72 = vector.broadcast %71 : vector<1x128xf32> to vector<256x128xf32>
      %73 = arith.addf %66, %72 : vector<256x128xf32>
      %c0_103 = arith.constant 0 : index
      %c0_104 = arith.constant 0 : index
      %c0_105 = arith.constant 0 : index
      %c0_106 = arith.constant 0 : index
      %74 = vector.load %arg6[%c0_103, %c0_104, %c0_105, %c0_106] : memref<1x1x256x128xf32, #tpu.memory_space<vmem>>, vector<1x1x256x128xf32>
      %75 = vector.shape_cast %74 : vector<1x1x256x128xf32> to vector<256x128xf32>
      %76 = vector.shape_cast %73 : vector<256x128xf32> to vector<1x1x256x128xf32>
      tpu.vector_store %arg6[%c0_103, %c0_104, %c0_105, %c0_106], %76 {strides = array<i32>} : memref<1x1x256x128xf32, #tpu.memory_space<vmem>>, vector<1x1x256x128xf32>,
    } else {
    }
    return
  }
  func.func @transform_0(%arg0: i32, %arg1: i32, %arg2: i32) -> (i32, i32, i32, i32, i32) {
    %0 = arith.addi %arg1, %arg2 : i32
    %c8_i32 = arith.constant 8 : i32
    %1 = arith.addi %0, %c8_i32 : i32
    %c1_i32 = arith.constant 1 : i32
    %2 = arith.subi %1, %c1_i32 : i32
    %c8_i32_0 = arith.constant 8 : i32
    %c0_i32 = arith.constant 0 : i32
    %3 = arith.cmpi eq, %c8_i32_0, %c0_i32 : i32
    %c1_i32_1 = arith.constant 1 : i32
    %4 = arith.select %3, %c1_i32_1, %c8_i32_0 : i32
    %5 = arith.remsi %2, %4 : i32
    %c0_i32_2 = arith.constant 0 : i32
    %6 = arith.cmpi ne, %5, %c0_i32_2 : i32
    %c0_i32_3 = arith.constant 0 : i32
    %7 = arith.cmpi slt, %5, %c0_i32_3 : i32
    %c0_i32_4 = arith.constant 0 : i32
    %8 = arith.cmpi slt, %4, %c0_i32_4 : i32
    %9 = arith.xori %7, %8 : i1
    %10 = arith.andi %9, %6 : i1
    %11 = arith.addi %5, %4 : i32
    %12 = arith.select %10, %11, %5 : i32
    %c0_i32_5 = arith.constant 0 : i32
    %c0_i32_6 = arith.constant 0 : i32
    %c0_i32_7 = arith.constant 0 : i32
    %c0_i32_8 = arith.constant 0 : i32
    return %arg0, %12, %c0_i32_5, %c0_i32_6, %c0_i32_7 : i32, i32, i32, i32, i32
  }
  func.func @transform_1(%arg0: i32, %arg1: i32, %arg2: i32) -> (i32, i32, i32, i32, i32) {
    %c0_i32 = arith.constant 0 : i32
    %c0_i32_0 = arith.constant 0 : i32
    %c0_i32_1 = arith.constant 0 : i32
    %c0_i32_2 = arith.constant 0 : i32
    %c0_i32_3 = arith.constant 0 : i32
    return %arg2, %c0_i32, %c0_i32_0, %c0_i32_1, %c0_i32_2 : i32, i32, i32, i32, i32
  }
  func.func @transform_2(%arg0: i32, %arg1: i32, %arg2: i32) -> (i32, i32) {
    %c0_i32 = arith.constant 0 : i32
    %c0_i32_0 = arith.constant 0 : i32
    %c0_i32_1 = arith.constant 0 : i32
    return %c0_i32, %c0_i32_0 : i32, i32
  }
  func.func @transform_3(%arg0: i32, %arg1: i32, %arg2: i32) -> (i32, i32, i32, i32) {
    %c0_i32 = arith.constant 0 : i32
    %c0_i32_0 = arith.constant 0 : i32
    %c0_i32_1 = arith.constant 0 : i32
    return %arg0, %arg1, %c0_i32, %c0_i32_0 : i32, i32, i32, i32
  }
}

</mosaic_0001>

<bundles_post_ra>
// kernel: pre_pad_dual_conv3d.1
= control target key start
LH: loop header
LB: loop body
LE: loop exit
PB: predicated region body
PF: predicated region fallthrough
CT: control target
= control target key end

     0   :  { %8 = vsyncpa [#allocation4], 0  ;;  %s7776_s0 = inlined_call_operand.vmem [shape: bf16[2,8,18,18,128], index: 0, kind: input, shape index: {}]   ;;  %s7777_s1 = inlined_call_operand.vmem [shape: bf16[3,3,3,128,128], index: 1, kind: input, shape index: {}]   ;;  %s7778_s2 = inlined_call_operand.vmem [shape: f32[1,128], index: 2, kind: input, shape index: {}]   ;;  %s7779_s3 = inlined_call_operand.hbm [shape: f32[2,8,256,128], index: 3, kind: output, shape index: {}]  }
   0x1   :  { %10 = vsyncpa [#allocation4 + $0x1], 0  ;;  %s6166_s12 = smov 0   ;;  %s6168_s13 = smov 0  }
   0x2   :  { %s6170_s14 = smov 0   ;;  %s6172_s15 = smov 0  }
   0x3   :  { %s6174_s16 = smov 0   ;;  %s6176_s17 = smov 0  }
   0x4   :  { %s6178_s18 = smov 0   ;;  %s6180_s19 = smov 0  }
   0x5   :  { %s6182_s20 = smov 0   ;;  %s6184_s21 = smov 0  }
   0x6 LB: > { %7787 = sst [smem:[#allocation6_spill]] %s6129_s18  ;;  %s4888_s22 = sadd.s32 4294967295, %s6141_s21   ;;  %s6141_s21 = sphi %s6184_s21, %s16_s21   ;;  %s6137_s20 = sphi %s6182_s20, %s7825_s20   ;;  %s6133_s19 = sphi %s6180_s19, %s7824_s19   ;;  %s6129_s18 = sphi %s6178_s18, %s7823_s18   ;;  %s6125_s17 = sphi %s6176_s17, %s7822_s17   ;;  %s6121_s16 = sphi %s6174_s16, %s7821_s16   ;;  %s6117_s15 = sphi %s6172_s15, %s7820_s15   ;;  %s6113_s14 = sphi %s6170_s14, %s7828_s14   ;;  %s6109_s13 = sphi %s6168_s13, %s7827_s13   ;;  %s6105_s12 = sphi %s6166_s12, %s7826_s12  }
   0x7   : > { %7788 = sst [smem:[#allocation7_spill]] %s6133_s19  ;;  %s4889_s23 = sadd.s32 4294967294, %s6141_s21  }
   0x8   : > { %7789 = sst [smem:[#allocation8_spill]] %s6137_s20  ;;  %s28_s24 = sadd.s32 1, %s6129_s18 }
   0x9   : > { %p29_p0 = scmp.ge.s32.totalorder %s28_s24, 3  ;;  %s31_s25 = sadd.s32 1, %s6133_s19 }
   0xa   : > { %s35_s26 = sadd.s32 1, %s6137_s20  ;;  %p157_p1 = scmp.ne.s32.totalorder %s6113_s14, %s6109_s13 }
   0xb   : > { %s7830_s24 = smov (%p29_p0, %s28_s24), 0  ;;  %s7832_s25 = smov (!%p29_p0, %s31_s25), %s6133_s19 }
   0xc   : > { %7790 = sst [smem:[#allocation9_spill]] %s7830_s24  ;;  %p158_p2 = scmp.eq.s32.totalorder %s4888_s22, 47 }
   0xd   : > { %p163_p3 = scmp.ne.s32.totalorder %s6109_s13, %s6105_s12  ;;  %p33_p4 = scmp.ge.s32.totalorder %s7832_s25, 8 }
   0xe   : > { %p164_p5 = scmp.eq.s32.totalorder %s4889_s23, 47  ;;  %p6228_p6 = por %p158_p2, %p157_p1 }
   0xf   : > { %s7834_s25 = smov (%p33_p4, %s7832_s25), 0  ;;  %s7836_s26 = smov (!%p33_p4, %s35_s26), %s6137_s20 }
  0x10   : > { %7792 = sst [smem:[#allocation10_spill]] %s7834_s25  ;;  %p6235_p7 = por %p164_p5, %p163_p3 }
  0x11   : > { %p4898_p8 = scmp.ge.s32.totalorder %s6141_s21, 1  ;;  %p37_p9 = scmp.ge.s32.totalorder %s7836_s26, 2 }
  0x12   : > { %p233_p10 = scmp.lt.s32.totalorder %s6141_s21, 49  ;;  %s143_s29 = ssub.s32 %s6133_s19, %s7834_s25 }
  0x13   : > { %s7838_s26 = smov (%p37_p9, %s7836_s26), 0  ;;  %s147_s5 = sadd.s32 1, %s6113_s14 }
  0x14   : > { %7794 = sst [smem:[#allocation11_spill]] %s7838_s26  ;;  %p234_p11 = pnand %p4898_p8, %p233_p10 }
  0x15   : > { %s142_s30 = ssub.s32 %s6137_s20, %s7838_s26 }
  0x16   : > { %s144_s4 = sor.u32 %s143_s29, %s142_s30  ;;  %237 = sbr.rel (%p234_p11) target bundleno = 872 (0x368), region = 32 }
  0x17   : > { %p145_p12 = scmp.eq.s32.totalorder %s144_s4, 0 }
  0x19   : > { %s6249_s6 = scalar_select %p145_p12, %s6113_s14, %s147_s5  }
  0x1b   : > { %s7782_s7 = sand.u32 1, %s6109_s13   ;;  %s280_s8 = sadd.s32 %s6117_s15, %s6121_s16 }
  0x1c   : > { %s4899_s9 = sshll.u32 %s7782_s7, 8  ;;  %s281_s10 = sadd.s32 7, %s280_s8 }
  0x1d   : > { %p282_p13 = scmp.lt.s32.totalorder %s281_s10, 0  ;;  %s283_s11 = ssub.s32 0, %s281_s10 }
  0x1e   : > { %s4900_s22 = smin.u32 %s283_s11, %s281_s10  ;;  %p294_p0 = scmp.lt.s32.totalorder %s6125_s17, 1 }
  0x1f   : > { %s285_s23 = sand.u32 7, %s4900_s22   ;;  %p317_p1 = scmp.lt.s32.totalorder %s6117_s15, 2 }
  0x20   : > { %s286_s29 = ssub.s32 0, %s285_s23  ;;  %s6270_s18 = scalar_lea.vmem [#allocation3], %s4899_s9 }
  0x21   : > { %s7840_s29 = smov (!%p282_p13, %s286_s29), %s285_s23  ;;  %p4905_p4 = scmp.ne.s32.totalorder %s6117_s15, 0 }
  0x22   : > { %s295_s30 = scalar_select %p294_p0, %s6125_s17, 1 }
  0x23   : > { %p4902_p2 = scmp.lt.s32.totalorder %s7840_s29, 0  ;;  %s292_s4 = sadd.s32 8, %s7840_s29 }
  0x24   : > { %s318_s5 = scalar_select %p317_p1, %s6117_s15, 2 }
  0x25   : > { %s7842_s4 = smov (!%p4902_p2, %s292_s4), %s7840_s29  ;;  %s5906_s26 = smul.u32 432, %s295_s30 }
  0x26   : > { %p296_p3 = scmp.lt.s32.totalorder %s7842_s4, 7  ;;  %s5907_s25 = smul.u32 576, %s318_s5 }
  0x28   : > { %s7844_s4 = smov (!%p296_p3, %s7842_s4), 7  ;;  %s6263_s8 = scalar_lea.vmem %s7777_s1, %s5907_s25 }
  0x29   : > { %s5905_s10 = smul.u32 54, %s7844_s4 }
  0x2a   : > { %325 = sbr.rel (%p4905_p4) target bundleno = 80 (0x50), region = 36 }
  0x2b   : > { %s300_s11 = sadd.s32 %s5906_s26, %s5905_s10 }
  0x2c   : > { %s4903_s22 = sshll.u32 %s300_s11, 2 }
  0x2d   : > { %s6268_s23 = scalar_lea.vmem %s7776_s0, %s4903_s22 }
  0x2f   : > { %v6143_v0 = vmov 0.0  }
  0x30   : > { %326 = vst [vmem:[#allocation2 + $0xb0] sm:$0xff] %v6143_v0 }
  0x31   : > { %327 = vst [vmem:[#allocation2] sm:$0xff] %v6143_v0 }
  0x32   : > { %328 = vst [vmem:[#allocation2 + $0xd8] sm:$0xff] %v6143_v0 }
  0x33   : > { %329 = vst [vmem:[#allocation2 + $0x18] sm:$0xff] %v6143_v0 }
  0x34   : > { %330 = vst [vmem:[#allocation2 + $0x50] sm:$0xff] %v6143_v0 }
  0x35   : > { %331 = vst [vmem:[#allocation2 + $0x68] sm:$0xff] %v6143_v0 }
  0x36   : > { %332 = vst [vmem:[#allocation2 + $0x30] sm:$0xff] %v6143_v0 }
  0x37   : > { %333 = vst [vmem:[#allocation2 + $0x48] sm:$0xff] %v6143_v0 }
  0x38   : > { %334 = vst [vmem:[#allocation2 + $0x80] sm:$0xff] %v6143_v0 }
  0x39   : > { %335 = vst [vmem:[#allocation2 + $0x88] sm:$0xff] %v6143_v0 }
  0x3a   : > { %336 = vst [vmem:[#allocation2 + $0xe8] sm:$0xff] %v6143_v0 }
  0x3b   : > { %337 = vst [vmem:[#allocation2 + $0xb8] sm:$0xff] %v6143_v0 }
  0x3c   : > { %338 = vst [vmem:[#allocation2 + $0x60] sm:$0xff] %v6143_v0 }
  0x3d   : > { %339 = vst [vmem:[#allocation2 + $0xf0] sm:$0xff] %v6143_v0 }
  0x3e   : > { %340 = vst [vmem:[#allocation2 + $0x8] sm:$0xff] %v6143_v0 }
  0x3f   : > { %341 = vst [vmem:[#allocation2 + $0x78] sm:$0xff] %v6143_v0 }
  0x40   : > { %342 = vst [vmem:[#allocation2 + $0x38] sm:$0xff] %v6143_v0 }
  0x41   : > { %343 = vst [vmem:[#allocation2 + $0x58] sm:$0xff] %v6143_v0 }
  0x42   : > { %344 = vst [vmem:[#allocation2 + $0x40] sm:$0xff] %v6143_v0 }
  0x43   : > { %345 = vst [vmem:[#allocation2 + $0xc8] sm:$0xff] %v6143_v0 }
  0x44   : > { %346 = vst [vmem:[#allocation2 + $0xe0] sm:$0xff] %v6143_v0 }
  0x45   : > { %347 = vst [vmem:[#allocation2 + $0x90] sm:$0xff] %v6143_v0 }
  0x46   : > { %348 = vst [vmem:[#allocation2 + $0x70] sm:$0xff] %v6143_v0 }
  0x47   : > { %349 = vst [vmem:[#allocation2 + $0xc0] sm:$0xff] %v6143_v0 }
  0x48   : > { %350 = vst [vmem:[#allocation2 + $0xa8] sm:$0xff] %v6143_v0 }
  0x49   : > { %351 = vst [vmem:[#allocation2 + $0xd0] sm:$0xff] %v6143_v0 }
  0x4a   : > { %352 = vst [vmem:[#allocation2 + $0x10] sm:$0xff] %v6143_v0 }
  0x4b   : > { %353 = vst [vmem:[#allocation2 + $0x28] sm:$0xff] %v6143_v0 }
  0x4c   : > { %354 = vst [vmem:[#allocation2 + $0xa0] sm:$0xff] %v6143_v0 }
  0x4d   : > { %355 = vst [vmem:[#allocation2 + $0xf8] sm:$0xff] %v6143_v0 }
  0x4e   : > { %356 = vst [vmem:[#allocation2 + $0x20] sm:$0xff] %v6143_v0 }
  0x4f   : > { %357 = vst [vmem:[#allocation2 + $0x98] sm:$0xff] %v6143_v0 }
  0x50 PF: > { %v5784_v1 = vld [vmem:[%s6263_s8 + $0x38] sm:$0xff]  ;;  %v5783_v2 = vld [vmem:[%s6263_s8 + $0x30] sm:$0xff]  ;;  %v5782_v3 = vld [vmem:[%s6263_s8 + $0x28] sm:$0xff]  ;;  %vm751_vm0 = vsmask.f32 3328  ;;  %vm1452_vm2 = vcmask 1042432  }
  0x51   : > { %5881 = vmatpush.bf16.msra.mxu1 %v5784_v1  ;;  %5882 = vmatpush.bf16.msra.mxu2 %v5784_v1  ;;  %v5781_v4 = vld [vmem:[%s6263_s8 + $0x20] sm:$0xff]  ;;  %v5780_v5 = vld [vmem:[%s6263_s8 + $0x18] sm:$0xff]  ;;  %v5779_v6 = vld [vmem:[%s6263_s8 + $0x10] sm:$0xff]  ;;  %vm752_vm1 = vsmask.f32 7440  ;;  %vm1453_vm3 = vcmask 1046532  }
  0x52   : > { %5883 = vmatpush.bf16.msra.mxu3 %v5784_v1  ;;  %582 = vmatpush.bf16.msra.mxu0 %v5784_v1  ;;  %v5778_v7 = vld [vmem:[%s6263_s8 + $0x8] sm:$0xff]  ;;  %v5777_v8 = vld [vmem:[%s6263_s8] sm:$0xff]  ;;  %v5800_v9 = vld [vmem:[%s6263_s8 + $0xb8] sm:$0xff]  ;;  %p5754_p5 = scmp.ne.s32.totalorder %s6117_s15, 2 }
  0x53   : > { %v5824_v10 = vld [vmem:[%s6263_s8 + $0xf8] sm:$0xff]  ;;  %v5765_v11 = vld [vmem:[%s6268_s23 + $0x30] sm:$0xff]  ;;  %v5769_v12 = vld [vmem:[%s6268_s23 + $0x60] sm:$0xff] }
  0x54   : > { %v5773_v13 = vld [vmem:[%s6268_s23 + $0x90] sm:$0xff]  ;;  %v5761_v14 = vld [vmem:[%s6268_s23] sm:$0xff]  ;;  %v5792_v15 = vld [vmem:[%s6263_s8 + $0x78] sm:$0xff] }
  0x55   : > { %5884 = vmatpush.bf16.msra.mxu1 %v5783_v2  ;;  %5885 = vmatpush.bf16.msra.mxu2 %v5783_v2  ;;  %v5832_v16 = vld [vmem:[%s6263_s8 + $0x138] sm:$0xff]  ;;  %v5799_v17 = vld [vmem:[%s6263_s8 + $0xb0] sm:$0xff]  ;;  %v5798_v21 = vld [vmem:[%s6263_s8 + $0xa8] sm:$0xff] }
  0x56   : > { %5886 = vmatpush.bf16.msra.mxu3 %v5783_v2  ;;  %583 = vmatpush.bf16.msra.mxu0 %v5783_v2  ;;  %v5823_v18 = vld [vmem:[%s6263_s8 + $0xf0] sm:$0xff]  ;;  %v5822_v22 = vld [vmem:[%s6263_s8 + $0xe8] sm:$0xff]  ;;  %v5797_v25 = vld [vmem:[%s6263_s8 + $0xa0] sm:$0xff] }
  0x57   : > { %v5791_v19 = vld [vmem:[%s6263_s8 + $0x70] sm:$0xff]  ;;  %v5790_v23 = vld [vmem:[%s6263_s8 + $0x68] sm:$0xff]  ;;  %v5821_v26 = vld [vmem:[%s6263_s8 + $0xe0] sm:$0xff] }
  0x58   : > { %v5831_v20 = vld [vmem:[%s6263_s8 + $0x130] sm:$0xff]  ;;  %v5830_v24 = vld [vmem:[%s6263_s8 + $0x128] sm:$0xff]  ;;  %v5789_v27 = vld [vmem:[%s6263_s8 + $0x60] sm:$0xff] }
  0x59   : > { %5887 = vmatpush.bf16.msra.mxu1 %v5782_v3  ;;  %5888 = vmatpush.bf16.msra.mxu2 %v5782_v3  ;;  %v5829_v28 = vld [vmem:[%s6263_s8 + $0x120] sm:$0xff]  ;;  %v5796_v29 = vld [vmem:[%s6263_s8 + $0x98] sm:$0xff]  ;;  %v5770_v32 = vld [vmem:[%s6268_s23 + $0x6c] sm:$0xff] }
  0x5a   : > { %5889 = vmatpush.bf16.msra.mxu3 %v5782_v3  ;;  %584 = vmatpush.bf16.msra.mxu0 %v5782_v3  ;;  %v5820_v30 = vld [vmem:[%s6263_s8 + $0xd8] sm:$0xff]  ;;  %v5762_v34 = vld [vmem:[%s6268_s23 + $0xc] sm:$0xff]  ;;  %v5793_v45 = vld [vmem:[%s6263_s8 + $0x80] sm:$0xff] }
  0x5b   : > { %v5766_v31 = vld [vmem:[%s6268_s23 + $0x3c] sm:$0xff]  ;;  %v5795_v37 = vld [vmem:[%s6263_s8 + $0x90] sm:$0xff]  ;;  %v5794_v41 = vld [vmem:[%s6263_s8 + $0x88] sm:$0xff] }
  0x5c   : > { %v5774_v33 = vld [vmem:[%s6268_s23 + $0x9c] sm:$0xff]  ;;  %v5819_v38 = vld [vmem:[%s6263_s8 + $0xd0] sm:$0xff]  ;;  %v5818_v42 = vld [vmem:[%s6263_s8 + $0xc8] sm:$0xff] }
  0x5d   : > { %5890 = vmatpush.bf16.msra.mxu1 %v5781_v4  ;;  %5891 = vmatpush.bf16.msra.mxu2 %v5781_v4  ;;  %v5788_v35 = vld [vmem:[%s6263_s8 + $0x58] sm:$0xff]  ;;  %v5787_v39 = vld [vmem:[%s6263_s8 + $0x50] sm:$0xff]  ;;  %v5786_v43 = vld [vmem:[%s6263_s8 + $0x48] sm:$0xff] }
  0x5e   : > { %5892 = vmatpush.bf16.msra.mxu3 %v5781_v4  ;;  %585 = vmatpush.bf16.msra.mxu0 %v5781_v4  ;;  %v5828_v36 = vld [vmem:[%s6263_s8 + $0x118] sm:$0xff]  ;;  %v5827_v40 = vld [vmem:[%s6263_s8 + $0x110] sm:$0xff]  ;;  %v5826_v44 = vld [vmem:[%s6263_s8 + $0x108] sm:$0xff] }
  0x5f   : > { %v5817_v46 = vld [vmem:[%s6263_s8 + $0xc0] sm:$0xff]  ;;  %v5767_v49 = vld [vmem:[%s6268_s23 + $0x48] sm:$0xff]  ;;  %v5771_v50 = vld [vmem:[%s6268_s23 + $0x78] sm:$0xff] }
  0x60   : > { %v5785_v47 = vld [vmem:[%s6263_s8 + $0x40] sm:$0xff]  ;;  %v5775_v51 = vld [vmem:[%s6268_s23 + $0xa8] sm:$0xff]  ;;  %v5763_v52 = vld [vmem:[%s6268_s23 + $0x18] sm:$0xff] }
  0x61   : > { %5893 = vmatpush.bf16.msra.mxu1 %v5780_v5  ;;  %5894 = vmatpush.bf16.msra.mxu2 %v5780_v5  ;;  %v5825_v48 = vld [vmem:[%s6263_s8 + $0x100] sm:$0xff]  ;;  %v5864_v57 = vld [vmem:[%s6263_s8 + $0x1b8] sm:$0xff]  ;;  %v5258_v59 = vld [vmem:[%s6268_s23 + $0xc] sm:$0xf] }
  0x62   : > { %5895 = vmatpush.bf16.msra.mxu3 %v5780_v5  ;;  %586 = vmatpush.bf16.msra.mxu0 %v5780_v5  ;;  %v703_v53 = vld [vmem:[%s6268_s23] sm:$0xf]  ;;  %v6327_v54 = vld [vmem:[%s6268_s23 + $0x4] sm:$0xf]  ;;  %v5872_v58 = vld [vmem:[%s6263_s8 + $0x1f8] sm:$0xff]  ;;  %v2181_v3 = vshrl.u32 %v5258_v59, 16 }
  0x63   : > { %v755_v55 = vshrl.u32 %v703_v53, 16  ;;  %v758_v56 = vshll.u32 %v703_v53, 16  ;;  %v5840_v60 = vld [vmem:[%s6263_s8 + $0x178] sm:$0xff]  ;;  %v764_v62 = vshll.u32 %v6327_v54, 16  ;;  %v768_v63 = vshrl.u32 %v6327_v54, 16  ;;  %vm6347_vm4 = vmor %vm751_vm0, %vm752_vm1 }
  0x64   : > { %v5880_v61 = vld [vmem:[%s6263_s8 + $0x238] sm:$0xff]  ;;  %v5259_v0 = vld [vmem:[%s6268_s23 + $0x10] sm:$0xf]  ;;  %v2184_v4 = vshll.u32 %v5258_v59, 16  ;;  %vm6351_vm5 = vmor %vm1452_vm2, %vm1453_vm3 }
  0x65   : > { %5896 = vmatpush.bf16.msra.mxu1 %v5779_v6  ;;  %5897 = vmatpush.bf16.msra.mxu2 %v5779_v6  ;;  %v757_v1 = vrot.slane %v755_v55, 4  ;;  %v760_v2 = vrot.slane %v758_v56, 5  ;;  %v2190_v5 = vshll.u32 %v5259_v0, 16 }
  0x66   : > { %5898 = vmatpush.bf16.msra.mxu3 %v5779_v6  ;;  %587 = vmatpush.bf16.msra.mxu0 %v5779_v6  ;;  %v2194_v6 = vshrl.u32 %v5259_v0, 16 }
  0x69   : > { %5899 = vmatpush.bf16.msra.mxu1 %v5778_v7  ;;  %5900 = vmatpush.bf16.msra.mxu2 %v5778_v7 }
  0x6a   : > { %5901 = vmatpush.bf16.msra.mxu3 %v5778_v7  ;;  %588 = vmatpush.bf16.msra.mxu0 %v5778_v7  ;;  %v705_v7 = vld [vmem:[%s6268_s23 + $0x8] sm:$0x1] }
  0x6d   : > { %5902 = vmatpush.bf16.msra.mxu1 %v5777_v8  ;;  %5903 = vmatpush.bf16.msra.mxu2 %v5777_v8 }
  0x6e   : > { %5904 = vmatpush.bf16.msra.mxu3 %v5777_v8  ;;  %589 = vmatpush.bf16.msra.mxu0 %v5777_v8  ;;  %v766_v8 = vrot.slane %v764_v62, 5  ;;  %v708_v62 = vld [vmem:[%s6268_s23 + $0x14] sm:$0x1] }
  0x70   : > { %610 = vmatmul.bf16.vlgmr.msra.gmra.mxu1 %v5765_v11  ;;  %630 = vmatmul.bf16.vlgmr.msra.gmra.mxu2 %v5769_v12  ;;  %v2183_v11 = vrot.slane %v2181_v3, 4  ;;  %v2186_v12 = vrot.slane %v2184_v4, 5 }
  0x71   : > { %1696 = vmatpush.bf16.msrb.mxu2 %v5800_v9  ;;  %650 = vmatmul.bf16.vlgmr.msra.gmra.mxu3 %v5773_v13  ;;  %v770_v9 = vrot.slane %v768_v63, 4  ;;  %v774_v13 = vshll.u32 %v705_v7, 16 }
  0x72   : > { %2011 = vmatpush.bf16.msrb.mxu3 %v5824_v10  ;;  %590 = vmatmul.bf16.vlgmr.msra.gmra.mxu0 %v5761_v14  ;;  %v761_v10 = vor.u32 %v760_v2, %v757_v1  ;;  %v1388_v14 = vld [vmem:[%s6268_s23] sm:$0xe] }
  0x73   : > { %1267 = vmatpush.bf16.msrb.mxu1 %v5792_v15  ;;  %2693 = vmatpush.bf16.msrb.mxu0 %v5832_v16  ;;  %v2192_v15 = vrot.slane %v2190_v5, 5  ;;  %v2196_v16 = vrot.slane %v2194_v6, 4 }
  0x75   : > { %1697 = vmatpush.bf16.msrb.mxu2 %v5799_v17  ;;  %v771_v17 = vor.u32 %v770_v9, %v766_v8  ;;  %v798_v9 = vshll.u32 %v708_v62, 16 }
  0x76   : > { %2012 = vmatpush.bf16.msrb.mxu3 %v5823_v18  ;;  %v1457_v18 = vrot.slane %v6327_v54, 5 }
  0x77   : > { %1268 = vmatpush.bf16.msrb.mxu1 %v5791_v19  ;;  %2694 = vmatpush.bf16.msrb.mxu0 %v5831_v20  ;;  %v5260_v19 = vld [vmem:[%s6268_s23 + $0x14] sm:$0x1] }
  0x78   : > { %v5768_v20 = vld [vmem:[%s6268_s23 + $0x54] sm:$0xff] }
  0x79   : > { %1698 = vmatpush.bf16.msrb.mxu2 %v5798_v21  ;;  %v5772_v21 = vld [vmem:[%s6268_s23 + $0x84] sm:$0xff] }
  0x7a   : > { %2013 = vmatpush.bf16.msrb.mxu3 %v5822_v22  ;;  %v5776_v22 = vld [vmem:[%s6268_s23 + $0xb4] sm:$0xff] }
  0x7b   : > { %1269 = vmatpush.bf16.msrb.mxu1 %v5790_v23  ;;  %2695 = vmatpush.bf16.msrb.mxu0 %v5830_v24  ;;  %v5764_v23 = vld [vmem:[%s6268_s23 + $0x24] sm:$0xff] }
  0x7d   : > { %1699 = vmatpush.bf16.msrb.mxu2 %v5797_v25  ;;  %v762_v25 = vrot.slane %v761_v10, 4 }
  0x7e   : > { %2014 = vmatpush.bf16.msrb.mxu3 %v5821_v26  ;;  %v5050_v26 = vrot.slane %v1388_v14, 9  ;;  %v1389_v14 = vld [vmem:[%s6268_s23 + $0xc] sm:$0xe] }
  0x7f   : > { %1270 = vmatpush.bf16.msrb.mxu1 %v5789_v27  ;;  %2696 = vmatpush.bf16.msrb.mxu0 %v5829_v28  ;;  %v2187_v27 = vor.u32 %v2186_v12, %v2183_v11 }
  0x80   : > { %615 = vmatmul.bf16.gmra.mxu1 %v5766_v31  ;;  %635 = vmatmul.bf16.gmra.mxu2 %v5770_v32  ;;  %v772_v31 = vrot.slane %v771_v17, 4  ;;  %v776_v32 = vrot.slane %v774_v13, 5 }
  0x81   : > { %1700 = vmatpush.bf16.msrb.mxu2 %v5796_v29  ;;  %655 = vmatmul.bf16.gmra.mxu3 %v5774_v33  ;;  %v2197_v29 = vor.u32 %v2196_v16, %v2192_v15  ;;  %v1459_v33 = vrot.slane %v1457_v18, 4 }
  0x82   : > { %2015 = vmatpush.bf16.msrb.mxu3 %v5820_v30  ;;  %595 = vmatmul.bf16.gmra.mxu0 %v5762_v34  ;;  %v2200_v30 = vshll.u32 %v5260_v19, 16  ;;  %v1460_v34 = vrot.slane %v705_v7, 5  ;;  %v5263_v7 = vld [vmem:[%s6268_s23 + $0x20] sm:$0x1] }
  0x83   : > { %1271 = vmatpush.bf16.msrb.mxu1 %v5788_v35  ;;  %2697 = vmatpush.bf16.msrb.mxu0 %v5828_v36  ;;  %v706_v35 = vld [vmem:[%s6268_s23 + $0xc] sm:$0xf]  ;;  %v6357_v36 = vld [vmem:[%s6268_s23 + $0x10] sm:$0xf]  ;;  %v2224_v17 = vshll.u32 %v5263_v7, 16 }
  0x84   : > { %v1464_v12 = vrot.slane %v6357_v36, 5 }
  0x85   : > { %1701 = vmatpush.bf16.msrb.mxu2 %v5795_v37  ;;  %v767_v37 = vsel %vm6347_vm4, %v762_v25, %v766_v8 }
  0x86   : > { %2016 = vmatpush.bf16.msrb.mxu3 %v5819_v38  ;;  %v1458_v38 = vsel %vm6351_vm5, %v5050_v26, %v1457_v18  ;;  %v1155_v54 = vunpack.c.l.b16 %v767_v37  ;;  %v5801_v18 = vld [vmem:[%s6268_s23 + $0xc] sm:$0xff]  ;;  %v5051_v26 = vrot.slane %v1389_v14, 9  ;;  %v5802_v14 = vld [vmem:[%s6268_s23 + $0x18] sm:$0xff] }
  0x87   : > { %1272 = vmatpush.bf16.msrb.mxu1 %v5787_v39  ;;  %2698 = vmatpush.bf16.msrb.mxu0 %v5827_v40  ;;  %v2188_v39 = vrot.slane %v2187_v27, 4  ;;  %v5261_v40 = vld [vmem:[%s6268_s23 + $0x18] sm:$0xf]  ;;  %v1584_v55 = vunpack.c.l.b16 %v1458_v38  ;;  %v1466_v27 = vrot.slane %v1464_v12, 4  ;;  %v5863_v37 = vld [vmem:[%s6263_s8 + $0x1b0] sm:$0xff] }
  0x88   : > { %v5871_v38 = vld [vmem:[%s6263_s8 + $0x1f0] sm:$0xff] }
  0x89   : > { %1702 = vmatpush.bf16.msrb.mxu2 %v5794_v41  ;;  %v5262_v41 = vld [vmem:[%s6268_s23 + $0x1c] sm:$0xf]  ;;  %v2193_v56 = vsel %vm6347_vm4, %v2188_v39, %v2192_v15  ;;  %v5839_v39 = vld [vmem:[%s6263_s8 + $0x170] sm:$0xff] }
  0x8a   : > { %2017 = vmatpush.bf16.msrb.mxu3 %v5818_v42  ;;  %v2198_v42 = vrot.slane %v2197_v29, 4  ;;  %v2218_v53 = vshrl.u32 %v5262_v41, 16  ;;  %v2581_v5 = vunpack.c.l.b16 %v2193_v56  ;;  %v1467_v29 = vrot.slane %v708_v62, 5 }
  0x8b   : > { %1273 = vmatpush.bf16.msrb.mxu1 %v5786_v43  ;;  %2699 = vmatpush.bf16.msrb.mxu0 %v5826_v44  ;;  %v2202_v43 = vrot.slane %v2200_v30, 5  ;;  %v779_v44 = vshrl.u32 %v706_v35, 16 }
  0x8c   : > { %v2220_v4 = vrot.slane %v2218_v53, 4 }
  0x8d   : > { %1703 = vmatpush.bf16.msrb.mxu2 %v5793_v45  ;;  %v782_v45 = vshll.u32 %v706_v35, 16 }
  0x8e   : > { %2018 = vmatpush.bf16.msrb.mxu3 %v5817_v46  ;;  %v777_v46 = vsel %vm6347_vm4, %v772_v31, %v776_v32  ;;  %v2226_v32 = vrot.slane %v2224_v17, 5 }
  0x8f   : > { %1274 = vmatpush.bf16.msrb.mxu1 %v5785_v47  ;;  %2700 = vmatpush.bf16.msrb.mxu0 %v5825_v48  ;;  %v1461_v47 = vsel %vm6351_vm5, %v1459_v33, %v1460_v34  ;;  %v788_v48 = vshll.u32 %v6357_v36, 16  ;;  %v784_v59 = vrot.slane %v782_v45, 5  ;;  %v5265_v45 = vld [vmem:[%s6268_s23 + $0x28] sm:$0xf] }
  0x90   : > { %620 = vmatmul.bf16.gmra.mxu1 %v5767_v49  ;;  %640 = vmatmul.bf16.gmra.mxu2 %v5771_v50  ;;  %v792_v49 = vshrl.u32 %v6357_v36, 16  ;;  %v2205_v50 = vshrl.u32 %v5261_v40, 16  ;;  %v2238_v56 = vshll.u32 %v5265_v45, 16 }
  0x91   : > { %660 = vmatmul.bf16.gmra.mxu3 %v5775_v51  ;;  %3434 = vmatpush.bf16.msra.mxu2 %v5864_v57  ;;  %v2208_v51 = vshll.u32 %v5261_v40, 16  ;;  %v2203_v57 = vsel %vm6347_vm4, %v2198_v42, %v2202_v43  ;;  %v6376_v63 = vrot.slane %v788_v48, 5  ;;  %v5879_v40 = vld [vmem:[%s6263_s8 + $0x230] sm:$0xff]  ;;  %v1465_v43 = vsel %vm6351_vm5, %v5051_v26, %v1464_v12 }
  0x92   : > { %600 = vmatmul.bf16.gmra.mxu0 %v5763_v52  ;;  %4116 = vmatpush.bf16.msra.mxu3 %v5872_v58  ;;  %v2214_v52 = vshll.u32 %v5262_v41, 16  ;;  %v781_v58 = vrot.slane %v779_v44, 4  ;;  %v794_v0 = vrot.slane %v792_v49, 4  ;;  %v2207_v1 = vrot.slane %v2205_v50, 4  ;;  %v5264_v44 = vld [vmem:[%s6268_s23 + $0x24] sm:$0xf] }
  0x93   : > { %3119 = vmatpush.bf16.msra.mxu1 %v5840_v60  ;;  %4542 = vmatpush.bf16.msra.mxu0 %v5880_v61  ;;  %v1156_v60 = vunpack.c.l.b16 %v777_v46  ;;  %v1585_v61 = vunpack.c.l.b16 %v1461_v47  ;;  %v2210_v2 = vrot.slane %v2208_v51, 5  ;;  %v2582_v6 = vunpack.c.l.b16 %v2203_v57  ;;  %v711_v49 = vld [vmem:[%s6268_s23 + $0x20] sm:$0x1] }
  0x94   : > { %v6378_v3 = vrot.slane %v2214_v52, 5  ;;  %v785_v8 = vor.u32 %v784_v59, %v781_v58  ;;  %v795_v11 = vor.u32 %v794_v0, %v6376_v63  ;;  %v1468_v46 = vsel %vm6351_vm5, %v1466_v27, %v1467_v29 }
  0x95   : > { %v1187_v10 = vpack.c.b16 %v1156_v60, %v1155_v54  ;;  %v1616_v13 = vpack.c.b16 %v1585_v61, %v1584_v55  ;;  %v2211_v15 = vor.u32 %v2210_v2, %v2207_v1  ;;  %v2613_v19 = vpack.c.b16 %v2582_v6, %v2581_v5  ;;  %3435 = vmatpush.bf16.msra.mxu2 %v5863_v37 }
  0x96   : > { %v2221_v16 = vor.u32 %v2220_v4, %v6378_v3  ;;  %v796_v25 = vrot.slane %v795_v11, 4  ;;  %4117 = vmatpush.bf16.msra.mxu3 %v5871_v38  ;;  %v2229_v54 = vshrl.u32 %v5264_v44, 16  ;;  %v2232_v55 = vshll.u32 %v5264_v44, 16  ;;  %v1390_v4 = vld [vmem:[%s6268_s23 + $0x18] sm:$0xe] }
  0x97   : > { %v2212_v30 = vrot.slane %v2211_v15, 4  ;;  %3120 = vmatpush.bf16.msra.mxu1 %v5839_v39  ;;  %4543 = vmatpush.bf16.msra.mxu0 %v5879_v40  ;;  %v2242_v57 = vshrl.u32 %v5265_v45, 16  ;;  %v1586_v60 = vunpack.c.l.b16 %v1465_v43  ;;  %v1587_v61 = vunpack.c.l.b16 %v1468_v46 }
  0x98   : > { %v2222_v31 = vrot.slane %v2221_v16, 4  ;;  %v822_v0 = vshll.u32 %v711_v49, 16  ;;  %v2231_v5 = vrot.slane %v2229_v54, 4  ;;  %v2234_v6 = vrot.slane %v2232_v55, 5 }
  0x99   : > { %v2217_v47 = vsel %vm6347_vm4, %v2212_v30, %v6378_v3  ;;  %v2240_v7 = vrot.slane %v2238_v56, 5  ;;  %v1617_v11 = vpack.c.b16 %v1587_v61, %v1586_v60  ;;  %v5052_v17 = vrot.slane %v1390_v4, 9  ;;  %v5267_v30 = vld [vmem:[%s6268_s23 + $0x30] sm:$0xf]  ;;  %v5269_v61 = vld [vmem:[%s6268_s23 + $0x38] sm:$0x1] }
  0x9a   : > { %v2227_v48 = vsel %vm6347_vm4, %v2222_v31, %v2226_v32  ;;  %v2583_v62 = vunpack.c.l.b16 %v2217_v47  ;;  %v5268_v31 = vld [vmem:[%s6268_s23 + $0x34] sm:$0xf]  ;;  %v2253_v40 = vshrl.u32 %v5267_v30, 16  ;;  %v1391_v4 = vld [vmem:[%s6268_s23 + $0x24] sm:$0xe] }
  0x9b   : > { %v2266_v43 = vshrl.u32 %v5268_v31, 16 }
  0x9c   : > { %v2255_v55 = vrot.slane %v2253_v40, 4 }
  0xa0   : > { %625 = vmatmul.bf16.gmra.mxu1 %v5768_v20  ;;  %645 = vmatmul.bf16.gmra.mxu2 %v5772_v21  ;;  %v709_v20 = vld [vmem:[%s6268_s23 + $0x18] sm:$0xf]  ;;  %v786_v21 = vrot.slane %v785_v8, 4  ;;  %v2244_v8 = vrot.slane %v2242_v57, 4 }
  0xa1   : > { %665 = vmatmul.bf16.gmra.mxu3 %v5776_v22  ;;  %v800_v22 = vrot.slane %v798_v9, 5  ;;  %v803_v33 = vshrl.u32 %v709_v20, 16  ;;  %v806_v34 = vshll.u32 %v709_v20, 16  ;;  %v5266_v9 = vld [vmem:[%s6268_s23 + $0x2c] sm:$0x1]  ;;  %v2235_v20 = vor.u32 %v2234_v6, %v2231_v5 }
  0xa2   : > { %605 = vmatmul.bf16.gmra.mxu0 %v5764_v23  ;;  %v6388_v23 = vld [vmem:[%s6268_s23 + $0x1c] sm:$0xf]  ;;  %v791_v41 = vsel %vm6347_vm4, %v786_v21, %v6376_v63  ;;  %v2584_v63 = vunpack.c.l.b16 %v2227_v48  ;;  %v2245_v21 = vor.u32 %v2244_v8, %v2240_v7  ;;  %v5803_v8 = vld [vmem:[%s6268_s23 + $0x24] sm:$0xff] }
  0xa3   : > { %v812_v35 = vshll.u32 %v6388_v23, 16  ;;  %v816_v36 = vshrl.u32 %v6388_v23, 16  ;;  %v801_v42 = vsel %vm6347_vm4, %v796_v25, %v800_v22  ;;  %v805_v50 = vrot.slane %v803_v33, 4  ;;  %v6419_v25 = vld [vmem:[%s6268_s23 + $0x28] sm:$0xf] }
  0xa4   : > { %v808_v51 = vrot.slane %v806_v34, 5  ;;  %v1157_v58 = vunpack.c.l.b16 %v791_v41  ;;  %v1158_v59 = vunpack.c.l.b16 %v801_v42  ;;  %v1471_v3 = vrot.slane %v6388_v23, 5  ;;  %v712_v23 = vld [vmem:[%s6268_s23 + $0x24] sm:$0xf] }
  0xa5   : > { %v814_v52 = vrot.slane %v812_v35, 5  ;;  %v818_v53 = vrot.slane %v816_v36, 4  ;;  %v2614_v12 = vpack.c.b16 %v2584_v63, %v2583_v62  ;;  %v2248_v22 = vshll.u32 %v5266_v9, 16 }
  0xa6   : > { %v809_v1 = vor.u32 %v808_v51, %v805_v50  ;;  %v1472_v29 = vsel %vm6351_vm5, %v5052_v17, %v1471_v3  ;;  %v2236_v33 = vrot.slane %v2235_v20, 4  ;;  %v2246_v34 = vrot.slane %v2245_v21, 4  ;;  %v714_v50 = vld [vmem:[%s6268_s23 + $0x2c] sm:$0x1] }
  0xa7   : > { %v819_v2 = vor.u32 %v818_v53, %v814_v52  ;;  %v2250_v35 = vrot.slane %v2248_v22, 5  ;;  %v827_v36 = vshrl.u32 %v712_v23, 16  ;;  %v830_v37 = vshll.u32 %v712_v23, 16 }
  0xa8   : > { %v810_v15 = vrot.slane %v809_v1, 4  ;;  %v836_v38 = vshll.u32 %v6419_v25, 16  ;;  %v840_v39 = vshrl.u32 %v6419_v25, 16  ;;  %v2256_v41 = vshll.u32 %v5267_v30, 16 }
  0xa9   : > { %v820_v16 = vrot.slane %v819_v2, 4  ;;  %v2262_v42 = vshll.u32 %v5268_v31, 16  ;;  %v1588_v46 = vunpack.c.l.b16 %v1472_v29  ;;  %v2241_v48 = vsel %vm6347_vm4, %v2236_v33, %v2240_v7  ;;  %v5270_v31 = vld [vmem:[%s6268_s23 + $0x3c] sm:$0xf] }
  0xaa   : > { %v815_v26 = vsel %vm6347_vm4, %v810_v15, %v814_v52  ;;  %v829_v51 = vrot.slane %v827_v36, 4  ;;  %v832_v52 = vrot.slane %v830_v37, 5  ;;  %v838_v53 = vrot.slane %v836_v38, 5 }
  0xab   : > { %v1159_v44 = vunpack.c.l.b16 %v815_v26  ;;  %v842_v54 = vrot.slane %v840_v39, 4  ;;  %v2258_v56 = vrot.slane %v2256_v41, 5  ;;  %v6438_v57 = vrot.slane %v2262_v42, 5  ;;  %v5862_v26 = vld [vmem:[%s6263_s8 + $0x1a8] sm:$0xff]  ;;  %v717_v42 = vld [vmem:[%s6268_s23 + $0x38] sm:$0x1] }
  0xac   : > { %v846_v62 = vshll.u32 %v714_v50, 16  ;;  %v1478_v2 = vrot.slane %v6419_v25, 5  ;;  %v2272_v7 = vshll.u32 %v5269_v61, 16  ;;  %v5053_v15 = vrot.slane %v1391_v4, 9  ;;  %3436 = vmatpush.bf16.msra.mxu2 %v5862_v26  ;;  %v5838_v41 = vld [vmem:[%s6263_s8 + $0x168] sm:$0xff] }
  0xad   : > { %v843_v1 = vor.u32 %v842_v54, %v838_v53  ;;  %v2259_v5 = vor.u32 %v2258_v56, %v2255_v55  ;;  %v1481_v17 = vrot.slane %v714_v50, 5  ;;  %3121 = vmatpush.bf16.msra.mxu1 %v5838_v41  ;;  %v870_v56 = vshll.u32 %v717_v42, 16  ;;  %v5272_v61 = vld [vmem:[%s6268_s23 + $0x44] sm:$0x1] }
  0xae   : > { %v2274_v20 = vrot.slane %v2272_v7, 5  ;;  %v1479_v33 = vsel %vm6351_vm5, %v5053_v15, %v1478_v2  ;;  %v1488_v15 = vrot.slane %v717_v42, 5 }
  0xaf   : > { %v1590_v50 = vunpack.c.l.b16 %v1479_v33 }
  0xb0   : > { %1275 = vmatmul.bf16.vlgmr.msrb.gmra.mxu1 %v1187_v10  ;;  %1704 = vmatmul.bf16.vlgmr.msrb.gmra.mxu2 %v1616_v13  ;;  %v1188_v10 = vpack.c.b16 %v1158_v59, %v1157_v58  ;;  %v824_v13 = vrot.slane %v822_v0, 5  ;;  %v2268_v58 = vrot.slane %v2266_v43, 4  ;;  %v2585_v59 = vunpack.c.l.b16 %v2241_v48  ;;  %v5878_v48 = vld [vmem:[%s6263_s8 + $0x228] sm:$0xff] }
  0xb1   : > { %2019 = vmatmul.bf16.vlgmr.msrb.gmra.mxu3 %v5801_v18  ;;  %v1473_v18 = vrot.slane %v1471_v3, 4  ;;  %v833_v0 = vor.u32 %v832_v52, %v829_v51  ;;  %v2277_v43 = vshrl.u32 %v5270_v31, 16  ;;  %4544 = vmatpush.bf16.msra.mxu0 %v5878_v48 }
  0xb2   : > { %2701 = vmatmul.bf16.vlgmr.msrb.gmra.mxu0 %v2613_v19  ;;  %v1474_v19 = vrot.slane %v711_v49, 5  ;;  %v825_v27 = vsel %vm6347_vm4, %v820_v16, %v824_v13  ;;  %v2251_v49 = vsel %vm6347_vm4, %v2246_v34, %v2250_v35  ;;  %v2269_v6 = vor.u32 %v2268_v58, %v6438_v57 }
  0xb3   : > { %v1160_v45 = vunpack.c.l.b16 %v825_v27  ;;  %v2586_v60 = vunpack.c.l.b16 %v2251_v49  ;;  %v834_v13 = vrot.slane %v833_v0, 4  ;;  %v1480_v16 = vrot.slane %v1478_v2, 4  ;;  %v5870_v27 = vld [vmem:[%s6263_s8 + $0x1e8] sm:$0xff]  ;;  %v5804_v0 = vld [vmem:[%s6268_s23 + $0x30] sm:$0xff] }
  0xb4   : > { %v1475_v32 = vsel %vm6351_vm5, %v1473_v18, %v1474_v19  ;;  %v2260_v18 = vrot.slane %v2259_v5, 4  ;;  %v2270_v19 = vrot.slane %v2269_v6, 4  ;;  %4118 = vmatpush.bf16.msra.mxu3 %v5870_v27  ;;  %v872_v5 = vrot.slane %v870_v56, 5  ;;  %v1392_v6 = vld [vmem:[%s6268_s23 + $0x30] sm:$0xe] }
  0xb5   : > { %v1589_v47 = vunpack.c.l.b16 %v1475_v32  ;;  %v1189_v63 = vpack.c.b16 %v1160_v45, %v1159_v44  ;;  %v2615_v9 = vpack.c.b16 %v2586_v60, %v2585_v59  ;;  %v839_v29 = vsel %vm6347_vm4, %v834_v13, %v838_v53  ;;  %v5271_v32 = vld [vmem:[%s6268_s23 + $0x40] sm:$0xf] }
  0xb6   : > { %v1482_v34 = vsel %vm6351_vm5, %v1480_v16, %v1481_v17  ;;  %v2265_v35 = vsel %vm6347_vm4, %v2260_v18, %v6438_v57  ;;  %v2275_v36 = vsel %vm6347_vm4, %v2270_v19, %v2274_v20  ;;  %v2280_v44 = vshll.u32 %v5270_v31, 16  ;;  %v5273_v16 = vld [vmem:[%s6268_s23 + $0x48] sm:$0xf] }
  0xb7   : > { %v1618_v3 = vpack.c.b16 %v1589_v47, %v1588_v46  ;;  %v2286_v45 = vshll.u32 %v5271_v32, 16  ;;  %v2290_v46 = vshrl.u32 %v5271_v32, 16  ;;  %v1161_v47 = vunpack.c.l.b16 %v839_v29 }
  0xb8   : > { %v1591_v51 = vunpack.c.l.b16 %v1482_v34  ;;  %v2587_v52 = vunpack.c.l.b16 %v2265_v35  ;;  %v2588_v53 = vunpack.c.l.b16 %v2275_v36  ;;  %v2279_v57 = vrot.slane %v2277_v43, 4 }
  0xb9   : > { %v2282_v58 = vrot.slane %v2280_v44, 5  ;;  %v2288_v59 = vrot.slane %v2286_v45, 5  ;;  %v2292_v60 = vrot.slane %v2290_v46, 4  ;;  %v2301_v27 = vshrl.u32 %v5273_v16, 16  ;;  %v720_v44 = vld [vmem:[%s6268_s23 + $0x44] sm:$0x1] }
  0xba   : > { %v2304_v29 = vshll.u32 %v5273_v16, 16 }
  0xbb   : > { %v2283_v7 = vor.u32 %v2282_v58, %v2279_v57  ;;  %v2303_v45 = vrot.slane %v2301_v27, 4 }
  0xbc   : > { %v2306_v46 = vrot.slane %v2304_v29, 5 }
  0xbd   : > { %v2284_v18 = vrot.slane %v2283_v7, 4  ;;  %v1495_v7 = vrot.slane %v720_v44, 5 }
  0xbe   : > { %v2307_v58 = vor.u32 %v2306_v46, %v2303_v45 }
  0xbf   : > { %v2289_v36 = vsel %vm6347_vm4, %v2284_v18, %v2288_v59  ;;  %v5276_v18 = vld [vmem:[%s6268_s23 + $0x54] sm:$0xf] }
  0xc0   : > { %1280 = vmatmul.bf16.gmra.mxu1 %v1188_v10  ;;  %1709 = vmatmul.bf16.gmra.mxu2 %v1617_v11  ;;  %v848_v10 = vrot.slane %v846_v62, 5  ;;  %v715_v11 = vld [vmem:[%s6268_s23 + $0x30] sm:$0xf] }
  0xc1   : > { %2024 = vmatmul.bf16.gmra.mxu3 %v5802_v14  ;;  %v844_v14 = vrot.slane %v843_v1, 4  ;;  %v851_v21 = vshrl.u32 %v715_v11, 16  ;;  %v854_v22 = vshll.u32 %v715_v11, 16  ;;  %v2616_v1 = vpack.c.b16 %v2588_v53, %v2587_v52  ;;  %v6480_v11 = vld [vmem:[%s6268_s23 + $0x40] sm:$0xf] }
  0xc2   : > { %2706 = vmatmul.bf16.gmra.mxu0 %v2614_v12  ;;  %v6447_v12 = vld [vmem:[%s6268_s23 + $0x34] sm:$0xf]  ;;  %v888_v26 = vshrl.u32 %v6480_v11, 16  ;;  %v1492_v57 = vrot.slane %v6480_v11, 5 }
  0xc3   : > { %v860_v23 = vshll.u32 %v6447_v12, 16  ;;  %v864_v25 = vshrl.u32 %v6447_v12, 16  ;;  %v849_v30 = vsel %vm6347_vm4, %v844_v14, %v848_v10  ;;  %v853_v37 = vrot.slane %v851_v21, 4  ;;  %v718_v10 = vld [vmem:[%s6268_s23 + $0x3c] sm:$0xf] }
  0xc4   : > { %v856_v38 = vrot.slane %v854_v22, 5  ;;  %v1162_v49 = vunpack.c.l.b16 %v849_v30  ;;  %v1485_v4 = vrot.slane %v6447_v12, 5  ;;  %v5054_v14 = vrot.slane %v1392_v6, 9  ;;  %v5274_v21 = vld [vmem:[%s6268_s23 + $0x4c] sm:$0xf] }
  0xc5   : > { %v6468_v39 = vrot.slane %v860_v23, 5  ;;  %v866_v40 = vrot.slane %v864_v25, 4  ;;  %v875_v22 = vshrl.u32 %v718_v10, 16  ;;  %v878_v23 = vshll.u32 %v718_v10, 16 }
  0xc6   : > { %v857_v54 = vor.u32 %v856_v38, %v853_v37  ;;  %v1190_v62 = vpack.c.b16 %v1162_v49, %v1161_v47  ;;  %v1487_v12 = vrot.slane %v1485_v4, 4  ;;  %v884_v25 = vshll.u32 %v6480_v11, 16  ;;  %v721_v11 = vld [vmem:[%s6268_s23 + $0x48] sm:$0xf] }
  0xc7   : > { %v867_v55 = vor.u32 %v866_v40, %v6468_v39  ;;  %v1486_v30 = vsel %vm6351_vm5, %v5054_v14, %v1485_v4  ;;  %v2310_v32 = vshll.u32 %v5274_v21, 16  ;;  %v2314_v33 = vshrl.u32 %v5274_v21, 16  ;;  %v5869_v14 = vld [vmem:[%s6263_s8 + $0x1e0] sm:$0xff] }
  0xc8   : > { %v858_v2 = vrot.slane %v857_v54, 4  ;;  %v1489_v31 = vsel %vm6351_vm5, %v1487_v12, %v1488_v15  ;;  %v877_v38 = vrot.slane %v875_v22, 4  ;;  %v6499_v40 = vrot.slane %v884_v25, 5  ;;  %v6518_v12 = vld [vmem:[%s6268_s23 + $0x4c] sm:$0xf]  ;;  %4119 = vmatpush.bf16.msra.mxu3 %v5869_v14 }
  0xc9   : > { %v890_v41 = vrot.slane %v888_v26, 4  ;;  %v1592_v42 = vunpack.c.l.b16 %v1486_v30  ;;  %v1593_v43 = vunpack.c.l.b16 %v1489_v31  ;;  %v2589_v47 = vunpack.c.l.b16 %v2289_v36 }
  0xca   : > { %v863_v13 = vsel %vm6347_vm4, %v858_v2, %v6468_v39  ;;  %v880_v39 = vrot.slane %v878_v23, 5  ;;  %v6502_v49 = vrot.slane %v2310_v32, 5  ;;  %v894_v54 = vshll.u32 %v720_v44, 16  ;;  %v5837_v32 = vld [vmem:[%s6263_s8 + $0x160] sm:$0xff] }
  0xcb   : > { %v1163_v34 = vunpack.c.l.b16 %v863_v13  ;;  %v891_v53 = vor.u32 %v890_v41, %v6499_v40  ;;  %v1620_v56 = vpack.c.b16 %v1593_v43, %v1592_v42  ;;  %v1494_v6 = vrot.slane %v1492_v57, 4  ;;  %v5861_v13 = vld [vmem:[%s6263_s8 + $0x1a0] sm:$0xff]  ;;  %3122 = vmatpush.bf16.msra.mxu1 %v5837_v32 }
  0xcc   : > { %v881_v52 = vor.u32 %v880_v39, %v877_v38  ;;  %v896_v4 = vrot.slane %v894_v54, 5  ;;  %3437 = vmatpush.bf16.msra.mxu2 %v5861_v13  ;;  %v899_v23 = vshrl.u32 %v721_v11, 16  ;;  %v902_v25 = vshll.u32 %v721_v11, 16  ;;  %v724_v11 = vld [vmem:[%s6268_s23 + $0x54] sm:$0xf] }
  0xcd   : > { %v1496_v22 = vsel %vm6351_vm5, %v1494_v6, %v1495_v7  ;;  %v908_v30 = vshll.u32 %v6518_v12, 16  ;;  %v912_v31 = vshrl.u32 %v6518_v12, 16 }
  0xce   : > { %v882_v2 = vrot.slane %v881_v52, 4  ;;  %v1595_v42 = vunpack.c.l.b16 %v1496_v22  ;;  %v901_v43 = vrot.slane %v899_v23, 4  ;;  %v904_v44 = vrot.slane %v902_v25, 5  ;;  %v5279_v22 = vld [vmem:[%s6268_s23 + $0x60] sm:$0xf] }
  0xcf   : > { %v923_v25 = vshrl.u32 %v724_v11, 16 }
  0xd0   : > { %1285 = vmatmul.bf16.gmra.mxu1 %v1189_v63  ;;  %1714 = vmatmul.bf16.gmra.mxu2 %v1618_v3  ;;  %v1619_v63 = vpack.c.b16 %v1591_v51, %v1590_v50  ;;  %v868_v3 = vrot.slane %v867_v55, 4  ;;  %v2316_v50 = vrot.slane %v2314_v33, 4  ;;  %v5275_v51 = vld [vmem:[%s6268_s23 + $0x50] sm:$0x1]  ;;  %v887_v16 = vsel %vm6347_vm4, %v882_v2, %v6499_v40  ;;  %v5877_v40 = vld [vmem:[%s6263_s8 + $0x220] sm:$0xff] }
  0xd1   : > { %2029 = vmatmul.bf16.gmra.mxu3 %v5803_v8  ;;  %v2293_v8 = vor.u32 %v2292_v60, %v2288_v59  ;;  %v5805_v60 = vld [vmem:[%s6268_s23 + $0x3c] sm:$0xff]  ;;  %v1165_v38 = vunpack.c.l.b16 %v887_v16  ;;  %4545 = vmatpush.bf16.msra.mxu0 %v5877_v40  ;;  %v2352_v40 = vshll.u32 %v5279_v22, 16 }
  0xd2   : > { %2711 = vmatmul.bf16.gmra.mxu0 %v2615_v9  ;;  %v2296_v9 = vshll.u32 %v5272_v61, 16  ;;  %v873_v17 = vsel %vm6347_vm4, %v868_v3, %v872_v5  ;;  %v892_v3 = vrot.slane %v891_v53, 4 }
  0xd3   : > { %v2294_v19 = vrot.slane %v2293_v8, 4  ;;  %v1164_v35 = vunpack.c.l.b16 %v873_v17  ;;  %v2308_v8 = vrot.slane %v2307_v58, 4 }
  0xd4   : > { %v2298_v20 = vrot.slane %v2296_v9, 5  ;;  %v897_v17 = vsel %vm6347_vm4, %v892_v3, %v896_v4  ;;  %v1394_v3 = vld [vmem:[%s6268_s23 + $0x48] sm:$0xe]  ;;  %v1499_v4 = vrot.slane %v6518_v12, 5 }
  0xd5   : > { %v1191_v55 = vpack.c.b16 %v1164_v35, %v1163_v34  ;;  %v2313_v27 = vsel %vm6347_vm4, %v2308_v8, %v6502_v49  ;;  %v2325_v34 = vshrl.u32 %v5276_v18, 16  ;;  %v2328_v35 = vshll.u32 %v5276_v18, 16 }
  0xd6   : > { %v2299_v37 = vsel %vm6347_vm4, %v2294_v19, %v2298_v20  ;;  %v5277_v19 = vld [vmem:[%s6268_s23 + $0x58] sm:$0xf]  ;;  %v1166_v39 = vunpack.c.l.b16 %v897_v17  ;;  %v2591_v45 = vunpack.c.l.b16 %v2313_v27  ;;  %v1501_v16 = vrot.slane %v1499_v4, 4 }
  0xd7   : > { %v2590_v48 = vunpack.c.l.b16 %v2299_v37  ;;  %v2334_v36 = vshll.u32 %v5277_v19, 16  ;;  %v2338_v37 = vshrl.u32 %v5277_v19, 16  ;;  %v6566_v17 = vld [vmem:[%s6268_s23 + $0x58] sm:$0xf]  ;;  %v926_v27 = vshll.u32 %v724_v11, 16 }
  0xd8   : > { %v1506_v11 = vrot.slane %v6566_v17, 5 }
  0xd9   : > { %v2617_v61 = vpack.c.b16 %v2590_v48, %v2589_v47  ;;  %v910_v47 = vrot.slane %v908_v30, 5  ;;  %v914_v48 = vrot.slane %v912_v31, 4  ;;  %v6549_v52 = vrot.slane %v2334_v36, 5 }
  0xda   : > { %v2340_v53 = vrot.slane %v2338_v37, 4 }
  0xdc   : > { %v2341_v7 = vor.u32 %v2340_v53, %v6549_v52  ;;  %v726_v53 = vld [vmem:[%s6268_s23 + $0x5c] sm:$0x1] }
  0xde   : > { %v2342_v19 = vrot.slane %v2341_v7, 4 }
  0xe0   : > { %1290 = vmatmul.bf16.gmra.mxu1 %v1190_v62  ;;  %1719 = vmatmul.bf16.gmra.mxu2 %v1619_v63  ;;  %v1393_v62 = vld [vmem:[%s6268_s23 + $0x3c] sm:$0xe]  ;;  %v2317_v63 = vor.u32 %v2316_v50, %v6502_v49  ;;  %v723_v49 = vld [vmem:[%s6268_s23 + $0x50] sm:$0x1]  ;;  %v2327_v50 = vrot.slane %v2325_v34, 4  ;;  %v932_v34 = vshll.u32 %v6566_v17, 16 }
  0xe1   : > { %2034 = vmatmul.bf16.gmra.mxu3 %v5804_v0  ;;  %v2320_v0 = vshll.u32 %v5275_v51, 16  ;;  %v5055_v5 = vrot.slane %v1393_v62, 9  ;;  %v2330_v51 = vrot.slane %v2328_v35, 5  ;;  %v5806_v62 = vld [vmem:[%s6268_s23 + $0x48] sm:$0xff]  ;;  %v918_v2 = vshll.u32 %v723_v49, 16 }
  0xe2   : > { %2716 = vmatmul.bf16.gmra.mxu0 %v2616_v1  ;;  %v2318_v9 = vrot.slane %v2317_v63, 4  ;;  %v1502_v12 = vrot.slane %v723_v49, 5  ;;  %v936_v35 = vshrl.u32 %v6566_v17, 16  ;;  %v928_v49 = vrot.slane %v926_v27, 5 }
  0xe3   : > { %v2322_v10 = vrot.slane %v2320_v0, 5  ;;  %v1493_v21 = vsel %vm6351_vm5, %v5055_v5, %v1492_v57  ;;  %v1192_v57 = vpack.c.b16 %v1166_v39, %v1165_v38  ;;  %v915_v0 = vor.u32 %v914_v48, %v910_v47 }
  0xe4   : > { %v1594_v41 = vunpack.c.l.b16 %v1493_v21  ;;  %v2331_v6 = vor.u32 %v2330_v51, %v2327_v50  ;;  %v920_v14 = vrot.slane %v918_v2, 5  ;;  %v1503_v38 = vsel %vm6351_vm5, %v1501_v16, %v1502_v12  ;;  %v1395_v12 = vld [vmem:[%s6268_s23 + $0x54] sm:$0xe] }
  0xe5   : > { %v2323_v29 = vsel %vm6347_vm4, %v2318_v9, %v2322_v10  ;;  %v5056_v10 = vrot.slane %v1394_v3, 9  ;;  %v916_v13 = vrot.slane %v915_v0, 4  ;;  %v2349_v39 = vshrl.u32 %v5279_v22, 16 }
  0xe6   : > { %v2592_v46 = vunpack.c.l.b16 %v2323_v29  ;;  %v1621_v58 = vpack.c.b16 %v1595_v42, %v1594_v41  ;;  %v2332_v18 = vrot.slane %v2331_v6, 4  ;;  %v5280_v29 = vld [vmem:[%s6268_s23 + $0x64] sm:$0xf]  ;;  %v925_v48 = vrot.slane %v923_v25, 4  ;;  %v5281_v6 = vld [vmem:[%s6268_s23 + $0x68] sm:$0x1] }
  0xe7   : > { %v1500_v32 = vsel %vm6351_vm5, %v5056_v10, %v1499_v4  ;;  %v921_v37 = vsel %vm6347_vm4, %v916_v13, %v920_v14  ;;  %v1597_v51 = vunpack.c.l.b16 %v1503_v38  ;;  %v942_v4 = vshll.u32 %v726_v53, 16  ;;  %v5807_v14 = vld [vmem:[%s6268_s23 + $0x54] sm:$0xff]  ;;  %v727_v25 = vld [vmem:[%s6268_s23 + $0x60] sm:$0xf] }
  0xe8   : > { %v2618_v63 = vpack.c.b16 %v2592_v46, %v2591_v45  ;;  %v2337_v42 = vsel %vm6347_vm4, %v2332_v18, %v6549_v52  ;;  %v2362_v45 = vshrl.u32 %v5280_v29, 16  ;;  %v1168_v50 = vunpack.c.l.b16 %v921_v37 }
  0xe9   : > { %v2351_v52 = vrot.slane %v2349_v39, 4  ;;  %v929_v3 = vor.u32 %v928_v49, %v925_v48  ;;  %v2368_v22 = vshll.u32 %v5281_v6, 16  ;;  %v947_v38 = vshrl.u32 %v727_v25, 16  ;;  %v5283_v49 = vld [vmem:[%s6268_s23 + $0x70] sm:$0xf] }
  0xea   : > { %v2364_v0 = vrot.slane %v2362_v45, 4  ;;  %v950_v39 = vshll.u32 %v727_v25, 16  ;;  %v5282_v45 = vld [vmem:[%s6268_s23 + $0x6c] sm:$0xf] }
  0xeb   : > { %v930_v27 = vrot.slane %v929_v3, 4  ;;  %v2373_v3 = vshrl.u32 %v5282_v45, 16  ;;  %v2376_v6 = vshll.u32 %v5282_v45, 16  ;;  %v1396_v45 = vld [vmem:[%s6268_s23 + $0x60] sm:$0xe] }
  0xed   : > { %v6507_v59 = vpop.f32.mrf.mxu1 }
  0xef   : > { %v6512_v1 = vpop.f32.mrf.mxu0 }
  0xf0   : > { %1295 = vmatmul.bf16.gmra.mxu1 %v1191_v55  ;;  %1724 = vmatmul.bf16.gmra.mxu2 %v1620_v56  ;;  %v5278_v55 = vld [vmem:[%s6268_s23 + $0x5c] sm:$0x1] }
  0xf1   : > { %2039 = vmatmul.bf16.gmra.mxu3 %v5805_v60  ;;  %v905_v60 = vor.u32 %v904_v44, %v901_v43  ;;  %v2344_v8 = vshll.u32 %v5278_v55, 16  ;;  %v2358_v44 = vshll.u32 %v5280_v29, 16  ;;  %v6594_v55 = vrot.slane %v932_v34, 5 }
  0xf2   : > { %2721 = vmatmul.bf16.gmra.mxu0 %v2617_v61  ;;  %v944_v29 = vrot.slane %v942_v4, 5  ;;  %v1509_v34 = vrot.slane %v726_v53, 5 }
  0xf3   : > { %v6520_v15 = vpop.f32.mrf.mxu2  ;;  %v906_v9 = vrot.slane %v905_v60, 4  ;;  %v2346_v21 = vrot.slane %v2344_v8, 5 }
  0xf4   : > { %v6529_v20 = vpop.f32.mrf.mxu3 }
  0xf5   : > { %v6535_v26 = vpop.f32.mrf.mxu1  ;;  %v911_v31 = vsel %vm6347_vm4, %v906_v9, %v910_v47  ;;  %v2347_v43 = vsel %vm6347_vm4, %v2342_v19, %v2346_v21  ;;  %v1596_v47 = vunpack.c.l.b16 %v1500_v32  ;;  %v1508_v32 = vrot.slane %v1506_v11, 4 }
  0xf6   : > { %v1167_v46 = vunpack.c.l.b16 %v911_v31  ;;  %v2594_v60 = vunpack.c.l.b16 %v2347_v43  ;;  %v5057_v31 = vrot.slane %v1395_v12, 9 }
  0xf7   : > { %v6545_v33 = vpop.f32.mrf.mxu0  ;;  %v1622_v9 = vpack.c.b16 %v1597_v51, %v1596_v47  ;;  %v935_v51 = vsel %vm6347_vm4, %v930_v27, %v6594_v55 }
  0xf8   : > { %v1193_v8 = vpack.c.b16 %v1168_v50, %v1167_v46  ;;  %v1169_v12 = vunpack.c.l.b16 %v935_v51 }
  0xfb   : > { %v6551_v54 = vpop.f32.mrf.mxu2 }
  0xfc   : > { %v6554_v56 = vpop.f32.mrf.mxu3 }
  0xfd   : > { %v6556_v61 = vpop.f32.mrf.mxu1 }
  0xff   : > { %v6561_v5 = vpop.f32.mrf.mxu0 }
 0x100   : > { %1300 = vmatmul.bf16.gmra.mxu1 %v1192_v57  ;;  %1729 = vmatmul.bf16.gmra.mxu2 %v1621_v58  ;;  %v938_v57 = vrot.slane %v936_v35, 4  ;;  %v2593_v58 = vunpack.c.l.b16 %v2337_v42  ;;  %v6614_v35 = vld [vmem:[%s6268_s23 + $0x64] sm:$0xf]  ;;  %v5868_v42 = vld [vmem:[%s6263_s8 + $0x1d8] sm:$0xff] }
 0x101   : > { %2044 = vmatmul.bf16.gmra.mxu3 %v5806_v62  ;;  %v2354_v62 = vrot.slane %v2352_v40, 5  ;;  %v5860_v40 = vld [vmem:[%s6263_s8 + $0x198] sm:$0xff]  ;;  %v956_v47 = vshll.u32 %v6614_v35, 16  ;;  %v960_v48 = vshrl.u32 %v6614_v35, 16  ;;  %v1513_v51 = vrot.slane %v6614_v35, 5 }
 0x102   : > { %2726 = vmatmul.bf16.gmra.mxu0 %v2618_v63  ;;  %v6596_v63 = vrot.slane %v2358_v44, 5  ;;  %v939_v10 = vor.u32 %v938_v57, %v6594_v55  ;;  %v2619_v16 = vpack.c.b16 %v2594_v60, %v2593_v58  ;;  %v2370_v44 = vrot.slane %v2368_v22, 5  ;;  %3438 = vmatpush.bf16.msra.mxu2 %v5860_v40  ;;  %v729_v22 = vld [vmem:[%s6268_s23 + $0x68] sm:$0x1]  ;;  %v5284_v40 = vld [vmem:[%s6268_s23 + $0x74] sm:$0x1] }
 0x103   : > { %v6569_v23 = vpop.f32.mrf.mxu2  ;;  %v2355_v18 = vor.u32 %v2354_v62, %v2351_v52  ;;  %4120 = vmatpush.bf16.msra.mxu3 %v5868_v42  ;;  %v1507_v57 = vsel %vm6351_vm5, %v5057_v31, %v1506_v11  ;;  %v1510_v58 = vsel %vm6351_vm5, %v1508_v32, %v1509_v34  ;;  %v949_v62 = vrot.slane %v947_v38, 4  ;;  %v5876_v11 = vld [vmem:[%s6263_s8 + $0x218] sm:$0xff] }
 0x104   : > { %v6572_v30 = vpop.f32.mrf.mxu3  ;;  %v2365_v21 = vor.u32 %v2364_v0, %v6596_v63  ;;  %v940_v17 = vrot.slane %v939_v10, 4  ;;  %v952_v0 = vrot.slane %v950_v39, 5  ;;  %v5836_v10 = vld [vmem:[%s6263_s8 + $0x158] sm:$0xff]  ;;  %4546 = vmatpush.bf16.msra.mxu0 %v5876_v11  ;;  %v2378_v31 = vrot.slane %v2376_v6, 5 }
 0x105   : > { %7799 = vst [vmem:[#allocation12_spill] sm:$0xff] %v6572_v30  ;;  %v6580_v36 = vpop.f32.mrf.mxu1  ;;  %v2356_v37 = vrot.slane %v2355_v18, 4  ;;  %3123 = vmatpush.bf16.msra.mxu1 %v5836_v10  ;;  %v966_v39 = vshll.u32 %v729_v22, 16  ;;  %v5058_v6 = vrot.slane %v1396_v45, 9  ;;  %v1515_v35 = vrot.slane %v1513_v51, 4 }
 0x106   : > { %v2366_v43 = vrot.slane %v2365_v21, 4  ;;  %v945_v53 = vsel %vm6347_vm4, %v940_v17, %v944_v29  ;;  %v1599_v21 = vunpack.c.l.b16 %v1510_v58  ;;  %v953_v29 = vor.u32 %v952_v0, %v949_v62 }
 0x107   : > { %v6586_v41 = vpop.f32.mrf.mxu0  ;;  %v2361_v52 = vsel %vm6347_vm4, %v2356_v37, %v6596_v63  ;;  %v1170_v18 = vunpack.c.l.b16 %v945_v53  ;;  %v1598_v63 = vunpack.c.l.b16 %v1507_v57  ;;  %v2375_v17 = vrot.slane %v2373_v3, 4  ;;  %v730_v53 = vld [vmem:[%s6268_s23 + $0x6c] sm:$0xf] }
 0x108   : > { %v2371_v4 = vsel %vm6347_vm4, %v2366_v43, %v2370_v44  ;;  %v2595_v25 = vunpack.c.l.b16 %v2361_v52  ;;  %v954_v58 = vrot.slane %v953_v29, 4  ;;  %v2392_v0 = vshll.u32 %v5284_v40, 16 }
 0x109   : > { %v2596_v27 = vunpack.c.l.b16 %v2371_v4  ;;  %v1194_v43 = vpack.c.b16 %v1170_v18, %v1169_v12  ;;  %v1623_v44 = vpack.c.b16 %v1599_v21, %v1598_v63  ;;  %v2379_v52 = vor.u32 %v2378_v31, %v2375_v17 }
 0x10a   : > { %v968_v4 = vrot.slane %v966_v39, 5  ;;  %v974_v10 = vshll.u32 %v730_v53, 16  ;;  %v1516_v11 = vrot.slane %v729_v22, 5  ;;  %v2394_v21 = vrot.slane %v2392_v0, 5 }
 0x10b   : > { %v6598_v2 = vpop.f32.mrf.mxu2  ;;  %v2380_v18 = vrot.slane %v2379_v52, 4  ;;  %v1514_v17 = vsel %vm6351_vm5, %v5058_v6, %v1513_v51  ;;  %v358_v52 = vld [vmem:[#allocation2 + $0xb0] sm:$0xff] }
 0x10c   : > { %v6601_v7 = vpop.f32.mrf.mxu3  ;;  %v1600_v0 = vunpack.c.l.b16 %v1514_v17 }
 0x10d   : > { %7800 = vst [vmem:[#allocation13_spill] sm:$0xff] %v6601_v7  ;;  %v6605_v13 = vpop.f32.mrf.mxu1 }
 0x10f   : > { %v6609_v19 = vpop.f32.mrf.mxu0 }
 0x110   : > { %1305 = vmatmul.bf16.gmra.mxu1 %v1193_v8  ;;  %1734 = vmatmul.bf16.gmra.mxu2 %v1622_v9  ;;  %v2382_v8 = vshll.u32 %v5283_v49, 16  ;;  %v2386_v9 = vshrl.u32 %v5283_v49, 16  ;;  %v2620_v49 = vpack.c.b16 %v2596_v27, %v2595_v25  ;;  %v5286_v25 = vld [vmem:[%s6268_s23 + $0x7c] sm:$0xf] }
 0x111   : > { %2049 = vmatmul.bf16.gmra.mxu3 %v5807_v14  ;;  %v6646_v14 = vrot.slane %v956_v47, 5  ;;  %v2406_v45 = vshll.u32 %v5286_v25, 16 }
 0x112   : > { %2731 = vmatmul.bf16.gmra.mxu0 %v2619_v16  ;;  %v962_v16 = vrot.slane %v960_v48, 4  ;;  %v6649_v32 = vrot.slane %v2382_v8, 5  ;;  %v2388_v34 = vrot.slane %v2386_v9, 4  ;;  %v5808_v48 = vld [vmem:[%s6268_s23 + $0x60] sm:$0xff]  ;;  %v6667_v8 = vld [vmem:[%s6268_s23 + $0x70] sm:$0xf] }
 0x113   : > { %v6619_v46 = vpop.f32.mrf.mxu2  ;;  %v971_v9 = vshrl.u32 %v730_v53, 16  ;;  %v959_v12 = vsel %vm6347_vm4, %v954_v58, %v6646_v14  ;;  %v980_v31 = vshll.u32 %v6667_v8, 16  ;;  %v984_v22 = vshrl.u32 %v6667_v8, 16 }
 0x114   : > { %v6624_v50 = vpop.f32.mrf.mxu3  ;;  %v963_v38 = vor.u32 %v962_v16, %v6646_v14  ;;  %v2389_v62 = vor.u32 %v2388_v34, %v6649_v32  ;;  %v5285_v16 = vld [vmem:[%s6268_s23 + $0x78] sm:$0xf]  ;;  %v976_v14 = vrot.slane %v974_v10, 5  ;;  %v1171_v51 = vunpack.c.l.b16 %v959_v12 }
 0x115   : > { %7801 = vst [vmem:[#allocation14_spill] sm:$0xff] %v6624_v50  ;;  %v6635_v60 = vpop.f32.mrf.mxu1  ;;  %v2397_v39 = vshrl.u32 %v5285_v16, 16  ;;  %v2400_v40 = vshll.u32 %v5285_v16, 16  ;;  %v2385_v53 = vsel %vm6347_vm4, %v2380_v18, %v6649_v32  ;;  %v6699_v32 = vrot.slane %v2406_v45, 5 }
 0x116   : > { %v964_v3 = vrot.slane %v963_v38, 4  ;;  %v2390_v63 = vrot.slane %v2389_v62, 4  ;;  %v973_v38 = vrot.slane %v971_v9, 4  ;;  %v6696_v9 = vld [vmem:[%s6268_s23 + $0x74] sm:$0x1]  ;;  %v2597_v16 = vunpack.c.l.b16 %v2385_v53  ;;  %v5809_v53 = vld [vmem:[%s6268_s23 + $0x6c] sm:$0xff] }
 0x117   : > { %v6640_v55 = vpop.f32.mrf.mxu0 }
 0x118   : > { %v969_v29 = vsel %vm6347_vm4, %v964_v3, %v968_v4  ;;  %v2395_v58 = vsel %vm6347_vm4, %v2390_v63, %v2394_v21  ;;  %v982_v3 = vrot.slane %v980_v31, 5  ;;  %v986_v4 = vrot.slane %v984_v22, 4  ;;  %v1397_v22 = vld [vmem:[%s6268_s23 + $0x6c] sm:$0xe] }
 0x119   : > { %v1172_v62 = vunpack.c.l.b16 %v969_v29  ;;  %v977_v10 = vor.u32 %v976_v14, %v973_v38  ;;  %v2598_v12 = vunpack.c.l.b16 %v2395_v58  ;;  %v671_v63 = vadd.f32 %v6512_v1, %v358_v52  ;;  %v733_v52 = vld [vmem:[%s6268_s23 + $0x78] sm:$0xf] }
 0x11a   : > { %v987_v17 = vor.u32 %v986_v4, %v982_v3  ;;  %v990_v31 = vshll.u32 %v6696_v9, 16  ;;  %v1520_v38 = vrot.slane %v6667_v8, 5 }
 0x11b   : > { %v6651_v37 = vpop.f32.mrf.mxu2  ;;  %v1195_v29 = vpack.c.b16 %v1172_v62, %v1171_v51  ;;  %v2621_v1 = vpack.c.b16 %v2598_v12, %v2597_v16  ;;  %v359_v51 = vld [vmem:[#allocation2] sm:$0xff]  ;;  %v995_v12 = vshrl.u32 %v733_v52, 16 }
 0x11c   : > { %v6655_v42 = vpop.f32.mrf.mxu3  ;;  %v988_v8 = vrot.slane %v987_v17, 4  ;;  %v5859_v17 = vld [vmem:[%s6263_s8 + $0x190] sm:$0xff] }
 0x11d   : > { %7802 = vst [vmem:[#allocation15_spill] sm:$0xff] %v6655_v42  ;;  %v6658_v47 = vpop.f32.mrf.mxu1  ;;  %3439 = vmatpush.bf16.msra.mxu2 %v5859_v17 }
 0x11f   : > { %v6663_v57 = vpop.f32.mrf.mxu0 }
 0x120   : > { %1310 = vmatmul.bf16.gmra.mxu1 %v1194_v43  ;;  %1739 = vmatmul.bf16.gmra.mxu2 %v1623_v44  ;;  %v1517_v44 = vsel %vm6351_vm5, %v1515_v35, %v1516_v11  ;;  %v2399_v35 = vrot.slane %v2397_v39, 4  ;;  %v2402_v11 = vrot.slane %v2400_v40, 5  ;;  %v978_v40 = vrot.slane %v977_v10, 4  ;;  %v6716_v10 = vld [vmem:[%s6268_s23 + $0x7c] sm:$0xf] }
 0x121   : > { %2054 = vmatmul.bf16.gmra.mxu3 %v5808_v48  ;;  %v2410_v48 = vshrl.u32 %v5286_v25, 16  ;;  %v1601_v6 = vunpack.c.l.b16 %v1517_v44  ;;  %v5287_v25 = vld [vmem:[%s6268_s23 + $0x80] sm:$0x1] }
 0x122   : > { %2736 = vmatmul.bf16.gmra.mxu0 %v2620_v49  ;;  %v2403_v44 = vor.u32 %v2402_v11, %v2399_v35  ;;  %v2416_v45 = vshll.u32 %v5287_v25, 16  ;;  %v983_v35 = vsel %vm6347_vm4, %v978_v40, %v982_v3  ;;  %v5288_v25 = vld [vmem:[%s6268_s23 + $0x84] sm:$0xf]  ;;  %v1008_v3 = vshrl.u32 %v6716_v10, 16 }
 0x123   : > { %v6674_v27 = vpop.f32.mrf.mxu2  ;;  %v2412_v18 = vrot.slane %v2410_v48, 4  ;;  %v1624_v39 = vpack.c.b16 %v1601_v6, %v1600_v0  ;;  %v1522_v0 = vrot.slane %v1520_v38, 4  ;;  %v1523_v6 = vrot.slane %v6696_v9, 5 }
 0x124   : > { %v6682_v34 = vpop.f32.mrf.mxu3  ;;  %v2404_v11 = vrot.slane %v2403_v44, 4  ;;  %v2418_v16 = vrot.slane %v2416_v45, 5  ;;  %v672_v9 = vadd.f32 %v6545_v33, %v359_v51  ;;  %v6731_v45 = vunpack.c.l.b16 %v983_v35 }
 0x125   : > { %7803 = vst [vmem:[#allocation16_spill] sm:$0xff] %v6682_v34  ;;  %v6684_v43 = vpop.f32.mrf.mxu1  ;;  %v2413_v58 = vor.u32 %v2412_v18, %v6699_v32  ;;  %v5059_v34 = vrot.slane %v1397_v22, 9  ;;  %v5867_v22 = vld [vmem:[%s6263_s8 + $0x1d0] sm:$0xff] }
 0x126   : > { %4121 = vmatpush.bf16.msra.mxu3 %v5867_v22  ;;  %v6741_v22 = vld [vmem:[%s6268_s23 + $0x80] sm:$0x1] }
 0x127   : > { %v6688_v49 = vpop.f32.mrf.mxu0  ;;  %v2414_v18 = vrot.slane %v2413_v58, 4 }
 0x129   : > { %v2419_v51 = vsel %vm6347_vm4, %v2414_v18, %v2418_v16  ;;  %v5290_v18 = vld [vmem:[%s6268_s23 + $0x8c] sm:$0x1] }
 0x12b   : > { %v6702_v21 = vpop.f32.mrf.mxu2 }
 0x12c   : > { %v6707_v14 = vpop.f32.mrf.mxu3 }
 0x12d   : > { %7804 = vst [vmem:[#allocation17_spill] sm:$0xff] %v6707_v14  ;;  %v1276_v48 = vpop.f32.mrf.mxu1  ;;  %v992_v14 = vrot.slane %v990_v31, 5  ;;  %v5289_v31 = vld [vmem:[%s6268_s23 + $0x88] sm:$0xf] }
 0x12e   : > { %v1356_v62 = vadd.f32 %v1276_v48, %v671_v63  ;;  %v998_v63 = vshll.u32 %v733_v52, 16  ;;  %v2421_v48 = vshrl.u32 %v5288_v25, 16  ;;  %v2434_v58 = vshrl.u32 %v5289_v31, 16 }
 0x12f   : > { %v6712_v4 = vpop.f32.mrf.mxu0  ;;  %v993_v44 = vsel %vm6347_vm4, %v988_v8, %v992_v14  ;;  %v2409_v14 = vsel %vm6347_vm4, %v2404_v11, %v6699_v32  ;;  %v997_v8 = vrot.slane %v995_v12, 4  ;;  %v360_v11 = vld [vmem:[#allocation2 + $0xd8] sm:$0xff] }
 0x130   : > { %1315 = vmatmul.bf16.gmra.mxu1 %v1195_v29  ;;  %1744 = vmatmul.bf16.gmra.mxu2 %v1624_v39  ;;  %v1521_v29 = vsel %vm6351_vm5, %v5059_v34, %v1520_v38  ;;  %v1004_v39 = vshll.u32 %v6716_v10, 16  ;;  %v1524_v34 = vsel %vm6351_vm5, %v1522_v0, %v1523_v6  ;;  %v2430_v38 = vshll.u32 %v5289_v31, 16  ;;  %v5835_v6 = vld [vmem:[%s6263_s8 + $0x150] sm:$0xff] }
 0x131   : > { %2059 = vmatmul.bf16.gmra.mxu3 %v5809_v53  ;;  %v2424_v53 = vshll.u32 %v5288_v25, 16  ;;  %v1000_v35 = vrot.slane %v998_v63, 5  ;;  %v1010_v0 = vrot.slane %v1008_v3, 4  ;;  %v5875_v31 = vld [vmem:[%s6263_s8 + $0x210] sm:$0xff]  ;;  %v1174_v42 = vunpack.c.l.b16 %v993_v44  ;;  %3124 = vmatpush.bf16.msra.mxu1 %v5835_v6 }
 0x132   : > { %2741 = vmatmul.bf16.gmra.mxu0 %v2621_v1  ;;  %v1602_v50 = vunpack.c.l.b16 %v1521_v29  ;;  %v2423_v7 = vrot.slane %v2421_v48, 4  ;;  %v1603_v16 = vunpack.c.l.b16 %v1524_v34  ;;  %v2599_v12 = vunpack.c.l.b16 %v2409_v14 }
 0x133   : > { %v1705_v40 = vpop.f32.mrf.mxu2  ;;  %v2426_v32 = vrot.slane %v2424_v53, 5  ;;  %v6748_v63 = vrot.slane %v2430_v38, 5  ;;  %4547 = vmatpush.bf16.msra.mxu0 %v5875_v31  ;;  %v1014_v3 = vshll.u32 %v6741_v22, 16  ;;  %v673_v48 = vadd.f32 %v6561_v5, %v360_v11  ;;  %v736_v31 = vld [vmem:[%s6268_s23 + $0x84] sm:$0xf] }
 0x134   : > { %v1785_v1 = vadd.f32 %v1705_v40, %v1356_v62  ;;  %v2020_v33 = vpop.f32.mrf.mxu3  ;;  %v6743_v40 = vrot.slane %v1004_v39, 5  ;;  %v1001_v39 = vor.u32 %v1000_v35, %v997_v8  ;;  %v1527_v34 = vrot.slane %v6716_v10, 5 }
 0x135   : > { %v1278_v52 = vpop.f32.mrf.mxu1  ;;  %v2427_v38 = vor.u32 %v2426_v32, %v2423_v7  ;;  %v1625_v8 = vpack.c.b16 %v1603_v16, %v1602_v50  ;;  %v1016_v5 = vrot.slane %v1014_v3, 5  ;;  %v6763_v32 = vld [vmem:[%s6268_s23 + $0x88] sm:$0xf]  ;;  %v1530_v50 = vrot.slane %v6741_v22, 5 }
 0x136   : > { %v2100_v62 = vadd.f32 %v2020_v33, %v1785_v1  ;;  %v1357_v25 = vadd.f32 %v1278_v52, %v672_v9  ;;  %v2436_v9 = vrot.slane %v2434_v58, 4  ;;  %v2600_v1 = vunpack.c.l.b16 %v2419_v51  ;;  %v1398_v33 = vld [vmem:[%s6268_s23 + $0x78] sm:$0xe] }
 0x137   : > { %v2704_v17 = vpop.f32.mrf.mxu0  ;;  %v1011_v29 = vor.u32 %v1010_v0, %v6743_v40  ;;  %v2440_v58 = vshll.u32 %v5290_v18, 16  ;;  %v1196_v51 = vpack.c.b16 %v1174_v42, %v6731_v45  ;;  %v1002_v6 = vrot.slane %v1001_v39, 4 }
 0x138   : > { %v6752_v44 = vadd.f32 %v6712_v4, %v2100_v62  ;;  %v2437_v4 = vor.u32 %v2436_v9, %v6748_v63  ;;  %v5810_v62 = vld [vmem:[%s6268_s23 + $0x78] sm:$0xff]  ;;  %v2622_v0 = vpack.c.b16 %v2600_v1, %v2599_v12  ;;  %v5060_v7 = vrot.slane %v1398_v33, 9 }
 0x139   : > { %v1012_v10 = vrot.slane %v1011_v29, 4  ;;  %v1529_v18 = vrot.slane %v1527_v34, 4  ;;  %v2428_v42 = vrot.slane %v2427_v38, 4  ;;  %v2442_v45 = vrot.slane %v2440_v58, 5 }
 0x13a   : > { %7805 = vst [vmem:[#allocation18_spill] sm:$0xff] %v6752_v44  ;;  %v2438_v16 = vrot.slane %v2437_v4, 4  ;;  %v1019_v12 = vshrl.u32 %v736_v31, 16  ;;  %v1022_v9 = vshll.u32 %v736_v31, 16  ;;  %v1028_v39 = vshll.u32 %v6763_v32, 16 }
 0x13b   : > { %v1707_v53 = vpop.f32.mrf.mxu2  ;;  %v1032_v3 = vshrl.u32 %v6763_v32, 16  ;;  %v1007_v22 = vsel %vm6347_vm4, %v1002_v6, %v6743_v40  ;;  %v1017_v33 = vsel %vm6347_vm4, %v1012_v10, %v1016_v5  ;;  %v1531_v38 = vsel %vm6351_vm5, %v1529_v18, %v1530_v50  ;;  %v362_v50 = vld [vmem:[#allocation2 + $0x50] sm:$0xff] }
 0x13c   : > { %v1786_v52 = vadd.f32 %v1707_v53, %v1357_v25  ;;  %v2022_v14 = vpop.f32.mrf.mxu3  ;;  %v361_v25 = vld [vmem:[#allocation2 + $0x18] sm:$0xff]  ;;  %v2433_v58 = vsel %vm6347_vm4, %v2428_v42, %v6748_v63  ;;  %v2443_v40 = vsel %vm6347_vm4, %v2438_v16, %v2442_v45  ;;  %v1175_v10 = vunpack.c.l.b16 %v1007_v22 }
 0x13d   : > { %v1281_v35 = vpop.f32.mrf.mxu1  ;;  %v674_v29 = vadd.f32 %v6586_v41, %v361_v25  ;;  %v5292_v41 = vld [vmem:[%s6268_s23 + $0x94] sm:$0xf]  ;;  %v1605_v18 = vunpack.c.l.b16 %v1531_v38  ;;  %v2601_v42 = vunpack.c.l.b16 %v2433_v58  ;;  %v2602_v45 = vunpack.c.l.b16 %v2443_v40 }
 0x13e   : > { %v2101_v11 = vadd.f32 %v2022_v14, %v1786_v52  ;;  %v1358_v44 = vadd.f32 %v1281_v35, %v673_v48  ;;  %v5291_v48 = vld [vmem:[%s6268_s23 + $0x90] sm:$0xf]  ;;  %v6788_v35 = vld [vmem:[%s6268_s23 + $0x8c] sm:$0x1]  ;;  %v2454_v63 = vshll.u32 %v5292_v41, 16  ;;  %v1534_v58 = vrot.slane %v6763_v32, 5 }
 0x13f   : > { %v2707_v30 = vpop.f32.mrf.mxu0  ;;  %v2448_v6 = vshll.u32 %v5291_v48, 16 }
 0x140   : > { %1320 = vmatmul.bf16.gmra.mxu1 %v1196_v51  ;;  %1749 = vmatmul.bf16.gmra.mxu2 %v1625_v8  ;;  %v6766_v1 = vadd.f32 %v2704_v17, %v2101_v11  ;;  %v1528_v17 = vsel %vm6351_vm5, %v5060_v7, %v1527_v34  ;;  %v1021_v51 = vrot.slane %v1019_v12, 4  ;;  %v1024_v8 = vrot.slane %v1022_v9, 5 }
 0x141   : > { %2064 = vmatmul.bf16.gmra.mxu3 %v5810_v62  ;;  %v6790_v62 = vrot.slane %v1028_v39, 5  ;;  %v1034_v34 = vrot.slane %v1032_v3, 4  ;;  %v1176_v7 = vunpack.c.l.b16 %v1017_v33  ;;  %v1604_v25 = vunpack.c.l.b16 %v1528_v17 }
 0x142   : > { %2746 = vmatmul.bf16.gmra.mxu0 %v2622_v0  ;;  %v2445_v0 = vshrl.u32 %v5291_v48, 16  ;;  %v1025_v16 = vor.u32 %v1024_v8, %v1021_v51  ;;  %v1038_v12 = vshll.u32 %v6788_v35, 16  ;;  %v2450_v3 = vrot.slane %v2448_v6, 5  ;;  %v1399_v48 = vld [vmem:[%s6268_s23 + $0x84] sm:$0xe] }
 0x143   : > { %v1710_v53 = vpop.f32.mrf.mxu2  ;;  %v1035_v9 = vor.u32 %v1034_v34, %v6790_v62  ;;  %v6797_v22 = vrot.slane %v2454_v63, 5  ;;  %v675_v33 = vadd.f32 %v6609_v19, %v362_v50  ;;  %v1197_v38 = vpack.c.b16 %v1176_v7, %v1175_v10  ;;  %v5811_v34 = vld [vmem:[%s6268_s23 + $0x84] sm:$0xff] }
 0x144   : > { %v1787_v52 = vadd.f32 %v1710_v53, %v1358_v44  ;;  %v2025_v14 = vpop.f32.mrf.mxu3  ;;  %v2458_v44 = vshrl.u32 %v5292_v41, 16  ;;  %v2447_v39 = vrot.slane %v2445_v0, 4  ;;  %v5293_v41 = vld [vmem:[%s6268_s23 + $0x98] sm:$0x1]  ;;  %v1626_v40 = vpack.c.b16 %v1605_v18, %v1604_v25 }
 0x145   : > { %v1283_v4 = vpop.f32.mrf.mxu1  ;;  %v2623_v51 = vpack.c.b16 %v2602_v45, %v2601_v42  ;;  %v1026_v8 = vrot.slane %v1025_v16, 4  ;;  %v1036_v0 = vrot.slane %v1035_v9, 4  ;;  %v1040_v6 = vrot.slane %v1038_v12, 5  ;;  %v6809_v42 = vld [vmem:[%s6268_s23 + $0x94] sm:$0xf] }
 0x146   : > { %v2102_v5 = vadd.f32 %v2025_v14, %v1787_v52  ;;  %v1359_v31 = vadd.f32 %v1283_v4, %v674_v29  ;;  %v2460_v53 = vrot.slane %v2458_v44, 4  ;;  %v739_v4 = vld [vmem:[%s6268_s23 + $0x90] sm:$0xf]  ;;  %v2451_v63 = vor.u32 %v2450_v3, %v2447_v39  ;;  %v363_v44 = vld [vmem:[#allocation2 + $0x68] sm:$0xff] }
 0x147   : > { %v2709_v11 = vpop.f32.mrf.mxu0  ;;  %v1536_v7 = vrot.slane %v1534_v58, 4  ;;  %v1537_v25 = vrot.slane %v6788_v35, 5  ;;  %v1043_v18 = vshrl.u32 %v739_v4, 16  ;;  %v1046_v45 = vshll.u32 %v739_v4, 16  ;;  %v5858_v3 = vld [vmem:[%s6263_s8 + $0x188] sm:$0xff] }
 0x148   : > { %v6794_v29 = vadd.f32 %v2707_v30, %v2102_v5  ;;  %v5061_v5 = vrot.slane %v1399_v48, 9  ;;  %v2461_v32 = vor.u32 %v2460_v53, %v6797_v22  ;;  %v676_v12 = vadd.f32 %v6640_v55, %v363_v44  ;;  %v5294_v35 = vld [vmem:[%s6268_s23 + $0x9c] sm:$0xf]  ;;  %v5866_v48 = vld [vmem:[%s6263_s8 + $0x1c8] sm:$0xff]  ;;  %3440 = vmatpush.bf16.msra.mxu2 %v5858_v3 }
 0x149   : > { %v1031_v9 = vsel %vm6347_vm4, %v1026_v8, %v6790_v62  ;;  %v2452_v39 = vrot.slane %v2451_v63, 4  ;;  %v1041_v53 = vsel %vm6347_vm4, %v1036_v0, %v1040_v6  ;;  %v1052_v62 = vshll.u32 %v6809_v42, 16  ;;  %4122 = vmatpush.bf16.msra.mxu3 %v5866_v48 }
 0x14a   : > { %v1048_v8 = vrot.slane %v1046_v45, 5  ;;  %v2472_v4 = vshll.u32 %v5294_v35, 16 }
 0x14b   : > { %v1712_v17 = vpop.f32.mrf.mxu2  ;;  %v2457_v0 = vsel %vm6347_vm4, %v2452_v39, %v6797_v22  ;;  %v6837_v22 = vld [vmem:[%s6268_s23 + $0x98] sm:$0x1] }
 0x14c   : > { %v1788_v52 = vadd.f32 %v1712_v17, %v1359_v31  ;;  %v2027_v14 = vpop.f32.mrf.mxu3  ;;  %v2464_v31 = vshll.u32 %v5293_v41, 16  ;;  %v1538_v41 = vsel %vm6351_vm5, %v1536_v7, %v1537_v25  ;;  %v5874_v7 = vld [vmem:[%s6263_s8 + $0x208] sm:$0xff]  ;;  %v364_v25 = vld [vmem:[#allocation2 + $0x30] sm:$0xff] }
 0x14d   : > { %v1286_v30 = vpop.f32.mrf.mxu1  ;;  %v1607_v45 = vunpack.c.l.b16 %v1538_v41  ;;  %4548 = vmatpush.bf16.msra.mxu0 %v5874_v7 }
 0x14e   : > { %v2103_v19 = vadd.f32 %v2027_v14, %v1788_v52  ;;  %v1360_v50 = vadd.f32 %v1286_v30, %v675_v33  ;;  %v1535_v33 = vsel %vm6351_vm5, %v5061_v5, %v1534_v58  ;;  %v2466_v17 = vrot.slane %v2464_v31, 5  ;;  %v5834_v31 = vld [vmem:[%s6263_s8 + $0x148] sm:$0xff] }
 0x14f   : > { %v6804_v10 = vpop.f32.mrf.mxu0  ;;  %v1045_v52 = vrot.slane %v1043_v18, 4  ;;  %v1056_v14 = vshrl.u32 %v6809_v42, 16  ;;  %v2469_v58 = vshrl.u32 %v5294_v35, 16  ;;  %v1178_v18 = vunpack.c.l.b16 %v1041_v53  ;;  %3125 = vmatpush.bf16.msra.mxu1 %v5834_v31 }
 0x150   : > { %1325 = vmatmul.bf16.gmra.mxu1 %v1197_v38  ;;  %1754 = vmatmul.bf16.gmra.mxu2 %v1626_v40  ;;  %v6811_v16 = vadd.f32 %v2709_v11, %v2103_v19  ;;  %v2462_v11 = vrot.slane %v2461_v32, 4  ;;  %v5295_v38 = vld [vmem:[%s6268_s23 + $0xa0] sm:$0xf]  ;;  %v1606_v32 = vunpack.c.l.b16 %v1535_v33  ;;  %v2603_v35 = vunpack.c.l.b16 %v2457_v0 }
 0x151   : > { %2069 = vmatmul.bf16.gmra.mxu3 %v5811_v34  ;;  %v1177_v34 = vunpack.c.l.b16 %v1031_v9  ;;  %v2478_v6 = vshll.u32 %v5295_v38, 16  ;;  %v2482_v5 = vshrl.u32 %v5295_v38, 16  ;;  %v1054_v9 = vrot.slane %v1052_v62, 5 }
 0x152   : > { %2751 = vmatmul.bf16.gmra.mxu0 %v2623_v51  ;;  %v1058_v3 = vrot.slane %v1056_v14, 4  ;;  %v1049_v39 = vor.u32 %v1048_v8, %v1045_v52  ;;  %v2471_v48 = vrot.slane %v2469_v58, 4  ;;  %v1062_v52 = vshll.u32 %v6837_v22, 16 }
 0x153   : > { %v1715_v55 = vpop.f32.mrf.mxu2  ;;  %v6839_v38 = vrot.slane %v2478_v6, 5  ;;  %v1198_v62 = vpack.c.b16 %v1178_v18, %v1177_v34  ;;  %v5812_v6 = vld [vmem:[%s6268_s23 + $0x90] sm:$0xff]  ;;  %v365_v18 = vld [vmem:[#allocation2 + $0x48] sm:$0xff] }
 0x154   : > { %v1789_v40 = vadd.f32 %v1715_v55, %v1360_v50  ;;  %v2030_v51 = vpop.f32.mrf.mxu3  ;;  %v2467_v50 = vsel %vm6347_vm4, %v2462_v11, %v2466_v17  ;;  %v2484_v11 = vrot.slane %v2482_v5, 4  ;;  %v677_v17 = vadd.f32 %v6663_v57, %v364_v25  ;;  %v5296_v55 = vld [vmem:[%s6268_s23 + $0xa4] sm:$0x1]  ;;  %v742_v25 = vld [vmem:[%s6268_s23 + $0x9c] sm:$0xf] }
 0x155   : > { %v1288_v30 = vpop.f32.mrf.mxu1  ;;  %v2604_v33 = vunpack.c.l.b16 %v2467_v50  ;;  %v1059_v14 = vor.u32 %v1058_v3, %v1054_v9 }
 0x156   : > { %v2104_v63 = vadd.f32 %v2030_v51, %v1789_v40  ;;  %v1361_v44 = vadd.f32 %v1288_v30, %v676_v12  ;;  %v2474_v12 = vrot.slane %v2472_v4, 5  ;;  %v1400_v40 = vld [vmem:[%s6268_s23 + $0x90] sm:$0xe]  ;;  %v1541_v51 = vrot.slane %v6809_v42, 5 }
 0x157   : > { %v2714_v19 = vpop.f32.mrf.mxu0  ;;  %v1627_v4 = vpack.c.b16 %v1607_v45, %v1606_v32  ;;  %v1050_v30 = vrot.slane %v1049_v39, 4  ;;  %v2624_v5 = vpack.c.b16 %v2604_v33, %v2603_v35  ;;  %v2485_v57 = vor.u32 %v2484_v11, %v6839_v38  ;;  %v6853_v45 = vld [vmem:[%s6268_s23 + $0xa0] sm:$0xf] }
 0x158   : > { %v6842_v53 = vadd.f32 %v6804_v10, %v2104_v63  ;;  %v2475_v0 = vor.u32 %v2474_v12, %v2471_v48  ;;  %v2488_v63 = vshll.u32 %v5296_v55, 16  ;;  %v5062_v7 = vrot.slane %v1400_v40, 9  ;;  %v5297_v48 = vld [vmem:[%s6268_s23 + $0xa8] sm:$0xf] }
 0x159   : > { %v1060_v42 = vrot.slane %v1059_v14, 4  ;;  %v1543_v32 = vrot.slane %v1541_v51, 4  ;;  %v1055_v3 = vsel %vm6347_vm4, %v1050_v30, %v1054_v9  ;;  %v1544_v35 = vrot.slane %v6837_v22, 5 }
 0x15a   : > { %v2476_v39 = vrot.slane %v2475_v0, 4  ;;  %v2486_v33 = vrot.slane %v2485_v57, 4  ;;  %v2490_v11 = vrot.slane %v2488_v63, 5  ;;  %v1070_v55 = vshll.u32 %v742_v25, 16 }
 0x15b   : > { %v1717_v41 = vpop.f32.mrf.mxu2  ;;  %v678_v14 = vadd.f32 %v6688_v49, %v365_v18  ;;  %v1076_v9 = vshll.u32 %v6853_v45, 16  ;;  %v1080_v22 = vshrl.u32 %v6853_v45, 16  ;;  %v6869_v40 = vunpack.c.l.b16 %v1055_v3 }
 0x15c   : > { %v1790_v8 = vadd.f32 %v1717_v41, %v1361_v44  ;;  %v2032_v58 = vpop.f32.mrf.mxu3  ;;  %v1064_v44 = vrot.slane %v1062_v52, 5  ;;  %v5298_v41 = vld [vmem:[%s6268_s23 + $0xac] sm:$0xf]  ;;  %v1545_v49 = vsel %vm6351_vm5, %v1543_v32, %v1544_v35  ;;  %v1072_v63 = vrot.slane %v1070_v55, 5 }
 0x15d   : > { %v1291_v10 = vpop.f32.mrf.mxu1  ;;  %v2502_v0 = vshll.u32 %v5298_v41, 16  ;;  %v6881_v18 = vrot.slane %v1076_v9, 5 }
 0x15e   : > { %v2105_v34 = vadd.f32 %v2032_v58, %v1790_v8  ;;  %v1362_v50 = vadd.f32 %v1291_v10, %v677_v17  ;;  %v1067_v17 = vshrl.u32 %v742_v25, 16  ;;  %v2493_v8 = vshrl.u32 %v5297_v48, 16 }
 0x15f   : > { %v2717_v31 = vpop.f32.mrf.mxu0  ;;  %v2496_v58 = vshll.u32 %v5297_v48, 16 }
 0x160   : > { %1330 = vmatmul.bf16.gmra.mxu1 %v1198_v62  ;;  %1759 = vmatmul.bf16.gmra.mxu2 %v1627_v4  ;;  %v6859_v12 = vadd.f32 %v2714_v19, %v2105_v34  ;;  %v1542_v62 = vsel %vm6351_vm5, %v5062_v7, %v1541_v51  ;;  %v1065_v19 = vsel %vm6347_vm4, %v1060_v42, %v1064_v44  ;;  %v2506_v51 = vshrl.u32 %v5298_v41, 16 }
 0x161   : > { %2074 = vmatmul.bf16.gmra.mxu3 %v5812_v6  ;;  %v2481_v6 = vsel %vm6347_vm4, %v2476_v39, %v6839_v38  ;;  %v1069_v57 = vrot.slane %v1067_v17, 4  ;;  %v1082_v42 = vrot.slane %v1080_v22, 4  ;;  %v1180_v44 = vunpack.c.l.b16 %v1065_v19  ;;  %v366_v38 = vld [vmem:[#allocation2 + $0x80] sm:$0xff] }
 0x162   : > { %2756 = vmatmul.bf16.gmra.mxu0 %v2624_v5  ;;  %v2491_v5 = vsel %vm6347_vm4, %v2486_v33, %v2490_v11  ;;  %v1608_v32 = vunpack.c.l.b16 %v1542_v62  ;;  %v2495_v3 = vrot.slane %v2493_v8, 4  ;;  %v2498_v35 = vrot.slane %v2496_v58, 5  ;;  %v1401_v62 = vld [vmem:[%s6268_s23 + $0x9c] sm:$0xe] }
 0x163   : > { %v1720_v52 = vpop.f32.mrf.mxu2  ;;  %v1609_v39 = vunpack.c.l.b16 %v1545_v49  ;;  %v2605_v48 = vunpack.c.l.b16 %v2481_v6  ;;  %v6883_v33 = vrot.slane %v2502_v0, 5  ;;  %v2508_v11 = vrot.slane %v2506_v51, 4 }
 0x164   : > { %v1791_v4 = vadd.f32 %v1720_v52, %v1362_v50  ;;  %v2035_v30 = vpop.f32.mrf.mxu3  ;;  %v6879_v50 = vld [vmem:[%s6268_s23 + $0xa4] sm:$0x1]  ;;  %v2606_v17 = vunpack.c.l.b16 %v2491_v5  ;;  %v1073_v55 = vor.u32 %v1072_v63, %v1069_v57  ;;  %v1083_v22 = vor.u32 %v1082_v42, %v6881_v18  ;;  %v5813_v5 = vld [vmem:[%s6268_s23 + $0x9c] sm:$0xff] }
 0x165   : > { %v1293_v10 = vpop.f32.mrf.mxu1  ;;  %v1086_v41 = vshll.u32 %v6879_v50, 16  ;;  %v1548_v52 = vrot.slane %v6853_v45, 5  ;;  %v679_v19 = vadd.f32 %v6507_v59, %v366_v38  ;;  %v1199_v58 = vpack.c.b16 %v1180_v44, %v6869_v40 }
 0x166   : > { %v2106_v34 = vadd.f32 %v2035_v30, %v1791_v4  ;;  %v1363_v7 = vadd.f32 %v1293_v10, %v678_v14  ;;  %v5299_v14 = vld [vmem:[%s6268_s23 + $0xb0] sm:$0x1]  ;;  %v2499_v4 = vor.u32 %v2498_v35, %v2495_v3  ;;  %v1628_v0 = vpack.c.b16 %v1609_v39, %v1608_v32  ;;  %v367_v32 = vld [vmem:[#allocation2 + $0x88] sm:$0xff] }
 0x167   : > { %v2719_v25 = vpop.f32.mrf.mxu0  ;;  %v2509_v51 = vor.u32 %v2508_v11, %v6883_v33  ;;  %v2512_v10 = vshll.u32 %v5299_v14, 16  ;;  %v2625_v57 = vpack.c.b16 %v2606_v17, %v2605_v48  ;;  %v1074_v63 = vrot.slane %v1073_v55, 4 }
 0x168   : > { %v6887_v9 = vadd.f32 %v2717_v31, %v2106_v34  ;;  %v745_v31 = vld [vmem:[%s6268_s23 + $0xa8] sm:$0xf]  ;;  %v1088_v34 = vrot.slane %v1086_v41, 5  ;;  %v5063_v45 = vrot.slane %v1401_v62, 9  ;;  %v1084_v40 = vrot.slane %v1083_v22, 4  ;;  %v5857_v22 = vld [vmem:[%s6263_s8 + $0x180] sm:$0xff] }
 0x169   : > { %v1550_v44 = vrot.slane %v1548_v52, 4  ;;  %v1551_v3 = vrot.slane %v6879_v50, 5  ;;  %v2500_v35 = vrot.slane %v2499_v4, 4  ;;  %v1091_v39 = vshrl.u32 %v745_v31, 16  ;;  %v5300_v62 = vld [vmem:[%s6268_s23 + $0xb4] sm:$0xf]  ;;  %3441 = vmatpush.bf16.msra.mxu2 %v5857_v22 }
 0x16a   : > { %v1094_v48 = vshll.u32 %v745_v31, 16  ;;  %v2510_v11 = vrot.slane %v2509_v51, 4  ;;  %v2514_v17 = vrot.slane %v2512_v10, 5  ;;  %v680_v50 = vadd.f32 %v6535_v26, %v367_v32  ;;  %v5301_v4 = vld [vmem:[%s6268_s23 + $0xb8] sm:$0xf]  ;;  %v368_v22 = vld [vmem:[#allocation2 + $0xe8] sm:$0xff] }
 0x16b   : > { %v1722_v8 = vpop.f32.mrf.mxu2  ;;  %v2505_v26 = vsel %vm6347_vm4, %v2500_v35, %v6883_v33  ;;  %v2517_v31 = vshrl.u32 %v5300_v62, 16  ;;  %v2526_v33 = vshll.u32 %v5301_v4, 16  ;;  %v5873_v35 = vld [vmem:[%s6263_s8 + $0x200] sm:$0xff] }
 0x16c   : > { %v1792_v30 = vadd.f32 %v1722_v8, %v1363_v7  ;;  %v2037_v49 = vpop.f32.mrf.mxu3  ;;  %v6900_v7 = vld [vmem:[%s6268_s23 + $0xac] sm:$0xf]  ;;  %v1079_v8 = vsel %vm6347_vm4, %v1074_v63, %v6881_v18  ;;  %v1096_v51 = vrot.slane %v1094_v48, 5  ;;  %4549 = vmatpush.bf16.msra.mxu0 %v5873_v35 }
 0x16d   : > { %v1296_v6 = vpop.f32.mrf.mxu1  ;;  %v1100_v41 = vshll.u32 %v6900_v7, 16  ;;  %v1104_v14 = vshrl.u32 %v6900_v7, 16 }
 0x16e   : > { %v2107_v42 = vadd.f32 %v2037_v49, %v1792_v30  ;;  %v1364_v59 = vadd.f32 %v1296_v6, %v679_v19  ;;  %v5865_v19 = vld [vmem:[%s6263_s8 + $0x1c0] sm:$0xff]  ;;  %v1552_v49 = vsel %vm6351_vm5, %v1550_v44, %v1551_v3  ;;  %v2520_v6 = vshll.u32 %v5300_v62, 16 }
 0x16f   : > { %v6897_v38 = vpop.f32.mrf.mxu0  ;;  %4123 = vmatpush.bf16.msra.mxu3 %v5865_v19  ;;  %v6929_v63 = vrot.slane %v1100_v41, 5  ;;  %v5833_v3 = vld [vmem:[%s6263_s8 + $0x140] sm:$0xff]  ;;  %v1611_v48 = vunpack.c.l.b16 %v1552_v49 }
 0x170   : > { %1335 = vmatmul.bf16.gmra.mxu1 %v1199_v58  ;;  %1764 = vmatmul.bf16.gmra.mxu2 %v1628_v0  ;;  %v6903_v55 = vadd.f32 %v2719_v25, %v2107_v42  ;;  %v1089_v58 = vsel %vm6347_vm4, %v1084_v40, %v1088_v34  ;;  %v1549_v25 = vsel %vm6351_vm5, %v5063_v45, %v1548_v52  ;;  %v1093_v0 = vrot.slane %v1091_v39, 4 }
 0x171   : > { %2079 = vmatmul.bf16.gmra.mxu3 %v5813_v5  ;;  %v2515_v52 = vsel %vm6347_vm4, %v2510_v11, %v2514_v17  ;;  %v1106_v34 = vrot.slane %v1104_v14, 4  ;;  %v2530_v45 = vshrl.u32 %v5301_v4, 16  ;;  %v1610_v32 = vunpack.c.l.b16 %v1549_v25  ;;  %3126 = vmatpush.bf16.msra.mxu1 %v5833_v3  ;;  %v5302_v4 = vld [vmem:[%s6268_s23 + $0xbc] sm:$0x1]  ;;  %v748_v3 = vld [vmem:[%s6268_s23 + $0xb4] sm:$0xf] }
 0x172   : > { %2761 = vmatmul.bf16.gmra.mxu0 %v2625_v57  ;;  %v6927_v57 = vld [vmem:[%s6268_s23 + $0xb0] sm:$0x1]  ;;  %v1182_v39 = vunpack.c.l.b16 %v1089_v58  ;;  %v2607_v11 = vunpack.c.l.b16 %v2505_v26  ;;  %v2608_v17 = vunpack.c.l.b16 %v2515_v52  ;;  %v1097_v62 = vor.u32 %v1096_v51, %v1093_v0  ;;  %v1402_v51 = vld [vmem:[%s6268_s23 + $0xa8] sm:$0xe] }
 0x173   : > { %v1725_v30 = vpop.f32.mrf.mxu2  ;;  %v1110_v41 = vshll.u32 %v6927_v57, 16  ;;  %v2519_v14 = vrot.slane %v2517_v31, 4  ;;  %v2522_v19 = vrot.slane %v2520_v6, 5  ;;  %v2532_v25 = vrot.slane %v2530_v45, 4 }
 0x174   : > { %v1793_v18 = vadd.f32 %v1725_v30, %v1364_v59  ;;  %v2040_v10 = vpop.f32.mrf.mxu3  ;;  %v1181_v59 = vunpack.c.l.b16 %v1079_v8  ;;  %v6935_v8 = vrot.slane %v2526_v33, 5  ;;  %v681_v30 = vadd.f32 %v6556_v61, %v368_v22  ;;  %v5814_v33 = vld [vmem:[%s6268_s23 + $0xa8] sm:$0xff]  ;;  %v6952_v22 = vld [vmem:[%s6268_s23 + $0xb8] sm:$0xf] }
 0x175   : > { %v1298_v5 = vpop.f32.mrf.mxu1  ;;  %v1629_v0 = vpack.c.b16 %v1611_v48, %v1610_v32  ;;  %v2626_v31 = vpack.c.b16 %v2608_v17, %v2607_v11  ;;  %v1098_v6 = vrot.slane %v1097_v62, 4  ;;  %v2536_v61 = vshll.u32 %v5302_v4, 16  ;;  %v369_v48 = vld [vmem:[#allocation2 + $0xb8] sm:$0xff] }
 0x176   : > { %v2108_v42 = vadd.f32 %v2040_v10, %v1793_v18  ;;  %v1365_v40 = vadd.f32 %v1298_v5, %v680_v50  ;;  %v1107_v50 = vor.u32 %v1106_v34, %v6929_v63  ;;  %v1200_v26 = vpack.c.b16 %v1182_v39, %v1181_v59 }
 0x177   : > { %v2724_v44 = vpop.f32.mrf.mxu0  ;;  %v1555_v18 = vrot.slane %v6900_v7, 5  ;;  %v2523_v5 = vor.u32 %v2522_v19, %v2519_v14  ;;  %v5064_v39 = vrot.slane %v1402_v51, 9  ;;  %v1103_v11 = vsel %vm6347_vm4, %v1098_v6, %v6929_v63  ;;  %v5304_v6 = vld [vmem:[%s6268_s23 + $0xc4] sm:$0xf] }
 0x178   : > { %v6938_v58 = vadd.f32 %v6897_v38, %v2108_v42  ;;  %v1108_v45 = vrot.slane %v1107_v50, 4  ;;  %v1112_v38 = vrot.slane %v1110_v41, 5  ;;  %v2533_v42 = vor.u32 %v2532_v25, %v6935_v8  ;;  %v5998_v25 = vld [vmem:[%s6268_s23 + $0x10] sm:$0xf] }
 0x179   : > { %v1557_v7 = vrot.slane %v1555_v18, 4  ;;  %v2524_v17 = vrot.slane %v2523_v5, 4  ;;  %v1115_v62 = vshrl.u32 %v748_v3, 16  ;;  %v2538_v19 = vrot.slane %v2536_v61, 5 }
 0x17a   : > { %v1113_v14 = vsel %vm6347_vm4, %v1108_v45, %v1112_v38  ;;  %v1118_v50 = vshll.u32 %v748_v3, 16  ;;  %v2880_v4 = vrot.slane %v5998_v25, 5  ;;  %v6964_v51 = vunpack.c.l.b16 %v1103_v11 }
 0x17b   : > { %v1727_v49 = vpop.f32.mrf.mxu2 }
 0x17c   : > { %v1794_v10 = vadd.f32 %v1727_v49, %v1365_v40  ;;  %v2042_v52 = vpop.f32.mrf.mxu3  ;;  %v1558_v40 = vrot.slane %v6927_v57, 5  ;;  %v2534_v57 = vrot.slane %v2533_v42, 4  ;;  %v682_v49 = vadd.f32 %v6580_v36, %v369_v48 }
 0x17d   : > { %v1301_v34 = vpop.f32.mrf.mxu1  ;;  %v2529_v36 = vsel %vm6347_vm4, %v2524_v17, %v6935_v8  ;;  %v1120_v42 = vrot.slane %v1118_v50, 5  ;;  %v2882_v17 = vrot.slane %v2880_v4, 4 }
 0x17e   : > { %v2109_v35 = vadd.f32 %v2042_v52, %v1794_v10  ;;  %v1366_v59 = vadd.f32 %v1301_v34, %v681_v30  ;;  %v5999_v30 = vld [vmem:[%s6268_s23 + $0x14] sm:$0x1]  ;;  %v1559_v10 = vsel %vm6351_vm5, %v1557_v7, %v1558_v40  ;;  %v1124_v52 = vshll.u32 %v6952_v22, 16 }
 0x17f   : > { %v2727_v32 = vpop.f32.mrf.mxu0  ;;  %v2883_v63 = vrot.slane %v5999_v30, 5  ;;  %v2539_v38 = vsel %vm6347_vm4, %v2534_v57, %v2538_v19  ;;  %v2554_v40 = vshrl.u32 %v5304_v6, 16  ;;  %v6979_v57 = vld [vmem:[%s6268_s23 + $0xbc] sm:$0x1] }
 0x180   : > { %1340 = vmatmul.bf16.gmra.mxu1 %v1200_v26  ;;  %1769 = vmatmul.bf16.gmra.mxu2 %v1629_v0  ;;  %v6954_v41 = vadd.f32 %v2724_v44, %v2109_v35  ;;  %v1556_v26 = vsel %vm6351_vm5, %v5064_v39, %v1555_v18  ;;  %v5303_v44 = vld [vmem:[%s6268_s23 + $0xc0] sm:$0xf]  ;;  %v1117_v18 = vrot.slane %v1115_v62, 4  ;;  %v6976_v25 = vrot.slane %v1124_v52, 5 }
 0x181   : > { %2084 = vmatmul.bf16.gmra.mxu3 %v5814_v33  ;;  %v1184_v33 = vunpack.c.l.b16 %v1113_v14  ;;  %v2541_v61 = vshrl.u32 %v5303_v44, 16  ;;  %v2544_v3 = vshll.u32 %v5303_v44, 16  ;;  %v370_v35 = vld [vmem:[#allocation2 + $0x60] sm:$0xff]  ;;  %v1612_v11 = vunpack.c.l.b16 %v1556_v26 }
 0x182   : > { %2766 = vmatmul.bf16.gmra.mxu0 %v2626_v31  ;;  %v1128_v31 = vshrl.u32 %v6952_v22, 16  ;;  %v1613_v14 = vunpack.c.l.b16 %v1559_v10  ;;  %v2609_v62 = vunpack.c.l.b16 %v2529_v36  ;;  %v2610_v30 = vunpack.c.l.b16 %v2539_v38 }
 0x183   : > { %v1730_v0 = vpop.f32.mrf.mxu2  ;;  %v683_v50 = vadd.f32 %v6605_v13, %v370_v35  ;;  %v2543_v44 = vrot.slane %v2541_v61, 4  ;;  %v1201_v26 = vpack.c.b16 %v1184_v33, %v6964_v51  ;;  %v2556_v52 = vrot.slane %v2554_v40, 4  ;;  %v5305_v13 = vld [vmem:[%s6268_s23 + $0xc8] sm:$0x1] }
 0x184   : > { %v1795_v5 = vadd.f32 %v1730_v0, %v1366_v59  ;;  %v2045_v34 = vpop.f32.mrf.mxu3  ;;  %v2550_v59 = vshll.u32 %v5304_v6, 16  ;;  %v1130_v8 = vrot.slane %v1128_v31, 4  ;;  %v2546_v0 = vrot.slane %v2544_v3, 5  ;;  %v5815_v3 = vld [vmem:[%s6268_s23 + $0xb4] sm:$0xff] }
 0x185   : > { %v1303_v45 = vpop.f32.mrf.mxu1  ;;  %v2884_v33 = vsel %vm6351_vm5, %v2882_v17, %v2883_v63  ;;  %v5578_v63 = vld [vmem:[%s6268_s23 + $0x18] sm:$0xf]  ;;  %v7003_v17 = vld [vmem:[%s6268_s23 + $0x1c] sm:$0xf] }
 0x186   : > { %v2110_v39 = vadd.f32 %v2045_v34, %v1795_v5  ;;  %v1367_v48 = vadd.f32 %v1303_v45, %v682_v49  ;;  %v1121_v49 = vor.u32 %v1120_v42, %v1117_v18  ;;  %v5354_v5 = vld [vmem:[%s6268_s23 + $0xc] sm:$0xe]  ;;  %v6986_v10 = vrot.slane %v2550_v59, 5 }
 0x187   : > { %v2729_v7 = vpop.f32.mrf.mxu0  ;;  %v5370_v31 = vrot.slane %v5354_v5, 9  ;;  %v1630_v34 = vpack.c.b16 %v1613_v14, %v1612_v11  ;;  %v1131_v36 = vor.u32 %v1130_v8, %v6976_v25  ;;  %v1562_v45 = vrot.slane %v6952_v22, 5 }
 0x188   : > { %v6981_v19 = vadd.f32 %v2727_v32, %v2110_v39  ;;  %v1134_v32 = vshll.u32 %v6979_v57, 16  ;;  %v2627_v42 = vpack.c.b16 %v2610_v30, %v2609_v62  ;;  %v1122_v35 = vrot.slane %v1121_v49, 4  ;;  %v371_v49 = vld [vmem:[#allocation2 + $0xf0] sm:$0xff] }
 0x189   : > { %v2881_v51 = vsel %vm6351_vm5, %v5370_v31, %v2880_v4  ;;  %v2547_v39 = vor.u32 %v2546_v0, %v2543_v44  ;;  %v3008_v40 = vunpack.c.l.b16 %v2884_v33  ;;  %v2557_v8 = vor.u32 %v2556_v52, %v6986_v10 }
 0x18a   : > { %v3007_v59 = vunpack.c.l.b16 %v2881_v51  ;;  %v2560_v62 = vshll.u32 %v5305_v13, 16  ;;  %v1136_v4 = vrot.slane %v1134_v32, 5  ;;  %v1132_v44 = vrot.slane %v1131_v36, 4 }
 0x18b   : > { %v1732_v6 = vpop.f32.mrf.mxu2  ;;  %v1564_v0 = vrot.slane %v1562_v45, 4  ;;  %v1565_v31 = vrot.slane %v6979_v57, 5  ;;  %v1127_v52 = vsel %vm6347_vm4, %v1122_v35, %v6976_v25  ;;  %v3604_v13 = vshrl.u32 %v5578_v63, 16 }
 0x18c   : > { %v1796_v18 = vadd.f32 %v1732_v6, %v1367_v48  ;;  %v2047_v38 = vpop.f32.mrf.mxu3  ;;  %v1403_v48 = vld [vmem:[%s6268_s23 + $0xb4] sm:$0xe]  ;;  %v6999_v30 = vpack.c.b16 %v3008_v40, %v3007_v59  ;;  %v2558_v6 = vrot.slane %v2557_v8, 4  ;;  %v684_v36 = vadd.f32 %v6635_v60, %v371_v49  ;;  %v5580_v49 = vld [vmem:[%s6268_s23 + $0x20] sm:$0x1] }
 0x18d   : > { %v1306_v61 = vpop.f32.mrf.mxu1  ;;  %v1137_v57 = vsel %vm6347_vm4, %v1132_v44, %v1136_v4 }
 0x18e   : > { %v2111_v22 = vadd.f32 %v2047_v38, %v1796_v18  ;;  %v1368_v11 = vadd.f32 %v1306_v61, %v683_v50  ;;  %v5065_v50 = vrot.slane %v1403_v48, 9  ;;  %v3607_v18 = vshll.u32 %v5578_v63, 16 }
 0x18f   : > { %v2732_v14 = vpop.f32.mrf.mxu0  ;;  %v3617_v38 = vshrl.u32 %v7003_v17, 16  ;;  %v1185_v61 = vunpack.c.l.b16 %v1127_v52  ;;  %v1186_v4 = vunpack.c.l.b16 %v1137_v57 }
 0x190   : > { %1345 = vmatmul.bf16.gmra.mxu1 %v1201_v26  ;;  %1774 = vmatmul.bf16.gmra.mxu2 %v1630_v34  ;;  %v7005_v5 = vadd.f32 %v2729_v7, %v2111_v22  ;;  %v2548_v26 = vrot.slane %v2547_v39, 4  ;;  %v2562_v34 = vrot.slane %v2560_v62, 5  ;;  %v3613_v7 = vshll.u32 %v7003_v17, 16  ;;  %v372_v62 = vld [vmem:[#allocation2 + $0x8] sm:$0xff] }
 0x191   : > { %2089 = vmatmul.bf16.gmra.mxu3 %v5815_v3  ;;  %v1563_v25 = vsel %vm6351_vm5, %v5065_v50, %v1562_v45  ;;  %v1566_v3 = vsel %vm6351_vm5, %v1564_v0, %v1565_v31  ;;  %v3606_v22 = vrot.slane %v3604_v13, 4  ;;  %v3619_v8 = vrot.slane %v3617_v38, 4 }
 0x192   : > { %2771 = vmatmul.bf16.gmra.mxu0 %v2627_v42  ;;  %v2553_v60 = vsel %vm6347_vm4, %v2548_v26, %v6986_v10  ;;  %v2563_v40 = vsel %vm6347_vm4, %v2558_v6, %v2562_v34  ;;  %v3615_v48 = vrot.slane %v3613_v7, 5  ;;  %v1614_v45 = vunpack.c.l.b16 %v1563_v25 }
 0x193   : > { %v1735_v32 = vpop.f32.mrf.mxu2  ;;  %v1615_v63 = vunpack.c.l.b16 %v1566_v3  ;;  %v2611_v50 = vunpack.c.l.b16 %v2553_v60  ;;  %v2612_v0 = vunpack.c.l.b16 %v2563_v40  ;;  %v685_v10 = vadd.f32 %v6658_v47, %v372_v62 }
 0x194   : > { %v1797_v42 = vadd.f32 %v1735_v32, %v1368_v11  ;;  %v2050_v51 = vpop.f32.mrf.mxu3  ;;  %v3609_v11 = vrot.slane %v3607_v18, 5  ;;  %v3620_v26 = vor.u32 %v3619_v8, %v3615_v48  ;;  %v3623_v6 = vshll.u32 %v5580_v49, 16 }
 0x195   : > { %v1308_v33 = vpop.f32.mrf.mxu1  ;;  %v1202_v13 = vpack.c.b16 %v1186_v4, %v1185_v61  ;;  %v1631_v18 = vpack.c.b16 %v1615_v63, %v1614_v45  ;;  %v4303_v7 = vrot.slane %v7003_v17, 5  ;;  %v4306_v60 = vrot.slane %v5580_v49, 5  ;;  %v5581_v17 = vld [vmem:[%s6268_s23 + $0x24] sm:$0xf] }
 0x196   : > { %v2112_v35 = vadd.f32 %v2050_v51, %v1797_v42  ;;  %v1369_v39 = vadd.f32 %v1308_v33, %v684_v36  ;;  %v3610_v52 = vor.u32 %v3609_v11, %v3606_v22  ;;  %v5816_v36 = vld [vmem:[%s6268_s23 + $0xc0] sm:$0xff]  ;;  %v2628_v42 = vpack.c.b16 %v2612_v0, %v2611_v50  ;;  %v7036_v22 = vld [vmem:[%s6268_s23 + $0x28] sm:$0xf] }
 0x197   : > { %v2734_v59 = vpop.f32.mrf.mxu0  ;;  %v3621_v25 = vrot.slane %v3620_v26, 4  ;;  %v3625_v3 = vrot.slane %v3623_v6, 5  ;;  %v4305_v61 = vrot.slane %v4303_v7, 4  ;;  %v3628_v0 = vshrl.u32 %v5581_v17, 16 }
 0x198   : > { %v7026_v44 = vadd.f32 %v2732_v14, %v2112_v35  ;;  %v5674_v14 = vld [vmem:[%s6268_s23 + $0x18] sm:$0xe]  ;;  %v3611_v47 = vrot.slane %v3610_v52, 4 }
 0x199   : > { %v373_v35 = vld [vmem:[#allocation2 + $0x78] sm:$0xff]  ;;  %v3626_v63 = vsel %vm6347_vm4, %v3621_v25, %v3625_v3  ;;  %v4307_v49 = vsel %vm6351_vm5, %v4305_v61, %v4306_v60 }
 0x19a   : > { %v686_v11 = vadd.f32 %v6684_v43, %v373_v35  ;;  %v3616_v62 = vsel %vm6347_vm4, %v3611_v47, %v3615_v48  ;;  %v3637_v43 = vshll.u32 %v7036_v22, 16  ;;  %v5841_v35 = vld [vmem:[%s6268_s23 + $0x18] sm:$0xff] }
 0x19b   : > { %v1737_v31 = vpop.f32.mrf.mxu2  ;;  %v4004_v6 = vunpack.c.l.b16 %v3616_v62  ;;  %v6000_v61 = vld [vmem:[%s6268_s23 + $0x1c] sm:$0xf] }
 0x19c   : > { %v1798_v34 = vadd.f32 %v1737_v31, %v1369_v39  ;;  %v2052_v32 = vpop.f32.mrf.mxu3  ;;  %v5690_v39 = vrot.slane %v5674_v14, 9  ;;  %v3641_v31 = vshrl.u32 %v7036_v22, 16  ;;  %v2887_v60 = vrot.slane %v6000_v61, 5 }
 0x19d   : > { %v1311_v38 = vpop.f32.mrf.mxu1 }
 0x19e   : > { %v2113_v51 = vadd.f32 %v2052_v32, %v1798_v34  ;;  %v1370_v33 = vadd.f32 %v1311_v38, %v685_v10  ;;  %v3631_v10 = vshll.u32 %v5581_v17, 16  ;;  %v4005_v34 = vunpack.c.l.b16 %v3626_v63 }
 0x19f   : > { %v2737_v57 = vpop.f32.mrf.mxu0  ;;  %v3630_v38 = vrot.slane %v3628_v0, 4  ;;  %v3643_v14 = vrot.slane %v3641_v31, 4  ;;  %v2889_v0 = vrot.slane %v2887_v60, 4 }
 0x1a0   : > { %1350 = vmatmul.bf16.gmra.mxu1 %v1202_v13  ;;  %1779 = vmatmul.bf16.gmra.mxu2 %v1631_v18  ;;  %v7032_v40 = vadd.f32 %v2734_v59, %v2113_v51  ;;  %v4304_v59 = vsel %vm6351_vm5, %v5690_v39, %v4303_v7  ;;  %v4431_v13 = vunpack.c.l.b16 %v4307_v49  ;;  %v374_v7 = vld [vmem:[#allocation2 + $0x38] sm:$0xff]  ;;  %v5583_v51 = vld [vmem:[%s6268_s23 + $0x2c] sm:$0x1]  ;;  %v4036_v39 = vpack.c.b16 %v4005_v34, %v4004_v6  ;;  %v5675_v49 = vld [vmem:[%s6268_s23 + $0x24] sm:$0xe] }
 0x1a1   : > { %2094 = vmatmul.bf16.gmra.mxu3 %v5816_v36  ;;  %v4430_v32 = vunpack.c.l.b16 %v4304_v59  ;;  %v3633_v36 = vrot.slane %v3631_v10, 5  ;;  %v687_v47 = vadd.f32 %v6520_v15, %v374_v7  ;;  %v4310_v59 = vrot.slane %v7036_v22, 5  ;;  %v5584_v10 = vld [vmem:[%s6268_s23 + $0x30] sm:$0xf] }
 0x1a2   : > { %2776 = vmatmul.bf16.gmra.mxu0 %v2628_v42  ;;  %v7051_v42 = vrot.slane %v3637_v43, 5  ;;  %v7064_v43 = vld [vmem:[%s6268_s23 + $0x34] sm:$0xf]  ;;  %v5691_v22 = vrot.slane %v5675_v49, 9 }
 0x1a3   : > { %v1740_v8 = vpop.f32.mrf.mxu2  ;;  %v4462_v17 = vpack.c.b16 %v4431_v13, %v4430_v32  ;;  %v4312_v7 = vrot.slane %v4310_v59, 4 }
 0x1a4   : > { %v1799_v4 = vadd.f32 %v1740_v8, %v1370_v33  ;;  %v2055_v45 = vpop.f32.mrf.mxu3  ;;  %v3634_v8 = vor.u32 %v3633_v36, %v3630_v38  ;;  %v3644_v62 = vor.u32 %v3643_v14, %v7051_v42  ;;  %v4313_v38 = vrot.slane %v5583_v51, 5 }
 0x1a5   : > { %v1313_v50 = vpop.f32.mrf.mxu1  ;;  %v3652_v36 = vshrl.u32 %v5584_v10, 16  ;;  %v3655_v14 = vshll.u32 %v5584_v10, 16  ;;  %v376_v10 = vld [vmem:[#allocation2 + $0x40] sm:$0xff] }
 0x1a6   : > { %v2114_v48 = vadd.f32 %v2055_v45, %v1799_v4  ;;  %v1371_v52 = vadd.f32 %v1313_v50, %v686_v11  ;;  %v5355_v11 = vld [vmem:[%s6268_s23 + $0x18] sm:$0xe]  ;;  %v3647_v4 = vshll.u32 %v5583_v51, 16  ;;  %v3635_v34 = vrot.slane %v3634_v8, 4 }
 0x1a7   : > { %v2739_v26 = vpop.f32.mrf.mxu0  ;;  %v5371_v50 = vrot.slane %v5355_v11, 9  ;;  %v3645_v32 = vrot.slane %v3644_v62, 4  ;;  %v4311_v8 = vsel %vm6351_vm5, %v5691_v22, %v4310_v59  ;;  %v3654_v62 = vrot.slane %v3652_v36, 4  ;;  %v5356_v22 = vld [vmem:[%s6268_s23 + $0x24] sm:$0xe] }
 0x1a8   : > { %v7049_v18 = vadd.f32 %v2737_v57, %v2114_v48  ;;  %v375_v48 = vld [vmem:[#allocation2 + $0x58] sm:$0xff]  ;;  %v3649_v13 = vrot.slane %v3647_v4, 5  ;;  %v3640_v51 = vsel %vm6347_vm4, %v3635_v34, %v7051_v42  ;;  %v3657_v4 = vrot.slane %v3655_v14, 5  ;;  %v6002_v34 = vld [vmem:[%s6268_s23 + $0x28] sm:$0xf] }
 0x1a9   : > { %v689_v36 = vadd.f32 %v6569_v23, %v376_v10 }
 0x1ab   : > { %v1742_v33 = vpop.f32.mrf.mxu2 }
 0x1ac   : > { %v1800_v25 = vadd.f32 %v1742_v33, %v1371_v52  ;;  %v2057_v3 = vpop.f32.mrf.mxu3  ;;  %v6001_v52 = vld [vmem:[%s6268_s23 + $0x20] sm:$0x1]  ;;  %v3661_v33 = vshll.u32 %v7064_v43, 16 }
 0x1ad   : > { %v1316_v57 = vpop.f32.mrf.mxu1  ;;  %v2890_v6 = vrot.slane %v6001_v52, 5 }
 0x1ae   : > { %v2115_v45 = vadd.f32 %v2057_v3, %v1800_v25  ;;  %v1372_v63 = vadd.f32 %v1316_v57, %v687_v47  ;;  %v3665_v47 = vshrl.u32 %v7064_v43, 16  ;;  %v3650_v57 = vsel %vm6347_vm4, %v3645_v32, %v3649_v13 }
 0x1af   : > { %v2742_v15 = vpop.f32.mrf.mxu0  ;;  %v2891_v61 = vsel %vm6351_vm5, %v2889_v0, %v2890_v6  ;;  %v4007_v52 = vunpack.c.l.b16 %v3650_v57  ;;  %v4432_v6 = vunpack.c.l.b16 %v4311_v8  ;;  %v2894_v32 = vrot.slane %v6002_v34, 5 }
 0x1b0   : > { %3127 = vmatmul.bf16.vlgmr.msra.gmra.mxu1 %v6999_v30  ;;  %3442 = vmatmul.bf16.vlgmr.msra.gmra.mxu2 %v5841_v35  ;;  %v7066_v31 = vadd.f32 %v2739_v26, %v2115_v45  ;;  %v688_v26 = vadd.f32 %v6551_v54, %v375_v48  ;;  %v7085_v45 = vrot.slane %v3661_v33, 5  ;;  %v3010_v49 = vunpack.c.l.b16 %v2891_v61 }
 0x1b1   : > { %4124 = vmatmul.bf16.vlgmr.msra.gmra.mxu3 %v4036_v39  ;;  %v2888_v39 = vsel %vm6351_vm5, %v5371_v50, %v2887_v60  ;;  %v4314_v60 = vsel %vm6351_vm5, %v4312_v7, %v4313_v38  ;;  %v5586_v50 = vld [vmem:[%s6268_s23 + $0x38] sm:$0x1]  ;;  %v4006_v48 = vunpack.c.l.b16 %v3640_v51  ;;  %v3658_v7 = vor.u32 %v3657_v4, %v3654_v62 }
 0x1b2   : > { %4550 = vmatmul.bf16.vlgmr.msra.gmra.mxu0 %v4462_v17  ;;  %v3009_v42 = vunpack.c.l.b16 %v2888_v39  ;;  %v4433_v59 = vunpack.c.l.b16 %v4314_v60  ;;  %v5676_v39 = vld [vmem:[%s6268_s23 + $0x30] sm:$0xe]  ;;  %v2896_v8 = vrot.slane %v2894_v32, 4  ;;  %v6003_v60 = vld [vmem:[%s6268_s23 + $0x2c] sm:$0x1] }
 0x1b3   : > { %v1745_v30 = vpop.f32.mrf.mxu2  ;;  %v2897_v62 = vrot.slane %v6003_v60, 5  ;;  %v3659_v23 = vrot.slane %v3658_v7, 4 }
 0x1b4   : > { %v1801_v25 = vadd.f32 %v1745_v30, %v1372_v63  ;;  %v2060_v3 = vpop.f32.mrf.mxu3  ;;  %v3667_v63 = vrot.slane %v3665_v47, 4  ;;  %v3671_v30 = vshll.u32 %v5586_v50, 16  ;;  %v3040_v33 = vpack.c.b16 %v3010_v49, %v3009_v42  ;;  %v5842_v47 = vld [vmem:[%s6268_s23 + $0x24] sm:$0xff] }
 0x1b5   : > { %v1318_v35 = vpop.f32.mrf.mxu1  ;;  %v4320_v49 = vrot.slane %v5586_v50, 5  ;;  %v3664_v50 = vsel %vm6347_vm4, %v3659_v23, %v7085_v45 }
 0x1b6   : > { %v2116_v17 = vadd.f32 %v2060_v3, %v1801_v25  ;;  %v1373_v11 = vadd.f32 %v1318_v35, %v688_v26  ;;  %v3668_v38 = vor.u32 %v3667_v63, %v7085_v45  ;;  %v4317_v26 = vrot.slane %v7064_v43, 5  ;;  %v377_v63 = vld [vmem:[#allocation2 + $0xc8] sm:$0xff] }
 0x1b7   : > { %v2744_v54 = vpop.f32.mrf.mxu0  ;;  %v4037_v3 = vpack.c.b16 %v4007_v52, %v4006_v48  ;;  %v4463_v35 = vpack.c.b16 %v4433_v59, %v4432_v6  ;;  %v3673_v4 = vrot.slane %v3671_v30, 5  ;;  %v5692_v43 = vrot.slane %v5676_v39, 9  ;;  %v5587_v48 = vld [vmem:[%s6268_s23 + $0x3c] sm:$0xf]  ;;  %v7102_v52 = vld [vmem:[%s6268_s23 + $0x40] sm:$0xf] }
 0x1b8   : > { %v7088_v0 = vadd.f32 %v2742_v15, %v2116_v17  ;;  %v5372_v17 = vrot.slane %v5356_v22, 9  ;;  %v4319_v42 = vrot.slane %v4317_v26, 4  ;;  %v690_v6 = vadd.f32 %v6598_v2, %v377_v63  ;;  %v378_v39 = vld [vmem:[#allocation2 + $0xe0] sm:$0xff] }
 0x1ba   : > { %v2895_v34 = vsel %vm6351_vm5, %v5372_v17, %v2894_v32  ;;  %v4321_v2 = vsel %vm6351_vm5, %v4319_v42, %v4320_v49  ;;  %v3676_v32 = vshrl.u32 %v5587_v48, 16 }
 0x1bb   : > { %v1747_v13 = vpop.f32.mrf.mxu2 }
 0x1bc   : > { %v1802_v15 = vadd.f32 %v1747_v13, %v1373_v11  ;;  %v2062_v14 = vpop.f32.mrf.mxu3  ;;  %v3669_v11 = vrot.slane %v3668_v38, 4  ;;  %v2898_v13 = vsel %vm6351_vm5, %v2896_v8, %v2897_v62  ;;  %v4318_v38 = vsel %vm6351_vm5, %v5692_v43, %v4317_v26 }
 0x1bd   : > { %v1321_v25 = vpop.f32.mrf.mxu1  ;;  %v3678_v8 = vrot.slane %v3676_v32, 4  ;;  %v5677_v32 = vld [vmem:[%s6268_s23 + $0x3c] sm:$0xe] }
 0x1be   : > { %v2117_v61 = vadd.f32 %v2062_v14, %v1802_v15  ;;  %v1374_v51 = vadd.f32 %v1321_v25, %v689_v36  ;;  %v3674_v7 = vsel %vm6347_vm4, %v3669_v11, %v3673_v4  ;;  %v3679_v36 = vshll.u32 %v5587_v48, 16  ;;  %v5589_v11 = vld [vmem:[%s6268_s23 + $0x44] sm:$0x1]  ;;  %v5843_v48 = vld [vmem:[%s6268_s23 + $0x30] sm:$0xff] }
 0x1bf   : > { %v2747_v57 = vpop.f32.mrf.mxu0  ;;  %v3685_v15 = vshll.u32 %v7102_v52, 16  ;;  %v3689_v14 = vshrl.u32 %v7102_v52, 16  ;;  %v3011_v25 = vunpack.c.l.b16 %v2895_v34  ;;  %v4009_v26 = vunpack.c.l.b16 %v3674_v7 }
 0x1c0   : > { %3132 = vmatmul.bf16.gmra.mxu1 %v3040_v33  ;;  %3447 = vmatmul.bf16.gmra.mxu2 %v5842_v47  ;;  %v7098_v10 = vadd.f32 %v2744_v54, %v2117_v61  ;;  %v4434_v61 = vunpack.c.l.b16 %v4318_v38  ;;  %v3681_v60 = vrot.slane %v3679_v36, 5  ;;  %v691_v4 = vadd.f32 %v6619_v46, %v378_v39 }
 0x1c1   : > { %4129 = vmatmul.bf16.gmra.mxu3 %v4037_v3  ;;  %v3012_v3 = vunpack.c.l.b16 %v2898_v13  ;;  %v7122_v62 = vrot.slane %v3685_v15, 5  ;;  %v3691_v23 = vrot.slane %v3689_v14, 4  ;;  %v3695_v7 = vshll.u32 %v5589_v11, 16  ;;  %v5590_v14 = vld [vmem:[%s6268_s23 + $0x48] sm:$0xf] }
 0x1c2   : > { %4555 = vmatmul.bf16.gmra.mxu0 %v4463_v35  ;;  %v4008_v35 = vunpack.c.l.b16 %v3664_v50  ;;  %v5357_v50 = vld [vmem:[%s6268_s23 + $0x30] sm:$0xe] }
 0x1c3   : > { %v1750_v59 = vpop.f32.mrf.mxu2  ;;  %v3041_v49 = vpack.c.b16 %v3012_v3, %v3011_v25  ;;  %v5373_v36 = vrot.slane %v5357_v50, 9  ;;  %v379_v25 = vld [vmem:[#allocation2 + $0x90] sm:$0xff]  ;;  %v6005_v3 = vld [vmem:[%s6268_s23 + $0x38] sm:$0x1] }
 0x1c4   : > { %v1803_v54 = vadd.f32 %v1750_v59, %v1374_v51  ;;  %v2065_v22 = vpop.f32.mrf.mxu3  ;;  %v4435_v51 = vunpack.c.l.b16 %v4321_v2  ;;  %v6004_v59 = vld [vmem:[%s6268_s23 + $0x34] sm:$0xf] }
 0x1c5   : > { %v1323_v30 = vpop.f32.mrf.mxu1  ;;  %v2901_v34 = vrot.slane %v6004_v59, 5 }
 0x1c6   : > { %v2118_v45 = vadd.f32 %v2065_v22, %v1803_v54  ;;  %v1375_v33 = vadd.f32 %v1323_v30, %v690_v6  ;;  %v4038_v6 = vpack.c.b16 %v4009_v26, %v4008_v35  ;;  %v4464_v13 = vpack.c.b16 %v4435_v51, %v4434_v61 }
 0x1c7   : > { %v2749_v47 = vpop.f32.mrf.mxu0  ;;  %v3682_v54 = vor.u32 %v3681_v60, %v3678_v8  ;;  %v3692_v22 = vor.u32 %v3691_v23, %v7122_v62  ;;  %v4324_v30 = vrot.slane %v7102_v52, 5  ;;  %v2903_v15 = vrot.slane %v2901_v34, 4 }
 0x1c8   : > { %v7120_v17 = vadd.f32 %v2747_v57, %v2118_v45  ;;  %v7134_v45 = vld [vmem:[%s6268_s23 + $0x4c] sm:$0xf]  ;;  %v2904_v35 = vrot.slane %v6005_v3, 5  ;;  %v3697_v61 = vrot.slane %v3695_v7, 5  ;;  %v5693_v51 = vrot.slane %v5677_v32, 9 }
 0x1c9   : > { %v3683_v39 = vrot.slane %v3682_v54, 4  ;;  %v3693_v26 = vrot.slane %v3692_v22, 4  ;;  %v4326_v52 = vrot.slane %v4324_v30, 4  ;;  %v4327_v8 = vrot.slane %v5589_v11, 5 }
 0x1ca   : > { %v3700_v23 = vshrl.u32 %v5590_v14, 16  ;;  %v2905_v59 = vsel %vm6351_vm5, %v2903_v15, %v2904_v35  ;;  %v4325_v54 = vsel %vm6351_vm5, %v5693_v51, %v4324_v30  ;;  %v5358_v51 = vld [vmem:[%s6268_s23 + $0x3c] sm:$0xe] }
 0x1cb   : > { %v1752_v63 = vpop.f32.mrf.mxu2  ;;  %v3688_v11 = vsel %vm6347_vm4, %v3683_v39, %v7122_v62  ;;  %v3014_v32 = vunpack.c.l.b16 %v2905_v59  ;;  %v4436_v35 = vunpack.c.l.b16 %v4325_v54  ;;  %v6006_v39 = vld [vmem:[%s6268_s23 + $0x40] sm:$0xf] }
 0x1cc   : > { %v1804_v43 = vadd.f32 %v1752_v63, %v1375_v33  ;;  %v2067_v42 = vpop.f32.mrf.mxu3  ;;  %v3709_v63 = vshll.u32 %v7134_v45, 16  ;;  %v3702_v22 = vrot.slane %v3700_v23, 4 }
 0x1cd   : > { %v1326_v57 = vpop.f32.mrf.mxu1 }
 0x1ce   : > { %v2119_v46 = vadd.f32 %v2067_v42, %v1804_v43  ;;  %v1376_v38 = vadd.f32 %v1326_v57, %v691_v4  ;;  %v3703_v4 = vshll.u32 %v5590_v14, 16  ;;  %v3713_v43 = vshrl.u32 %v7134_v45, 16  ;;  %v380_v14 = vld [vmem:[#allocation2 + $0x70] sm:$0xff] }
 0x1cf   : > { %v2752_v2 = vpop.f32.mrf.mxu0  ;;  %v3698_v57 = vsel %vm6347_vm4, %v3693_v26, %v3697_v61  ;;  %v2908_v26 = vrot.slane %v6006_v39, 5  ;;  %v693_v23 = vadd.f32 %v6674_v27, %v380_v14 }
 0x1d0   : > { %3137 = vmatmul.bf16.gmra.mxu1 %v3041_v49  ;;  %3452 = vmatmul.bf16.gmra.mxu2 %v5843_v48  ;;  %v7136_v33 = vadd.f32 %v2749_v47, %v2119_v46  ;;  %v692_v47 = vadd.f32 %v6651_v37, %v379_v25  ;;  %v3705_v7 = vrot.slane %v3703_v4, 5  ;;  %v7155_v46 = vrot.slane %v3709_v63, 5 }
 0x1d1   : > { %4134 = vmatmul.bf16.gmra.mxu3 %v4038_v6  ;;  %v2902_v6 = vsel %vm6351_vm5, %v5373_v36, %v2901_v34  ;;  %v4328_v34 = vsel %vm6351_vm5, %v4326_v52, %v4327_v8  ;;  %v5592_v36 = vld [vmem:[%s6268_s23 + $0x50] sm:$0x1]  ;;  %v4010_v25 = vunpack.c.l.b16 %v3688_v11  ;;  %v4011_v3 = vunpack.c.l.b16 %v3698_v57 }
 0x1d2   : > { %4560 = vmatmul.bf16.gmra.mxu0 %v4464_v13  ;;  %v3013_v62 = vunpack.c.l.b16 %v2902_v6  ;;  %v4437_v30 = vunpack.c.l.b16 %v4328_v34  ;;  %v3706_v52 = vor.u32 %v3705_v7, %v3702_v22  ;;  %v5678_v6 = vld [vmem:[%s6268_s23 + $0x48] sm:$0xe]  ;;  %v2910_v54 = vrot.slane %v2908_v26, 4  ;;  %v6007_v34 = vld [vmem:[%s6268_s23 + $0x44] sm:$0x1] }
 0x1d3   : > { %v1755_v60 = vpop.f32.mrf.mxu2  ;;  %v2911_v22 = vrot.slane %v6007_v34, 5 }
 0x1d4   : > { %v1805_v42 = vadd.f32 %v1755_v60, %v1376_v38  ;;  %v2070_v49 = vpop.f32.mrf.mxu3  ;;  %v3715_v38 = vrot.slane %v3713_v43, 4  ;;  %v3719_v60 = vshll.u32 %v5592_v36, 16  ;;  %v3042_v63 = vpack.c.b16 %v3014_v32, %v3013_v62  ;;  %v5844_v43 = vld [vmem:[%s6268_s23 + $0x3c] sm:$0xff] }
 0x1d5   : > { %v1328_v48 = vpop.f32.mrf.mxu1  ;;  %v3707_v27 = vrot.slane %v3706_v52, 4  ;;  %v4334_v32 = vrot.slane %v5592_v36, 5 }
 0x1d6   : > { %v2120_v13 = vadd.f32 %v2070_v49, %v1805_v42  ;;  %v1377_v50 = vadd.f32 %v1328_v48, %v692_v47  ;;  %v3716_v8 = vor.u32 %v3715_v38, %v7155_v46  ;;  %v4331_v47 = vrot.slane %v7134_v45, 5  ;;  %v381_v38 = vld [vmem:[#allocation2 + $0xc0] sm:$0xff] }
 0x1d7   : > { %v2754_v37 = vpop.f32.mrf.mxu0  ;;  %v4039_v49 = vpack.c.b16 %v4011_v3, %v4010_v25  ;;  %v4465_v48 = vpack.c.b16 %v4437_v30, %v4436_v35  ;;  %v3721_v7 = vrot.slane %v3719_v60, 5  ;;  %v5694_v45 = vrot.slane %v5678_v6, 9  ;;  %v5593_v25 = vld [vmem:[%s6268_s23 + $0x54] sm:$0xf]  ;;  %v7172_v3 = vld [vmem:[%s6268_s23 + $0x58] sm:$0xf] }
 0x1d8   : > { %v7158_v15 = vadd.f32 %v2752_v2, %v2120_v13  ;;  %v5374_v13 = vrot.slane %v5358_v51, 9  ;;  %v4333_v62 = vrot.slane %v4331_v47, 4  ;;  %v694_v35 = vadd.f32 %v6702_v21, %v381_v38  ;;  %v382_v6 = vld [vmem:[#allocation2 + $0xa8] sm:$0xff] }
 0x1d9   : > { %v3712_v36 = vsel %vm6347_vm4, %v3707_v27, %v7155_v46 }
 0x1da   : > { %v2909_v39 = vsel %vm6351_vm5, %v5374_v13, %v2908_v26  ;;  %v4335_v21 = vsel %vm6351_vm5, %v4333_v62, %v4334_v32  ;;  %v3724_v26 = vshrl.u32 %v5593_v25, 16 }
 0x1db   : > { %v1757_v61 = vpop.f32.mrf.mxu2 }
 0x1dc   : > { %v1806_v2 = vadd.f32 %v1757_v61, %v1377_v50  ;;  %v2072_v4 = vpop.f32.mrf.mxu3  ;;  %v3717_v50 = vrot.slane %v3716_v8, 4  ;;  %v2912_v61 = vsel %vm6351_vm5, %v2910_v54, %v2911_v22  ;;  %v4332_v8 = vsel %vm6351_vm5, %v5694_v45, %v4331_v47 }
 0x1dd   : > { %v1331_v42 = vpop.f32.mrf.mxu1  ;;  %v3726_v54 = vrot.slane %v3724_v26, 4  ;;  %v5679_v26 = vld [vmem:[%s6268_s23 + $0x54] sm:$0xe] }
 0x1de   : > { %v2121_v59 = vadd.f32 %v2072_v4, %v1806_v2  ;;  %v1378_v11 = vadd.f32 %v1331_v42, %v693_v23  ;;  %v3722_v52 = vsel %vm6347_vm4, %v3717_v50, %v3721_v7  ;;  %v3727_v23 = vshll.u32 %v5593_v25, 16  ;;  %v5595_v50 = vld [vmem:[%s6268_s23 + $0x5c] sm:$0x1]  ;;  %v5845_v25 = vld [vmem:[%s6268_s23 + $0x48] sm:$0xff] }
 0x1df   : > { %v2757_v57 = vpop.f32.mrf.mxu0  ;;  %v3733_v2 = vshll.u32 %v7172_v3, 16  ;;  %v3737_v4 = vshrl.u32 %v7172_v3, 16  ;;  %v3015_v42 = vunpack.c.l.b16 %v2909_v39  ;;  %v4013_v47 = vunpack.c.l.b16 %v3722_v52 }
 0x1e0   : > { %3142 = vmatmul.bf16.gmra.mxu1 %v3042_v63  ;;  %3457 = vmatmul.bf16.gmra.mxu2 %v5844_v43  ;;  %v7168_v14 = vadd.f32 %v2754_v37, %v2121_v59  ;;  %v4438_v59 = vunpack.c.l.b16 %v4332_v8  ;;  %v3729_v34 = vrot.slane %v3727_v23, 5  ;;  %v695_v7 = vadd.f32 %v6529_v20, %v382_v6 }
 0x1e1   : > { %4139 = vmatmul.bf16.gmra.mxu3 %v4039_v49  ;;  %v3016_v49 = vunpack.c.l.b16 %v2912_v61  ;;  %v7192_v22 = vrot.slane %v3733_v2, 5  ;;  %v3739_v27 = vrot.slane %v3737_v4, 4  ;;  %v3743_v52 = vshll.u32 %v5595_v50, 16  ;;  %v5596_v4 = vld [vmem:[%s6268_s23 + $0x60] sm:$0xf] }
 0x1e2   : > { %4565 = vmatmul.bf16.gmra.mxu0 %v4465_v48  ;;  %v4012_v48 = vunpack.c.l.b16 %v3712_v36  ;;  %v5359_v36 = vld [vmem:[%s6268_s23 + $0x48] sm:$0xe] }
 0x1e3   : > { %v1760_v30 = vpop.f32.mrf.mxu2  ;;  %v3043_v32 = vpack.c.b16 %v3016_v49, %v3015_v42  ;;  %v5375_v23 = vrot.slane %v5359_v36, 9  ;;  %v383_v42 = vld [vmem:[#allocation2 + $0xd0] sm:$0xff] }
 0x1e4   : > { %v1807_v37 = vadd.f32 %v1760_v30, %v1378_v11  ;;  %v2075_v51 = vpop.f32.mrf.mxu3  ;;  %v4439_v11 = vunpack.c.l.b16 %v4335_v21  ;;  %v6008_v30 = vld [vmem:[%s6268_s23 + $0x4c] sm:$0xf]  ;;  %v6009_v49 = vld [vmem:[%s6268_s23 + $0x50] sm:$0x1] }
 0x1e5   : > { %v1333_v60 = vpop.f32.mrf.mxu1  ;;  %v2915_v39 = vrot.slane %v6008_v30, 5 }
 0x1e6   : > { %v2122_v46 = vadd.f32 %v2075_v51, %v1807_v37  ;;  %v1379_v63 = vadd.f32 %v1333_v60, %v694_v35  ;;  %v4040_v35 = vpack.c.b16 %v4013_v47, %v4012_v48  ;;  %v4466_v61 = vpack.c.b16 %v4439_v11, %v4438_v59 }
 0x1e7   : > { %v2759_v43 = vpop.f32.mrf.mxu0  ;;  %v3730_v37 = vor.u32 %v3729_v34, %v3726_v54  ;;  %v3740_v51 = vor.u32 %v3739_v27, %v7192_v22  ;;  %v4338_v60 = vrot.slane %v7172_v3, 5  ;;  %v2917_v2 = vrot.slane %v2915_v39, 4 }
 0x1e8   : > { %v7190_v13 = vadd.f32 %v2757_v57, %v2122_v46  ;;  %v7204_v46 = vld [vmem:[%s6268_s23 + $0x64] sm:$0xf]  ;;  %v2918_v48 = vrot.slane %v6009_v49, 5  ;;  %v3745_v59 = vrot.slane %v3743_v52, 5  ;;  %v5695_v11 = vrot.slane %v5679_v26, 9 }
 0x1e9   : > { %v3731_v6 = vrot.slane %v3730_v37, 4  ;;  %v3741_v47 = vrot.slane %v3740_v51, 4  ;;  %v4340_v3 = vrot.slane %v4338_v60, 4  ;;  %v4341_v54 = vrot.slane %v5595_v50, 5 }
 0x1ea   : > { %v3748_v27 = vshrl.u32 %v5596_v4, 16  ;;  %v2919_v30 = vsel %vm6351_vm5, %v2917_v2, %v2918_v48  ;;  %v4339_v37 = vsel %vm6351_vm5, %v5695_v11, %v4338_v60  ;;  %v5360_v11 = vld [vmem:[%s6268_s23 + $0x54] sm:$0xe] }
 0x1eb   : > { %v1762_v38 = vpop.f32.mrf.mxu2  ;;  %v3736_v50 = vsel %vm6347_vm4, %v3731_v6, %v7192_v22  ;;  %v3018_v26 = vunpack.c.l.b16 %v2919_v30  ;;  %v4440_v48 = vunpack.c.l.b16 %v4339_v37  ;;  %v6010_v6 = vld [vmem:[%s6268_s23 + $0x58] sm:$0xf]  ;;  %v5680_v30 = vld [vmem:[%s6268_s23 + $0x60] sm:$0xe]  ;;  %v5376_v37 = vrot.slane %v5360_v11, 9 }
 0x1ec   : > { %v1808_v45 = vadd.f32 %v1762_v38, %v1379_v63  ;;  %v2077_v62 = vpop.f32.mrf.mxu3  ;;  %v3757_v38 = vshll.u32 %v7204_v46, 16  ;;  %v3750_v51 = vrot.slane %v3748_v27, 4  ;;  %v7806_v27 = vld [vmem:[#allocation12_spill] sm:$0xff] }
 0x1ed   : > { %v1336_v57 = vpop.f32.mrf.mxu1 }
 0x1ee   : > { %v2123_v20 = vadd.f32 %v2077_v62, %v1808_v45  ;;  %v1380_v8 = vadd.f32 %v1336_v57, %v695_v7  ;;  %v3751_v7 = vshll.u32 %v5596_v4, 16  ;;  %v3761_v45 = vshrl.u32 %v7204_v46, 16  ;;  %v384_v4 = vld [vmem:[#allocation2 + $0x10] sm:$0xff] }
 0x1ef   : > { %v2762_v21 = vpop.f32.mrf.mxu0  ;;  %v3746_v57 = vsel %vm6347_vm4, %v3741_v47, %v3745_v59  ;;  %v2922_v47 = vrot.slane %v6010_v6, 5  ;;  %v7807_v6 = vld [vmem:[#allocation13_spill] sm:$0xff] }
 0x1f0   : > { %3147 = vmatmul.bf16.gmra.mxu1 %v3043_v32  ;;  %3462 = vmatmul.bf16.gmra.mxu2 %v5845_v25  ;;  %v7206_v63 = vadd.f32 %v2759_v43, %v2123_v20  ;;  %v696_v43 = vadd.f32 %v6554_v56, %v383_v42  ;;  %v3753_v52 = vrot.slane %v3751_v7, 5  ;;  %v7225_v20 = vrot.slane %v3757_v38, 5 }
 0x1f1   : > { %4144 = vmatmul.bf16.gmra.mxu3 %v4040_v35  ;;  %v2916_v35 = vsel %vm6351_vm5, %v5375_v23, %v2915_v39  ;;  %v4342_v39 = vsel %vm6351_vm5, %v4340_v3, %v4341_v54  ;;  %v5598_v23 = vld [vmem:[%s6268_s23 + $0x68] sm:$0x1]  ;;  %v4014_v42 = vunpack.c.l.b16 %v3736_v50  ;;  %v4015_v49 = vunpack.c.l.b16 %v3746_v57 }
 0x1f2   : > { %4570 = vmatmul.bf16.gmra.mxu0 %v4466_v61  ;;  %v3017_v22 = vunpack.c.l.b16 %v2916_v35  ;;  %v4441_v60 = vunpack.c.l.b16 %v4342_v39  ;;  %v3754_v3 = vor.u32 %v3753_v52, %v3750_v51  ;;  %v697_v7 = vadd.f32 %v7806_v27, %v384_v4  ;;  %v6011_v51 = vld [vmem:[%s6268_s23 + $0x5c] sm:$0x1] }
 0x1f3   : > { %v1765_v34 = vpop.f32.mrf.mxu2  ;;  %v2924_v39 = vrot.slane %v2922_v47, 4  ;;  %v2925_v52 = vrot.slane %v6011_v51, 5 }
 0x1f4   : > { %v1809_v62 = vadd.f32 %v1765_v34, %v1380_v8  ;;  %v2080_v32 = vpop.f32.mrf.mxu3  ;;  %v3763_v8 = vrot.slane %v3761_v45, 4  ;;  %v3767_v34 = vshll.u32 %v5598_v23, 16  ;;  %v3044_v45 = vpack.c.b16 %v3018_v26, %v3017_v22  ;;  %v385_v22 = vld [vmem:[#allocation2 + $0x28] sm:$0xff] }
 0x1f5   : > { %v1338_v25 = vpop.f32.mrf.mxu1  ;;  %v4467_v35 = vpack.c.b16 %v4441_v60, %v4440_v48  ;;  %v5599_v48 = vld [vmem:[%s6268_s23 + $0x6c] sm:$0xf]  ;;  %v7242_v60 = vld [vmem:[%s6268_s23 + $0x70] sm:$0xf] }
 0x1f6   : > { %v2124_v61 = vadd.f32 %v2080_v32, %v1809_v62  ;;  %v1381_v36 = vadd.f32 %v1338_v25, %v696_v43  ;;  %v3764_v54 = vor.u32 %v3763_v8, %v7225_v20  ;;  %v5846_v43 = vld [vmem:[%s6268_s23 + $0x54] sm:$0xff]  ;;  %v4345_v62 = vrot.slane %v7204_v46, 5 }
 0x1f7   : > { %v2764_v56 = vpop.f32.mrf.mxu0  ;;  %v4041_v25 = vpack.c.b16 %v4015_v49, %v4014_v42  ;;  %v3755_v8 = vrot.slane %v3754_v3, 4  ;;  %v3769_v4 = vrot.slane %v3767_v34, 5  ;;  %v5696_v46 = vrot.slane %v5680_v30, 9 }
 0x1f8   : > { %v7228_v2 = vadd.f32 %v2762_v21, %v2124_v61  ;;  %v4347_v26 = vrot.slane %v4345_v62, 4  ;;  %v4348_v42 = vrot.slane %v5598_v23, 5  ;;  %v2923_v3 = vsel %vm6351_vm5, %v5376_v37, %v2922_v47  ;;  %v386_v37 = vld [vmem:[#allocation2 + $0xa0] sm:$0xff] }
 0x1f9   : > { %v3760_v23 = vsel %vm6347_vm4, %v3755_v8, %v7225_v20  ;;  %v3772_v47 = vshrl.u32 %v5599_v48, 16  ;;  %v3019_v30 = vunpack.c.l.b16 %v2923_v3  ;;  %v5847_v3 = vld [vmem:[%s6268_s23 + $0x60] sm:$0xff] }
 0x1fb   : > { %v1767_v59 = vpop.f32.mrf.mxu2  ;;  %v3774_v8 = vrot.slane %v3772_v47, 4 }
 0x1fc   : > { %v1810_v21 = vadd.f32 %v1767_v59, %v1381_v36  ;;  %v2082_v38 = vpop.f32.mrf.mxu3  ;;  %v3765_v36 = vrot.slane %v3764_v54, 4  ;;  %v698_v59 = vadd.f32 %v7807_v6, %v385_v22  ;;  %v2926_v54 = vsel %vm6351_vm5, %v2924_v39, %v2925_v52 }
 0x1fd   : > { %v1341_v32 = vpop.f32.mrf.mxu1 }
 0x1fe   : > { %v2125_v50 = vadd.f32 %v2082_v38, %v1810_v21  ;;  %v1382_v57 = vadd.f32 %v1341_v32, %v697_v7  ;;  %v3770_v27 = vsel %vm6347_vm4, %v3765_v36, %v3769_v4  ;;  %v4346_v7 = vsel %vm6351_vm5, %v5696_v46, %v4345_v62  ;;  %v5601_v46 = vld [vmem:[%s6268_s23 + $0x74] sm:$0x1] }
 0x1ff   : > { %v2767_v61 = vpop.f32.mrf.mxu0  ;;  %v4349_v21 = vsel %vm6351_vm5, %v4347_v26, %v4348_v42  ;;  %v3785_v32 = vshrl.u32 %v7242_v60, 16  ;;  %v4017_v62 = vunpack.c.l.b16 %v3770_v27  ;;  %v4442_v39 = vunpack.c.l.b16 %v4346_v7  ;;  %v7808_v26 = vld [vmem:[#allocation14_spill] sm:$0xff]  ;;  %v5361_v27 = vld [vmem:[%s6268_s23 + $0x60] sm:$0xe] }
 0x200   : > { %3152 = vmatmul.bf16.gmra.mxu1 %v3044_v45  ;;  %3467 = vmatmul.bf16.gmra.mxu2 %v5846_v43  ;;  %v7238_v49 = vadd.f32 %v2764_v56, %v2125_v50  ;;  %v3775_v45 = vshll.u32 %v5599_v48, 16  ;;  %v3781_v43 = vshll.u32 %v7242_v60, 16  ;;  %v3020_v50 = vunpack.c.l.b16 %v2926_v54 }
 0x201   : > { %4149 = vmatmul.bf16.gmra.mxu3 %v4041_v25  ;;  %v4443_v51 = vunpack.c.l.b16 %v4349_v21  ;;  %v3787_v22 = vrot.slane %v3785_v32, 4  ;;  %v699_v42 = vadd.f32 %v7808_v26, %v386_v37  ;;  %v4352_v32 = vrot.slane %v7242_v60, 5 }
 0x202   : > { %4575 = vmatmul.bf16.gmra.mxu0 %v4467_v35  ;;  %v3777_v36 = vrot.slane %v3775_v45, 5  ;;  %v7262_v4 = vrot.slane %v3781_v43, 5 }
 0x203   : > { %v1770_v11 = vpop.f32.mrf.mxu2  ;;  %v4354_v60 = vrot.slane %v4352_v32, 4 }
 0x204   : > { %v1811_v56 = vadd.f32 %v1770_v11, %v1382_v57  ;;  %v2085_v34 = vpop.f32.mrf.mxu3  ;;  %v4016_v57 = vunpack.c.l.b16 %v3760_v23  ;;  %v3045_v11 = vpack.c.b16 %v3020_v50, %v3019_v30  ;;  %v6012_v23 = vld [vmem:[%s6268_s23 + $0x64] sm:$0xf]  ;;  %v3778_v7 = vor.u32 %v3777_v36, %v3774_v8  ;;  %v5602_v50 = vld [vmem:[%s6268_s23 + $0x78] sm:$0xf] }
 0x205   : > { %v1343_v38 = vpop.f32.mrf.mxu1  ;;  %v3788_v21 = vor.u32 %v3787_v22, %v7262_v4 }
 0x206   : > { %v2126_v20 = vadd.f32 %v2085_v34, %v1811_v56  ;;  %v1383_v25 = vadd.f32 %v1343_v38, %v698_v59  ;;  %v4042_v54 = vpack.c.b16 %v4017_v62, %v4016_v57  ;;  %v2929_v56 = vrot.slane %v6012_v23, 5  ;;  %v7274_v57 = vld [vmem:[%s6268_s23 + $0x7c] sm:$0xf] }
 0x207   : > { %v2769_v35 = vpop.f32.mrf.mxu0  ;;  %v4468_v34 = vpack.c.b16 %v4443_v51, %v4442_v39  ;;  %v3791_v38 = vshll.u32 %v5601_v46, 16  ;;  %v387_v62 = vld [vmem:[#allocation2 + $0xf8] sm:$0xff]  ;;  %v6013_v39 = vld [vmem:[%s6268_s23 + $0x68] sm:$0x1]  ;;  %v3779_v8 = vrot.slane %v3778_v7, 4  ;;  %v3789_v36 = vrot.slane %v3788_v21, 4 }
 0x208   : > { %v7260_v52 = vadd.f32 %v2767_v61, %v2126_v20  ;;  %v5681_v20 = vld [vmem:[%s6268_s23 + $0x6c] sm:$0xe]  ;;  %v2931_v30 = vrot.slane %v2929_v56, 4  ;;  %v2932_v51 = vrot.slane %v6013_v39, 5 }
 0x209   : > { %v3793_v22 = vrot.slane %v3791_v38, 5  ;;  %v5697_v26 = vrot.slane %v5681_v20, 9 }
 0x20a   : > { %v2933_v7 = vsel %vm6351_vm5, %v2931_v30, %v2932_v51  ;;  %v5604_v51 = vld [vmem:[%s6268_s23 + $0x80] sm:$0x1] }
 0x20b   : > { %v1772_v48 = vpop.f32.mrf.mxu2  ;;  %v3794_v21 = vsel %vm6347_vm4, %v3789_v36, %v3793_v22  ;;  %v3022_v39 = vunpack.c.l.b16 %v2933_v7  ;;  %v388_v36 = vld [vmem:[#allocation2 + $0x20] sm:$0xff]  ;;  %v4359_v7 = vrot.slane %v7274_v57, 5 }
 0x20c   : > { %v1812_v6 = vadd.f32 %v1772_v48, %v1383_v25  ;;  %v2087_v59 = vpop.f32.mrf.mxu3  ;;  %v5377_v25 = vrot.slane %v5361_v27, 9 }
 0x20d   : > { %v1346_v61 = vpop.f32.mrf.mxu1 }
 0x20e   : > { %v2127_v47 = vadd.f32 %v2087_v59, %v1812_v6  ;;  %v1384_v45 = vadd.f32 %v1346_v61, %v699_v42  ;;  %v4355_v42 = vrot.slane %v5601_v46, 5  ;;  %v3796_v6 = vshrl.u32 %v5602_v50, 16 }
 0x20f   : > { %v2772_v43 = vpop.f32.mrf.mxu0  ;;  %v3799_v59 = vshll.u32 %v5602_v50, 16  ;;  %v2930_v27 = vsel %vm6351_vm5, %v5377_v25, %v2929_v56  ;;  %v3784_v46 = vsel %vm6347_vm4, %v3779_v8, %v7262_v4 }
 0x210   : > { %3157 = vmatmul.bf16.gmra.mxu1 %v3045_v11  ;;  %3472 = vmatmul.bf16.gmra.mxu2 %v5847_v3  ;;  %v7276_v37 = vadd.f32 %v2769_v35, %v2127_v47  ;;  %v3805_v11 = vshll.u32 %v7274_v57, 16  ;;  %v3809_v3 = vshrl.u32 %v7274_v57, 16  ;;  %v7810_v35 = vld [vmem:[#allocation15_spill] sm:$0xff]  ;;  %v4356_v56 = vsel %vm6351_vm5, %v4354_v60, %v4355_v42 }
 0x211   : > { %4154 = vmatmul.bf16.gmra.mxu3 %v4042_v54  ;;  %v700_v23 = vadd.f32 %v7810_v35, %v387_v62  ;;  %v3798_v25 = vrot.slane %v3796_v6, 4  ;;  %v3801_v30 = vrot.slane %v3799_v59, 5  ;;  %v3021_v4 = vunpack.c.l.b16 %v2930_v27  ;;  %v5362_v6 = vld [vmem:[%s6268_s23 + $0x6c] sm:$0xe] }
 0x212   : > { %7809 = vst [vmem:[#allocation12_spill] sm:$0xff] %v7276_v37  ;;  %4580 = vmatmul.bf16.gmra.mxu0 %v4468_v34  ;;  %v7295_v50 = vrot.slane %v3805_v11, 5  ;;  %v3811_v62 = vrot.slane %v3809_v3, 4  ;;  %v4018_v22 = vunpack.c.l.b16 %v3784_v46  ;;  %v3815_v3 = vshll.u32 %v5604_v51, 16  ;;  %v5848_v27 = vld [vmem:[%s6268_s23 + $0x6c] sm:$0xff] }
 0x213   : > { %v1775_v48 = vpop.f32.mrf.mxu2  ;;  %v3802_v59 = vor.u32 %v3801_v30, %v3798_v25  ;;  %v5378_v25 = vrot.slane %v5362_v6, 9  ;;  %v7813_v6 = vld [vmem:[#allocation17_spill] sm:$0xff] }
 0x214   : > { %v1813_v61 = vadd.f32 %v1775_v48, %v1384_v45  ;;  %v2090_v54 = vpop.f32.mrf.mxu3  ;;  %v4353_v45 = vsel %vm6351_vm5, %v5697_v26, %v4352_v32  ;;  %v4019_v48 = vunpack.c.l.b16 %v3794_v21  ;;  %v4445_v32 = vunpack.c.l.b16 %v4356_v56  ;;  %v6014_v26 = vld [vmem:[%s6268_s23 + $0x70] sm:$0xf] }
 0x215   : > { %v1348_v34 = vpop.f32.mrf.mxu1  ;;  %v4444_v35 = vunpack.c.l.b16 %v4353_v45  ;;  %v2936_v60 = vrot.slane %v6014_v26, 5  ;;  %v3812_v11 = vor.u32 %v3811_v62, %v7295_v50  ;;  %v5682_v45 = vld [vmem:[%s6268_s23 + $0x78] sm:$0xe]  ;;  %v6015_v62 = vld [vmem:[%s6268_s23 + $0x74] sm:$0x1] }
 0x216   : > { %v2128_v38 = vadd.f32 %v2090_v54, %v1813_v61  ;;  %v1385_v47 = vadd.f32 %v1348_v34, %v700_v23  ;;  %v7812_v23 = vld [vmem:[#allocation16_spill] sm:$0xff]  ;;  %v3046_v34 = vpack.c.b16 %v3022_v39, %v3021_v4  ;;  %v4043_v21 = vpack.c.b16 %v4019_v48, %v4018_v22  ;;  %v389_v4 = vld [vmem:[#allocation2 + $0x98] sm:$0xff] }
 0x217   : > { %v2774_v20 = vpop.f32.mrf.mxu0  ;;  %v701_v61 = vadd.f32 %v7812_v23, %v388_v36  ;;  %v2938_v30 = vrot.slane %v2936_v60, 4  ;;  %v2939_v37 = vrot.slane %v6015_v62, 5  ;;  %v3803_v36 = vrot.slane %v3802_v59, 4 }
 0x218   : > { %v7298_v8 = vadd.f32 %v2772_v43, %v2128_v38  ;;  %v4469_v38 = vpack.c.b16 %v4445_v32, %v4444_v35  ;;  %v5698_v57 = vrot.slane %v5682_v45, 9  ;;  %v4361_v39 = vrot.slane %v4359_v7, 4  ;;  %v5605_v35 = vld [vmem:[%s6268_s23 + $0x84] sm:$0xf]  ;;  %v7312_v32 = vld [vmem:[%s6268_s23 + $0x88] sm:$0xf] }
 0x219   : > { %v4362_v22 = vrot.slane %v5604_v51, 5  ;;  %v702_v23 = vadd.f32 %v7813_v6, %v389_v4  ;;  %v2937_v59 = vsel %vm6351_vm5, %v5378_v25, %v2936_v60  ;;  %v3808_v51 = vsel %vm6347_vm4, %v3803_v36, %v7295_v50 }
 0x21a   : > { %7811 = vst [vmem:[#allocation13_spill] sm:$0xff] %v7298_v8  ;;  %v3820_v60 = vshrl.u32 %v5605_v35, 16  ;;  %v4020_v25 = vunpack.c.l.b16 %v3808_v51 }
 0x21b   : > { %v1777_v42 = vpop.f32.mrf.mxu2 }
 0x21c   : > { %v1814_v43 = vadd.f32 %v1777_v42, %v1385_v47  ;;  %v2092_v54 = vpop.f32.mrf.mxu3  ;;  %v3813_v47 = vrot.slane %v3812_v11, 4  ;;  %v3817_v42 = vrot.slane %v3815_v3, 5  ;;  %v2940_v11 = vsel %vm6351_vm5, %v2938_v30, %v2939_v37 }
 0x21d   : > { %v1351_v46 = vpop.f32.mrf.mxu1  ;;  %v3829_v37 = vshll.u32 %v7312_v32, 16 }
 0x21e   : > { %v2129_v56 = vadd.f32 %v2092_v54, %v1814_v43  ;;  %v1386_v26 = vadd.f32 %v1351_v46, %v701_v61  ;;  %v3818_v43 = vsel %vm6347_vm4, %v3813_v47, %v3817_v42  ;;  %v4360_v54 = vsel %vm6351_vm5, %v5698_v57, %v4359_v7 }
 0x21f   : > { %v2777_v8 = vpop.f32.mrf.mxu0  ;;  %v3823_v46 = vshll.u32 %v5605_v35, 16  ;;  %v4021_v7 = vunpack.c.l.b16 %v3818_v43  ;;  %v4446_v30 = vunpack.c.l.b16 %v4360_v54  ;;  %v3822_v47 = vrot.slane %v3820_v60, 4 }
 0x220   : > { %3162 = vmatmul.bf16.gmra.mxu1 %v3046_v34  ;;  %3477 = vmatmul.bf16.gmra.mxu2 %v5848_v27  ;;  %v7308_v48 = vadd.f32 %v2774_v20, %v2129_v56  ;;  %v4363_v34 = vsel %vm6351_vm5, %v4361_v39, %v4362_v22  ;;  %v3023_v56 = vunpack.c.l.b16 %v2937_v59  ;;  %v7332_v4 = vrot.slane %v3829_v37, 5  ;;  %v5607_v39 = vld [vmem:[%s6268_s23 + $0x8c] sm:$0x1]  ;;  %v5683_v37 = vld [vmem:[%s6268_s23 + $0x84] sm:$0xe] }
 0x221   : > { %4159 = vmatmul.bf16.gmra.mxu3 %v4043_v21  ;;  %v3833_v21 = vshrl.u32 %v7312_v32, 16  ;;  %v4447_v62 = vunpack.c.l.b16 %v4363_v34  ;;  %v3825_v42 = vrot.slane %v3823_v46, 5  ;;  %v4044_v59 = vpack.c.b16 %v4021_v7, %v4020_v25  ;;  %v6017_v25 = vld [vmem:[%s6268_s23 + $0x80] sm:$0x1] }
 0x222   : > { %4585 = vmatmul.bf16.gmra.mxu0 %v4469_v38  ;;  %v3839_v34 = vshll.u32 %v5607_v39, 16  ;;  %v4366_v46 = vrot.slane %v7312_v32, 5  ;;  %v2946_v7 = vrot.slane %v6017_v25, 5  ;;  %v5699_v32 = vrot.slane %v5683_v37, 9 }
 0x223   : > { %v1780_v61 = vpop.f32.mrf.mxu2  ;;  %v3835_v57 = vrot.slane %v3833_v21, 4  ;;  %v3826_v43 = vor.u32 %v3825_v42, %v3822_v47  ;;  %v7814_v42 = vld [vmem:[#allocation18_spill] sm:$0xff] }
 0x224   : > { %v1815_v20 = vadd.f32 %v1780_v61, %v1386_v26  ;;  %v2095_v3 = vpop.f32.mrf.mxu3  ;;  %v3024_v26 = vunpack.c.l.b16 %v2940_v11  ;;  %v5849_v61 = vld [vmem:[%s6268_s23 + $0x78] sm:$0xff]  ;;  %v3841_v47 = vrot.slane %v3839_v34, 5  ;;  %v4367_v37 = vsel %vm6351_vm5, %v5699_v32, %v4366_v46 }
 0x225   : > { %v1353_v27 = vpop.f32.mrf.mxu1  ;;  %v6016_v11 = vld [vmem:[%s6268_s23 + $0x7c] sm:$0xf]  ;;  %v3836_v54 = vor.u32 %v3835_v57, %v7332_v4 }
 0x226   : > { %v2130_v50 = vadd.f32 %v2095_v3, %v1815_v20  ;;  %v1387_v38 = vadd.f32 %v1353_v27, %v702_v23  ;;  %v3047_v23 = vpack.c.b16 %v3024_v26, %v3023_v56  ;;  %v2943_v51 = vrot.slane %v6016_v11, 5  ;;  %v5363_v3 = vld [vmem:[%s6268_s23 + $0x78] sm:$0xe]  ;;  %v7343_v56 = vld [vmem:[%s6268_s23 + $0x94] sm:$0xf] }
 0x227   : > { %v2779_v45 = vpop.f32.mrf.mxu0  ;;  %v4470_v20 = vpack.c.b16 %v4447_v62, %v4446_v30  ;;  %v5379_v21 = vrot.slane %v5363_v3, 9  ;;  %v3827_v30 = vrot.slane %v3826_v43, 4  ;;  %v3837_v62 = vrot.slane %v3836_v54, 4 }
 0x228   : > { %v7330_v36 = vadd.f32 %v2777_v8, %v2130_v50  ;;  %v2945_v50 = vrot.slane %v2943_v51, 4  ;;  %v3853_v11 = vshll.u32 %v7343_v56, 16 }
 0x229   : > { %v2944_v43 = vsel %vm6351_vm5, %v5379_v21, %v2943_v51 }
 0x22b   : > { %v1782_v22 = vpop.f32.mrf.mxu2 }
 0x22c   : > { %v1816_v35 = vadd.f32 %v1782_v22, %v1387_v38  ;;  %v2097_v6 = vpop.f32.mrf.mxu3  ;;  %v5608_v38 = vld [vmem:[%s6268_s23 + $0x90] sm:$0xf]  ;;  %v4368_v22 = vrot.slane %v4366_v46, 4 }
 0x22d   : > { %v3128_v8 = vpop.f32.mrf.mxu1 }
 0x22e   : > { %v2131_v27 = vadd.f32 %v2097_v6, %v1816_v35  ;;  %v3208_v57 = vadd.f32 %v3128_v8, %v7814_v42  ;;  %v4369_v35 = vrot.slane %v5607_v39, 5  ;;  %v2947_v8 = vsel %vm6351_vm5, %v2945_v50, %v2946_v7  ;;  %v5610_v42 = vld [vmem:[%s6268_s23 + $0x98] sm:$0x1] }
 0x22f   : > { %v4551_v60 = vpop.f32.mrf.mxu0  ;;  %v3832_v39 = vsel %vm6347_vm4, %v3827_v30, %v7332_v4  ;;  %v7364_v50 = vrot.slane %v3853_v11, 5  ;;  %v3025_v4 = vunpack.c.l.b16 %v2944_v43  ;;  %v3026_v30 = vunpack.c.l.b16 %v2947_v8  ;;  %v5850_v43 = vld [vmem:[%s6268_s23 + $0x84] sm:$0xff] }
 0x230   : > { %3167 = vmatmul.bf16.gmra.mxu1 %v3047_v23  ;;  %3482 = vmatmul.bf16.gmra.mxu2 %v5849_v61  ;;  %v7345_v26 = vadd.f32 %v2779_v45, %v2131_v27  ;;  %v3844_v23 = vshrl.u32 %v5608_v38, 16  ;;  %v3847_v61 = vshll.u32 %v5608_v38, 16  ;;  %v3857_v45 = vshrl.u32 %v7343_v56, 16 }
 0x231   : > { %4164 = vmatmul.bf16.gmra.mxu3 %v4044_v59  ;;  %v3842_v27 = vsel %vm6347_vm4, %v3837_v62, %v3841_v47  ;;  %v4370_v38 = vsel %vm6351_vm5, %v4368_v22, %v4369_v35  ;;  %v4448_v47 = vunpack.c.l.b16 %v4367_v37  ;;  %v6018_v22 = vld [vmem:[%s6268_s23 + $0x88] sm:$0xf]  ;;  %v3863_v11 = vshll.u32 %v5610_v42, 16 }
 0x232   : > { %4590 = vmatmul.bf16.gmra.mxu0 %v4470_v20  ;;  %v3846_v51 = vrot.slane %v3844_v23, 4  ;;  %v3849_v21 = vrot.slane %v3847_v61, 5  ;;  %v3859_v25 = vrot.slane %v3857_v45, 4  ;;  %v4023_v62 = vunpack.c.l.b16 %v3842_v27  ;;  %v5364_v23 = vld [vmem:[%s6268_s23 + $0x84] sm:$0xe] }
 0x233   : > { %v3443_v6 = vpop.f32.mrf.mxu2  ;;  %v4449_v46 = vunpack.c.l.b16 %v4370_v38  ;;  %v2950_v35 = vrot.slane %v6018_v22, 5  ;;  %v4373_v8 = vrot.slane %v7343_v56, 5  ;;  %v5380_v38 = vrot.slane %v5364_v23, 9 }
 0x234   : > { %v3523_v3 = vadd.f32 %v3443_v6, %v3208_v57  ;;  %v4125_v59 = vpop.f32.mrf.mxu3  ;;  %v4022_v57 = vunpack.c.l.b16 %v3832_v39  ;;  %v3850_v61 = vor.u32 %v3849_v21, %v3846_v51  ;;  %v6019_v51 = vld [vmem:[%s6268_s23 + $0x8c] sm:$0x1] }
 0x235   : > { %v3130_v20 = vpop.f32.mrf.mxu1  ;;  %v4471_v27 = vpack.c.b16 %v4449_v46, %v4448_v47  ;;  %v2952_v22 = vrot.slane %v2950_v35, 4  ;;  %v2953_v21 = vrot.slane %v6019_v51, 5  ;;  %v7384_v47 = vld [vmem:[%s6268_s23 + $0xa0] sm:$0xf]  ;;  %v2951_v23 = vsel %vm6351_vm5, %v5380_v38, %v2950_v35 }
 0x236   : > { %v4205_v54 = vadd.f32 %v4125_v59, %v3523_v3  ;;  %v3209_v32 = vadd.f32 %v3130_v20, %v6766_v1  ;;  %v3048_v59 = vpack.c.b16 %v3026_v30, %v3025_v4  ;;  %v5684_v1 = vld [vmem:[%s6268_s23 + $0x90] sm:$0xe]  ;;  %v4375_v4 = vrot.slane %v4373_v8, 4 }
 0x237   : > { %v4553_v34 = vpop.f32.mrf.mxu0  ;;  %v5700_v56 = vrot.slane %v5684_v1, 9  ;;  %v4376_v30 = vrot.slane %v5610_v42, 5 }
 0x238   : > { %v7366_v7 = vadd.f32 %v4551_v60, %v4205_v54  ;;  %v3860_v60 = vor.u32 %v3859_v25, %v7364_v50  ;;  %v4045_v54 = vpack.c.b16 %v4023_v62, %v4022_v57  ;;  %v3851_v25 = vrot.slane %v3850_v61, 4  ;;  %v5611_v62 = vld [vmem:[%s6268_s23 + $0x9c] sm:$0xf] }
 0x239   : > { %v3868_v35 = vshrl.u32 %v5611_v62, 16 }
 0x23a   : > { %7815 = vst [vmem:[#allocation14_spill] sm:$0xff] %v7366_v7  ;;  %v3856_v42 = vsel %vm6347_vm4, %v3851_v25, %v7364_v50 }
 0x23b   : > { %4663 = vst [vmem:[#allocation2 + $0xb0] sm:$0xff] %v7366_v7  ;;  %v3445_v6 = vpop.f32.mrf.mxu2  ;;  %v3861_v7 = vrot.slane %v3860_v60, 4  ;;  %v3870_v51 = vrot.slane %v3868_v35, 4 }
 0x23c   : > { %v3524_v45 = vadd.f32 %v3445_v6, %v3209_v32  ;;  %v4127_v3 = vpop.f32.mrf.mxu3  ;;  %v3865_v32 = vrot.slane %v3863_v11, 5 }
 0x23d   : > { %v3133_v39 = vpop.f32.mrf.mxu1 }
 0x23e   : > { %v4206_v20 = vadd.f32 %v4127_v3, %v3524_v45  ;;  %v3210_v57 = vadd.f32 %v3133_v39, %v6794_v29  ;;  %v3866_v11 = vsel %vm6347_vm4, %v3861_v7, %v3865_v32  ;;  %v4374_v29 = vsel %vm6351_vm5, %v5700_v56, %v4373_v8 }
 0x23f   : > { %v4556_v37 = vpop.f32.mrf.mxu0  ;;  %v4377_v45 = vsel %vm6351_vm5, %v4375_v4, %v4376_v30  ;;  %v3881_v39 = vshrl.u32 %v7384_v47, 16  ;;  %v4025_v8 = vunpack.c.l.b16 %v3866_v11  ;;  %v4450_v38 = vunpack.c.l.b16 %v4374_v29  ;;  %v5613_v4 = vld [vmem:[%s6268_s23 + $0xa4] sm:$0x1]  ;;  %v5365_v11 = vld [vmem:[%s6268_s23 + $0x90] sm:$0xe] }
 0x240   : > { %v7378_v6 = vadd.f32 %v4553_v34, %v4206_v20  ;;  %3172 = vmatmul.bf16.gmra.mxu1 %v3048_v59  ;;  %3487 = vmatmul.bf16.gmra.mxu2 %v5850_v43  ;;  %v2954_v34 = vsel %vm6351_vm5, %v2952_v22, %v2953_v21  ;;  %v3871_v59 = vshll.u32 %v5611_v62, 16  ;;  %v3877_v43 = vshll.u32 %v7384_v47, 16 }
 0x241   : > { %4169 = vmatmul.bf16.gmra.mxu3 %v4045_v54  ;;  %v3028_v1 = vunpack.c.l.b16 %v2954_v34  ;;  %v4024_v20 = vunpack.c.l.b16 %v3856_v42  ;;  %v4451_v22 = vunpack.c.l.b16 %v4377_v45  ;;  %v3883_v32 = vrot.slane %v3881_v39, 4  ;;  %v6020_v34 = vld [vmem:[%s6268_s23 + $0x94] sm:$0xf] }
 0x242   : > { %4595 = vmatmul.bf16.gmra.mxu0 %v4471_v27  ;;  %4664 = vst [vmem:[#allocation2] sm:$0xff] %v7378_v6  ;;  %v3027_v27 = vunpack.c.l.b16 %v2951_v23  ;;  %v3873_v21 = vrot.slane %v3871_v59, 5  ;;  %v7403_v25 = vrot.slane %v3877_v43, 5  ;;  %v2957_v42 = vrot.slane %v6020_v34, 5  ;;  %v5685_v43 = vld [vmem:[%s6268_s23 + $0x9c] sm:$0xe] }
 0x243   : > { %v3448_v46 = vpop.f32.mrf.mxu2  ;;  %v4046_v23 = vpack.c.b16 %v4025_v8, %v4024_v20  ;;  %v4380_v59 = vrot.slane %v7384_v47, 5  ;;  %v7418_v20 = vld [vmem:[%s6268_s23 + $0xac] sm:$0xf]  ;;  %v6021_v8 = vld [vmem:[%s6268_s23 + $0x98] sm:$0x1] }
 0x244   : > { %v3525_v61 = vadd.f32 %v3448_v46, %v3210_v57  ;;  %v4130_v60 = vpop.f32.mrf.mxu3  ;;  %v3049_v62 = vpack.c.b16 %v3028_v1, %v3027_v27  ;;  %v5851_v46 = vld [vmem:[%s6268_s23 + $0x90] sm:$0xff]  ;;  %v3874_v29 = vor.u32 %v3873_v21, %v3870_v51  ;;  %v3884_v45 = vor.u32 %v3883_v32, %v7403_v25  ;;  %v5614_v1 = vld [vmem:[%s6268_s23 + $0xa8] sm:$0xf] }
 0x245   : > { %v3135_v3 = vpop.f32.mrf.mxu1  ;;  %v2959_v27 = vrot.slane %v2957_v42, 4  ;;  %v4382_v32 = vrot.slane %v4380_v59, 4 }
 0x246   : > { %v4207_v50 = vadd.f32 %v4130_v60, %v3525_v61  ;;  %v3211_v56 = vadd.f32 %v3135_v3, %v6811_v16  ;;  %v4472_v60 = vpack.c.b16 %v4451_v22, %v4450_v38  ;;  %v3887_v16 = vshll.u32 %v5613_v4, 16 }
 0x247   : > { %v4558_v54 = vpop.f32.mrf.mxu0  ;;  %v2960_v38 = vrot.slane %v6021_v8, 5  ;;  %v3875_v22 = vrot.slane %v3874_v29, 4  ;;  %v3885_v51 = vrot.slane %v3884_v45, 4 }
 0x248   : > { %v7401_v7 = vadd.f32 %v4556_v37, %v4207_v50  ;;  %v5381_v50 = vrot.slane %v5365_v11, 9  ;;  %v3889_v21 = vrot.slane %v3887_v16, 5 }
 0x24a   : > { %4665 = vst [vmem:[#allocation2 + $0xd8] sm:$0xff] %v7401_v7  ;;  %v2958_v11 = vsel %vm6351_vm5, %v5381_v50, %v2957_v42  ;;  %v3890_v45 = vsel %vm6347_vm4, %v3885_v51, %v3889_v21 }
 0x24b   : > { %v3450_v30 = vpop.f32.mrf.mxu2  ;;  %v4027_v51 = vunpack.c.l.b16 %v3890_v45 }
 0x24c   : > { %v3526_v57 = vadd.f32 %v3450_v30, %v3211_v56  ;;  %v4132_v37 = vpop.f32.mrf.mxu3  ;;  %v4383_v56 = vrot.slane %v5613_v4, 5  ;;  %v3880_v4 = vsel %vm6347_vm4, %v3875_v22, %v7403_v25  ;;  %v3029_v25 = vunpack.c.l.b16 %v2958_v11 }
 0x24d   : > { %v3138_v61 = vpop.f32.mrf.mxu1  ;;  %v4026_v22 = vunpack.c.l.b16 %v3880_v4  ;;  %v4387_v11 = vrot.slane %v7418_v20, 5 }
 0x24e   : > { %v4208_v3 = vadd.f32 %v4132_v37, %v3526_v57  ;;  %v3212_v47 = vadd.f32 %v3138_v61, %v6842_v53  ;;  %v3892_v57 = vshrl.u32 %v5614_v1, 16  ;;  %v3895_v37 = vshll.u32 %v5614_v1, 16 }
 0x24f   : > { %v4561_v35 = vpop.f32.mrf.mxu0  ;;  %v2961_v53 = vsel %vm6351_vm5, %v2959_v27, %v2960_v38  ;;  %v5616_v38 = vld [vmem:[%s6268_s23 + $0xb0] sm:$0x1]  ;;  %v4047_v4 = vpack.c.b16 %v4027_v51, %v4026_v22  ;;  %v5617_v51 = vld [vmem:[%s6268_s23 + $0xb4] sm:$0xf] }
 0x250   : > { %v7414_v39 = vadd.f32 %v4558_v54, %v4208_v3  ;;  %3177 = vmatmul.bf16.gmra.mxu1 %v3049_v62  ;;  %3492 = vmatmul.bf16.gmra.mxu2 %v5851_v46  ;;  %v5701_v54 = vrot.slane %v5685_v43, 9  ;;  %v3901_v62 = vshll.u32 %v7418_v20, 16  ;;  %v3905_v46 = vshrl.u32 %v7418_v20, 16 }
 0x251   : > { %4174 = vmatmul.bf16.gmra.mxu3 %v4046_v23  ;;  %v4384_v3 = vsel %vm6351_vm5, %v4382_v32, %v4383_v56  ;;  %v3894_v42 = vrot.slane %v3892_v57, 4  ;;  %v3897_v43 = vrot.slane %v3895_v37, 5  ;;  %v3030_v8 = vunpack.c.l.b16 %v2961_v53 }
 0x252   : > { %4600 = vmatmul.bf16.gmra.mxu0 %v4472_v60  ;;  %4666 = vst [vmem:[#allocation2 + $0x18] sm:$0xff] %v7414_v39  ;;  %v4381_v16 = vsel %vm6351_vm5, %v5701_v54, %v4380_v59  ;;  %v7438_v50 = vrot.slane %v3901_v62, 5  ;;  %v3907_v27 = vrot.slane %v3905_v46, 4  ;;  %v4453_v59 = vunpack.c.l.b16 %v4384_v3  ;;  %v6022_v54 = vld [vmem:[%s6268_s23 + $0xa0] sm:$0xf] }
 0x253   : > { %v3453_v30 = vpop.f32.mrf.mxu2  ;;  %v4452_v21 = vunpack.c.l.b16 %v4381_v16  ;;  %v2964_v32 = vrot.slane %v6022_v54, 5  ;;  %v3898_v57 = vor.u32 %v3897_v43, %v3894_v42  ;;  %v3911_v37 = vshll.u32 %v5616_v38, 16  ;;  %v6023_v42 = vld [vmem:[%s6268_s23 + $0xa4] sm:$0x1] }
 0x254   : > { %v3527_v23 = vadd.f32 %v3453_v30, %v3212_v47  ;;  %v4135_v34 = vpop.f32.mrf.mxu3  ;;  %v5366_v30 = vld [vmem:[%s6268_s23 + $0x9c] sm:$0xe]  ;;  %v2967_v43 = vrot.slane %v6023_v42, 5 }
 0x255   : > { %v3140_v60 = vpop.f32.mrf.mxu1  ;;  %v5382_v16 = vrot.slane %v5366_v30, 9  ;;  %v2966_v3 = vrot.slane %v2964_v32, 4 }
 0x256   : > { %v4209_v61 = vadd.f32 %v4135_v34, %v3527_v23  ;;  %v3213_v47 = vadd.f32 %v3140_v60, %v6859_v12  ;;  %v3050_v23 = vpack.c.b16 %v3030_v8, %v3029_v25  ;;  %v5852_v34 = vld [vmem:[%s6268_s23 + $0x9c] sm:$0xff]  ;;  %v5686_v12 = vld [vmem:[%s6268_s23 + $0xa8] sm:$0xe]  ;;  %v4389_v25 = vrot.slane %v4387_v11, 4 }
 0x257   : > { %v4563_v29 = vpop.f32.mrf.mxu0  ;;  %v5702_v20 = vrot.slane %v5686_v12, 9  ;;  %v4390_v8 = vrot.slane %v5616_v38, 5  ;;  %v2965_v30 = vsel %vm6351_vm5, %v5382_v16, %v2964_v32  ;;  %v3916_v32 = vshrl.u32 %v5617_v51, 16 }
 0x258   : > { %v7440_v1 = vadd.f32 %v4561_v35, %v4209_v61  ;;  %v3908_v35 = vor.u32 %v3907_v27, %v7438_v50  ;;  %v4473_v61 = vpack.c.b16 %v4453_v59, %v4452_v21  ;;  %v3899_v27 = vrot.slane %v3898_v57, 4  ;;  %v7458_v21 = vld [vmem:[%s6268_s23 + $0xb8] sm:$0xf] }
 0x25a   : > { %4667 = vst [vmem:[#allocation2 + $0x50] sm:$0xff] %v7440_v1  ;;  %v3909_v54 = vrot.slane %v3908_v35, 4  ;;  %v3904_v38 = vsel %vm6347_vm4, %v3899_v27, %v7438_v50 }
 0x25b   : > { %v3455_v56 = vpop.f32.mrf.mxu2 }
 0x25c   : > { %v3528_v62 = vadd.f32 %v3455_v56, %v3213_v47  ;;  %v4137_v46 = vpop.f32.mrf.mxu3  ;;  %v3913_v47 = vrot.slane %v3911_v37, 5 }
 0x25d   : > { %v3143_v53 = vpop.f32.mrf.mxu1 }
 0x25e   : > { %v4210_v60 = vadd.f32 %v4137_v46, %v3528_v62  ;;  %v3214_v22 = vadd.f32 %v3143_v53, %v6887_v9  ;;  %v3914_v37 = vsel %vm6347_vm4, %v3909_v54, %v3913_v47  ;;  %v4388_v9 = vsel %vm6351_vm5, %v5702_v20, %v4387_v11 }
 0x25f   : > { %v4566_v45 = vpop.f32.mrf.mxu0  ;;  %v4391_v62 = vsel %vm6351_vm5, %v4389_v25, %v4390_v8  ;;  %v3929_v53 = vshrl.u32 %v7458_v21, 16  ;;  %v4029_v11 = vunpack.c.l.b16 %v3914_v37  ;;  %v5619_v25 = vld [vmem:[%s6268_s23 + $0xbc] sm:$0x1]  ;;  %v5367_v37 = vld [vmem:[%s6268_s23 + $0xa8] sm:$0xe] }
 0x260   : > { %v7452_v56 = vadd.f32 %v4563_v29, %v4210_v60  ;;  %3182 = vmatmul.bf16.gmra.mxu1 %v3050_v23  ;;  %3497 = vmatmul.bf16.gmra.mxu2 %v5852_v34  ;;  %v2968_v29 = vsel %vm6351_vm5, %v2966_v3, %v2967_v43  ;;  %v3919_v23 = vshll.u32 %v5617_v51, 16  ;;  %v3925_v34 = vshll.u32 %v7458_v21, 16 }
 0x261   : > { %4179 = vmatmul.bf16.gmra.mxu3 %v4047_v4  ;;  %v3032_v12 = vunpack.c.l.b16 %v2968_v29  ;;  %v4028_v60 = vunpack.c.l.b16 %v3904_v38  ;;  %v4454_v3 = vunpack.c.l.b16 %v4388_v9  ;;  %v4455_v42 = vunpack.c.l.b16 %v4391_v62  ;;  %v6024_v29 = vld [vmem:[%s6268_s23 + $0xac] sm:$0xf] }
 0x262   : > { %4605 = vmatmul.bf16.gmra.mxu0 %v4473_v61  ;;  %4668 = vst [vmem:[#allocation2 + $0x68] sm:$0xff] %v7452_v56  ;;  %v3031_v61 = vunpack.c.l.b16 %v2965_v30  ;;  %v3918_v43 = vrot.slane %v3916_v32, 4  ;;  %v3921_v27 = vrot.slane %v3919_v23, 5  ;;  %v7477_v54 = vrot.slane %v3925_v34, 5  ;;  %v5687_v34 = vld [vmem:[%s6268_s23 + $0xb4] sm:$0xe] }
 0x263   : > { %v3458_v59 = vpop.f32.mrf.mxu2  ;;  %v3931_v47 = vrot.slane %v3929_v53, 4  ;;  %v4048_v30 = vpack.c.b16 %v4029_v11, %v4028_v60  ;;  %v2971_v38 = vrot.slane %v6024_v29, 5  ;;  %v4394_v23 = vrot.slane %v7458_v21, 5  ;;  %v7492_v60 = vld [vmem:[%s6268_s23 + $0xc4] sm:$0xf] }
 0x264   : > { %v3529_v57 = vadd.f32 %v3458_v59, %v3214_v22  ;;  %v4140_v35 = vpop.f32.mrf.mxu3  ;;  %v3051_v51 = vpack.c.b16 %v3032_v12, %v3031_v61  ;;  %v5853_v59 = vld [vmem:[%s6268_s23 + $0xa8] sm:$0xff]  ;;  %v3922_v9 = vor.u32 %v3921_v27, %v3918_v43  ;;  %v5620_v12 = vld [vmem:[%s6268_s23 + $0xc0] sm:$0xf]  ;;  %v6025_v11 = vld [vmem:[%s6268_s23 + $0xb0] sm:$0x1] }
 0x265   : > { %v3145_v46 = vpop.f32.mrf.mxu1  ;;  %v3932_v62 = vor.u32 %v3931_v47, %v7477_v54  ;;  %v2973_v61 = vrot.slane %v2971_v38, 4  ;;  %v4396_v47 = vrot.slane %v4394_v23, 4 }
 0x266   : > { %v4211_v50 = vadd.f32 %v4140_v35, %v3529_v57  ;;  %v3215_v20 = vadd.f32 %v3145_v46, %v6903_v55  ;;  %v4474_v35 = vpack.c.b16 %v4455_v42, %v4454_v3  ;;  %v3935_v55 = vshll.u32 %v5619_v25, 16 }
 0x267   : > { %v4568_v4 = vpop.f32.mrf.mxu0  ;;  %v2974_v3 = vrot.slane %v6025_v11, 5  ;;  %v3923_v42 = vrot.slane %v3922_v9, 4  ;;  %v3933_v43 = vrot.slane %v3932_v62, 4 }
 0x268   : > { %v7475_v16 = vadd.f32 %v4566_v45, %v4211_v50  ;;  %v5383_v50 = vrot.slane %v5367_v37, 9  ;;  %v3937_v27 = vrot.slane %v3935_v55, 5 }
 0x26a   : > { %4669 = vst [vmem:[#allocation2 + $0x30] sm:$0xff] %v7475_v16  ;;  %v2972_v37 = vsel %vm6351_vm5, %v5383_v50, %v2971_v38  ;;  %v3938_v62 = vsel %vm6347_vm4, %v3933_v43, %v3937_v27 }
 0x26b   : > { %v3460_v8 = vpop.f32.mrf.mxu2  ;;  %v4031_v43 = vunpack.c.l.b16 %v3938_v62 }
 0x26c   : > { %v3530_v22 = vadd.f32 %v3460_v8, %v3215_v20  ;;  %v4142_v45 = vpop.f32.mrf.mxu3  ;;  %v4397_v20 = vrot.slane %v5619_v25, 5  ;;  %v3928_v25 = vsel %vm6347_vm4, %v3923_v42, %v7477_v54  ;;  %v3033_v54 = vunpack.c.l.b16 %v2972_v37 }
 0x26d   : > { %v3148_v57 = vpop.f32.mrf.mxu1  ;;  %v4030_v42 = vunpack.c.l.b16 %v3928_v25  ;;  %v4401_v37 = vrot.slane %v7492_v60, 5 }
 0x26e   : > { %v4212_v46 = vadd.f32 %v4142_v45, %v3530_v22  ;;  %v3216_v21 = vadd.f32 %v3148_v57, %v6938_v58  ;;  %v3940_v22 = vshrl.u32 %v5620_v12, 16  ;;  %v3943_v45 = vshll.u32 %v5620_v12, 16 }
 0x26f   : > { %v4571_v32 = vpop.f32.mrf.mxu0  ;;  %v2975_v58 = vsel %vm6351_vm5, %v2973_v61, %v2974_v3  ;;  %v5622_v3 = vld [vmem:[%s6268_s23 + $0xc8] sm:$0x1]  ;;  %v4049_v25 = vpack.c.b16 %v4031_v43, %v4030_v42  ;;  %v5623_v43 = vld [vmem:[%s6268_s23 + $0xcc] sm:$0xf] }
 0x270   : > { %v7488_v53 = vadd.f32 %v4568_v4, %v4212_v46  ;;  %3187 = vmatmul.bf16.gmra.mxu1 %v3051_v51  ;;  %3502 = vmatmul.bf16.gmra.mxu2 %v5853_v59  ;;  %v5703_v4 = vrot.slane %v5687_v34, 9  ;;  %v3949_v51 = vshll.u32 %v7492_v60, 16  ;;  %v3953_v59 = vshrl.u32 %v7492_v60, 16 }
 0x271   : > { %4184 = vmatmul.bf16.gmra.mxu3 %v4048_v30  ;;  %v4398_v46 = vsel %vm6351_vm5, %v4396_v47, %v4397_v20  ;;  %v3942_v38 = vrot.slane %v3940_v22, 4  ;;  %v3945_v34 = vrot.slane %v3943_v45, 5  ;;  %v3034_v11 = vunpack.c.l.b16 %v2975_v58 }
 0x272   : > { %4610 = vmatmul.bf16.gmra.mxu0 %v4474_v35  ;;  %4670 = vst [vmem:[#allocation2 + $0x48] sm:$0xff] %v7488_v53  ;;  %v4395_v55 = vsel %vm6351_vm5, %v5703_v4, %v4394_v23  ;;  %v7512_v50 = vrot.slane %v3949_v51, 5  ;;  %v3955_v61 = vrot.slane %v3953_v59, 4  ;;  %v4457_v23 = vunpack.c.l.b16 %v4398_v46  ;;  %v6026_v4 = vld [vmem:[%s6268_s23 + $0xb8] sm:$0xf] }
 0x273   : > { %v3463_v8 = vpop.f32.mrf.mxu2  ;;  %v4456_v27 = vunpack.c.l.b16 %v4395_v55  ;;  %v2978_v47 = vrot.slane %v6026_v4, 5  ;;  %v3946_v22 = vor.u32 %v3945_v34, %v3942_v38  ;;  %v3959_v45 = vshll.u32 %v5622_v3, 16  ;;  %v6027_v38 = vld [vmem:[%s6268_s23 + $0xbc] sm:$0x1] }
 0x274   : > { %v3531_v30 = vadd.f32 %v3463_v8, %v3216_v21  ;;  %v4145_v29 = vpop.f32.mrf.mxu3  ;;  %v5368_v8 = vld [vmem:[%s6268_s23 + $0xb4] sm:$0xe]  ;;  %v2981_v34 = vrot.slane %v6027_v38, 5 }
 0x275   : > { %v3150_v35 = vpop.f32.mrf.mxu1  ;;  %v5384_v55 = vrot.slane %v5368_v8, 9  ;;  %v2980_v46 = vrot.slane %v2978_v47, 4 }
 0x276   : > { %v4213_v57 = vadd.f32 %v4145_v29, %v3531_v30  ;;  %v3217_v21 = vadd.f32 %v3150_v35, %v6954_v41  ;;  %v3052_v30 = vpack.c.b16 %v3034_v11, %v3033_v54  ;;  %v5854_v29 = vld [vmem:[%s6268_s23 + $0xb4] sm:$0xff]  ;;  %v5688_v41 = vld [vmem:[%s6268_s23 + $0xc0] sm:$0xe]  ;;  %v4403_v54 = vrot.slane %v4401_v37, 4 }
 0x277   : > { %v4573_v9 = vpop.f32.mrf.mxu0  ;;  %v5704_v60 = vrot.slane %v5688_v41, 9  ;;  %v4404_v11 = vrot.slane %v5622_v3, 5  ;;  %v2979_v8 = vsel %vm6351_vm5, %v5384_v55, %v2978_v47  ;;  %v3964_v47 = vshrl.u32 %v5623_v43, 16 }
 0x278   : > { %v7514_v12 = vadd.f32 %v4571_v32, %v4213_v57  ;;  %v3956_v32 = vor.u32 %v3955_v61, %v7512_v50  ;;  %v4475_v57 = vpack.c.b16 %v4457_v23, %v4456_v27  ;;  %v3947_v61 = vrot.slane %v3946_v22, 4  ;;  %v7532_v27 = vld [vmem:[%s6268_s23 + $0xd0] sm:$0xf] }
 0x27a   : > { %4671 = vst [vmem:[#allocation2 + $0x80] sm:$0xff] %v7514_v12  ;;  %v3957_v4 = vrot.slane %v3956_v32, 4  ;;  %v3952_v3 = vsel %vm6347_vm4, %v3947_v61, %v7512_v50 }
 0x27b   : > { %v3465_v20 = vpop.f32.mrf.mxu2 }
 0x27c   : > { %v3532_v51 = vadd.f32 %v3465_v20, %v3217_v21  ;;  %v4147_v59 = vpop.f32.mrf.mxu3  ;;  %v3961_v21 = vrot.slane %v3959_v45, 5 }
 0x27d   : > { %v3153_v58 = vpop.f32.mrf.mxu1 }
 0x27e   : > { %v4214_v35 = vadd.f32 %v4147_v59, %v3532_v51  ;;  %v3218_v42 = vadd.f32 %v3153_v58, %v6981_v19  ;;  %v3962_v45 = vsel %vm6347_vm4, %v3957_v4, %v3961_v21  ;;  %v4402_v19 = vsel %vm6351_vm5, %v5704_v60, %v4401_v37 }
 0x27f   : > { %v4576_v62 = vpop.f32.mrf.mxu0  ;;  %v4405_v51 = vsel %vm6351_vm5, %v4403_v54, %v4404_v11  ;;  %v3977_v58 = vshrl.u32 %v7532_v27, 16  ;;  %v4033_v37 = vunpack.c.l.b16 %v3962_v45  ;;  %v5625_v54 = vld [vmem:[%s6268_s23 + $0xd4] sm:$0x1]  ;;  %v5369_v45 = vld [vmem:[%s6268_s23 + $0xc0] sm:$0xe] }
 0x280   : > { %v7526_v20 = vadd.f32 %v4573_v9, %v4214_v35  ;;  %3192 = vmatmul.bf16.gmra.mxu1 %v3052_v30  ;;  %3507 = vmatmul.bf16.gmra.mxu2 %v5854_v29  ;;  %v2982_v9 = vsel %vm6351_vm5, %v2980_v46, %v2981_v34  ;;  %v3967_v30 = vshll.u32 %v5623_v43, 16  ;;  %v3973_v29 = vshll.u32 %v7532_v27, 16 }
 0x281   : > { %4189 = vmatmul.bf16.gmra.mxu3 %v4049_v25  ;;  %v3036_v41 = vunpack.c.l.b16 %v2982_v9  ;;  %v4032_v35 = vunpack.c.l.b16 %v3952_v3  ;;  %v4458_v46 = vunpack.c.l.b16 %v4402_v19  ;;  %v4459_v38 = vunpack.c.l.b16 %v4405_v51  ;;  %v6028_v9 = vld [vmem:[%s6268_s23 + $0xc4] sm:$0xf] }
 0x282   : > { %4615 = vmatmul.bf16.gmra.mxu0 %v4475_v57  ;;  %4672 = vst [vmem:[#allocation2 + $0x88] sm:$0xff] %v7526_v20  ;;  %v3035_v57 = vunpack.c.l.b16 %v2979_v8  ;;  %v3966_v34 = vrot.slane %v3964_v47, 4  ;;  %v3969_v61 = vrot.slane %v3967_v30, 5  ;;  %v3975_v4 = vrot.slane %v3973_v29, 5 }
 0x283   : > { %v3468_v23 = vpop.f32.mrf.mxu2  ;;  %v3979_v21 = vrot.slane %v3977_v58, 4  ;;  %v4050_v8 = vpack.c.b16 %v4033_v37, %v4032_v35  ;;  %v2985_v3 = vrot.slane %v6028_v9, 5  ;;  %v3983_v47 = vshll.u32 %v5625_v54, 16 }
 0x284   : > { %v3533_v22 = vadd.f32 %v3468_v23, %v3218_v42  ;;  %v4150_v32 = vpop.f32.mrf.mxu3  ;;  %v5855_v23 = vld [vmem:[%s6268_s23 + $0xc0] sm:$0xff]  ;;  %v3970_v19 = vor.u32 %v3969_v61, %v3966_v34 }
 0x285   : > { %v3155_v59 = vpop.f32.mrf.mxu1  ;;  %v3980_v51 = vor.u32 %v3979_v21, %v3975_v4  ;;  %v4411_v21 = vrot.slane %v5625_v54, 5 }
 0x286   : > { %v4215_v50 = vadd.f32 %v4150_v32, %v3533_v22  ;;  %v3219_v60 = vadd.f32 %v3155_v59, %v7005_v5  ;;  %v4476_v32 = vpack.c.b16 %v4459_v38, %v4458_v46  ;;  %v4408_v5 = vrot.slane %v7532_v27, 5  ;;  %v5689_v59 = vld [vmem:[%s6268_s23 + $0xcc] sm:$0xe] }
 0x287   : > { %v4578_v25 = vpop.f32.mrf.mxu0  ;;  %v3971_v37 = vrot.slane %v3970_v19, 4  ;;  %v3981_v46 = vrot.slane %v3980_v51, 4  ;;  %v3985_v38 = vrot.slane %v3983_v47, 5  ;;  %v5705_v61 = vrot.slane %v5689_v59, 9 }
 0x288   : > { %v7549_v55 = vadd.f32 %v4576_v62, %v4215_v50  ;;  %v3053_v62 = vpack.c.b16 %v3036_v41, %v3035_v57  ;;  %v5385_v50 = vrot.slane %v5369_v45, 9  ;;  %v2987_v57 = vrot.slane %v2985_v3, 4  ;;  %v6029_v41 = vld [vmem:[%s6268_s23 + $0xc8] sm:$0x1] }
 0x289   : > { %v2988_v35 = vrot.slane %v6029_v41, 5  ;;  %v4410_v27 = vrot.slane %v4408_v5, 4  ;;  %v4409_v54 = vsel %vm6351_vm5, %v5705_v61, %v4408_v5  ;;  %v5856_v5 = vld [vmem:[%s6268_s23 + $0xcc] sm:$0xff] }
 0x28a   : > { %4673 = vst [vmem:[#allocation2 + $0xe8] sm:$0xff] %v7549_v55  ;;  %v4460_v47 = vunpack.c.l.b16 %v4409_v54 }
 0x28b   : > { %v3470_v11 = vpop.f32.mrf.mxu2 }
 0x28c   : > { %v3534_v42 = vadd.f32 %v3470_v11, %v3219_v60  ;;  %v4152_v43 = vpop.f32.mrf.mxu3 }
 0x28d   : > { %v3158_v22 = vpop.f32.mrf.mxu1 }
 0x28e   : > { %v4216_v30 = vadd.f32 %v4152_v43, %v3534_v42  ;;  %v3220_v34 = vadd.f32 %v3158_v22, %v7026_v44  ;;  %v2986_v43 = vsel %vm6351_vm5, %v5385_v50, %v2985_v3  ;;  %v3986_v44 = vsel %vm6347_vm4, %v3981_v46, %v3985_v38 }
 0x28f   : > { %v4581_v29 = vpop.f32.mrf.mxu0  ;;  %v4412_v22 = vsel %vm6351_vm5, %v4410_v27, %v4411_v21  ;;  %v3037_v3 = vunpack.c.l.b16 %v2986_v43  ;;  %v4035_v51 = vunpack.c.l.b16 %v3986_v44 }
 0x290   : > { %v7559_v58 = vadd.f32 %v4578_v25, %v4216_v30  ;;  %3197 = vmatmul.bf16.gmra.mxu1 %v3053_v62  ;;  %3512 = vmatmul.bf16.gmra.mxu2 %v5855_v23  ;;  %v2989_v62 = vsel %vm6351_vm5, %v2987_v57, %v2988_v35  ;;  %v3976_v23 = vsel %vm6347_vm4, %v3971_v37, %v3975_v4  ;;  %v4461_v4 = vunpack.c.l.b16 %v4412_v22 }
 0x291   : > { %4194 = vmatmul.bf16.gmra.mxu3 %v4050_v8  ;;  %v3038_v45 = vunpack.c.l.b16 %v2989_v62  ;;  %v4034_v19 = vunpack.c.l.b16 %v3976_v23 }
 0x292   : > { %4620 = vmatmul.bf16.gmra.mxu0 %v4476_v32  ;;  %4674 = vst [vmem:[#allocation2 + $0xb8] sm:$0xff] %v7559_v58  ;;  %v4477_v35 = vpack.c.b16 %v4461_v4, %v4460_v47 }
 0x293   : > { %v3473_v25 = vpop.f32.mrf.mxu2  ;;  %v3054_v57 = vpack.c.b16 %v3038_v45, %v3037_v3  ;;  %v4051_v28 = vpack.c.b16 %v4035_v51, %v4034_v19 }
 0x294   : > { %v3535_v60 = vadd.f32 %v3473_v25, %v3220_v34  ;;  %v4155_v11 = vpop.f32.mrf.mxu3 }
 0x295   : > { %v3160_v42 = vpop.f32.mrf.mxu1 }
 0x296   : > { %v4217_v8 = vadd.f32 %v4155_v11, %v3535_v60  ;;  %v3221_v24 = vadd.f32 %v3160_v42, %v7032_v40 }
 0x297   : > { %v4583_v9 = vpop.f32.mrf.mxu0 }
 0x298   : > { %v7576_v32 = vadd.f32 %v4581_v29, %v4217_v8 }
 0x29a   : > { %4675 = vst [vmem:[#allocation2 + $0x60] sm:$0xff] %v7576_v32 }
 0x29b   : > { %v3475_v30 = vpop.f32.mrf.mxu2 }
 0x29c   : > { %v3536_v59 = vadd.f32 %v3475_v30, %v3221_v24  ;;  %v4157_v50 = vpop.f32.mrf.mxu3 }
 0x29d   : > { %v3163_v41 = vpop.f32.mrf.mxu1 }
 0x29e   : > { %v4218_v29 = vadd.f32 %v4157_v50, %v3536_v59  ;;  %v3222_v40 = vadd.f32 %v3163_v41, %v7049_v18 }
 0x29f   : > { %v4586_v37 = vpop.f32.mrf.mxu0 }
 0x2a0   : > { %v7581_v46 = vadd.f32 %v4583_v9, %v4218_v29  ;;  %3202 = vmatmul.bf16.gmra.mxu1 %v3054_v57  ;;  %3517 = vmatmul.bf16.gmra.mxu2 %v5856_v5 }
 0x2a1   : > { %4199 = vmatmul.bf16.gmra.mxu3 %v4051_v28 }
 0x2a2   : > { %4625 = vmatmul.bf16.gmra.mxu0 %v4477_v35  ;;  %4676 = vst [vmem:[#allocation2 + $0xf0] sm:$0xff] %v7581_v46 }
 0x2a3   : > { %v3478_v38 = vpop.f32.mrf.mxu2 }
 0x2a4   : > { %v3537_v34 = vadd.f32 %v3478_v38, %v3222_v40  ;;  %v4160_v61 = vpop.f32.mrf.mxu3 }
 0x2a5   : > { %v3165_v27 = vpop.f32.mrf.mxu1 }
 0x2a6   : > { %v4219_v21 = vadd.f32 %v4160_v61, %v3537_v34  ;;  %v3223_v11 = vadd.f32 %v3165_v27, %v7066_v31 }
 0x2a7   : > { %v4588_v25 = vpop.f32.mrf.mxu0 }
 0x2a8   : > { %v7585_v60 = vadd.f32 %v4586_v37, %v4219_v21 }
 0x2aa   : > { %4677 = vst [vmem:[#allocation2 + $0x8] sm:$0xff] %v7585_v60 }
 0x2ab   : > { %v3480_v42 = vpop.f32.mrf.mxu2 }
 0x2ac   : > { %v3538_v43 = vadd.f32 %v3480_v42, %v3223_v11  ;;  %v4162_v62 = vpop.f32.mrf.mxu3 }
 0x2ad   : > { %v3168_v23 = vpop.f32.mrf.mxu1 }
 0x2ae   : > { %v4220_v8 = vadd.f32 %v4162_v62, %v3538_v43  ;;  %v3224_v18 = vadd.f32 %v3168_v23, %v7088_v0 }
 0x2af   : > { %v4591_v9 = vpop.f32.mrf.mxu0 }
 0x2b0   : > { %v7589_v44 = vadd.f32 %v4588_v25, %v4220_v8 }
 0x2b2   : > { %4678 = vst [vmem:[#allocation2 + $0x78] sm:$0xff] %v7589_v44 }
 0x2b3   : > { %v3483_v54 = vpop.f32.mrf.mxu2 }
 0x2b4   : > { %v3539_v22 = vadd.f32 %v3483_v54, %v3224_v18  ;;  %v4165_v3 = vpop.f32.mrf.mxu3 }
 0x2b5   : > { %v3170_v45 = vpop.f32.mrf.mxu1 }
 0x2b6   : > { %v4221_v19 = vadd.f32 %v4165_v3, %v3539_v22  ;;  %v3225_v31 = vadd.f32 %v3170_v45, %v7098_v10 }
 0x2b7   : > { %v4593_v51 = vpop.f32.mrf.mxu0 }
 0x2b8   : > { %v7593_v47 = vadd.f32 %v4591_v9, %v4221_v19 }
 0x2ba   : > { %4679 = vst [vmem:[#allocation2 + $0x38] sm:$0xff] %v7593_v47 }
 0x2bb   : > { %v3485_v4 = vpop.f32.mrf.mxu2 }
 0x2bc   : > { %v3540_v24 = vadd.f32 %v3485_v4, %v3225_v31  ;;  %v4167_v30 = vpop.f32.mrf.mxu3 }
 0x2bd   : > { %v3173_v59 = vpop.f32.mrf.mxu1 }
 0x2be   : > { %v4222_v50 = vadd.f32 %v4167_v30, %v3540_v24  ;;  %v3226_v0 = vadd.f32 %v3173_v59, %v7120_v17 }
 0x2bf   : > { %v4596_v57 = vpop.f32.mrf.mxu0 }
 0x2c0   : > { %v7597_v5 = vadd.f32 %v4593_v51, %v4222_v50 }
 0x2c2   : > { %4680 = vst [vmem:[#allocation2 + $0x58] sm:$0xff] %v7597_v5 }
 0x2c3   : > { %v3488_v41 = vpop.f32.mrf.mxu2 }
 0x2c4   : > { %v3541_v28 = vadd.f32 %v3488_v41, %v3226_v0  ;;  %v4170_v35 = vpop.f32.mrf.mxu3 }
 0x2c5   : > { %v3175_v29 = vpop.f32.mrf.mxu1 }
 0x2c6   : > { %v4223_v37 = vadd.f32 %v4170_v35, %v3541_v28  ;;  %v3227_v10 = vadd.f32 %v3175_v29, %v7136_v33 }
 0x2c7   : > { %v4598_v40 = vpop.f32.mrf.mxu0 }
 0x2c8   : > { %v7601_v38 = vadd.f32 %v4596_v57, %v4223_v37 }
 0x2ca   : > { %4681 = vst [vmem:[#allocation2 + $0x40] sm:$0xff] %v7601_v38 }
 0x2cb   : > { %v3490_v34 = vpop.f32.mrf.mxu2 }
 0x2cc   : > { %v3542_v61 = vadd.f32 %v3490_v34, %v3227_v10  ;;  %v4172_v27 = vpop.f32.mrf.mxu3 }
 0x2cd   : > { %v3178_v21 = vpop.f32.mrf.mxu1 }
 0x2ce   : > { %v4224_v25 = vadd.f32 %v4172_v27, %v3542_v61  ;;  %v3228_v17 = vadd.f32 %v3178_v21, %v7158_v15 }
 0x2cf   : > { %v4601_v11 = vpop.f32.mrf.mxu0 }
 0x2d0   : > { %v7605_v42 = vadd.f32 %v4598_v40, %v4224_v25 }
 0x2d2   : > { %4682 = vst [vmem:[#allocation2 + $0xc8] sm:$0xff] %v7605_v42 }
 0x2d3   : > { %v3493_v43 = vpop.f32.mrf.mxu2 }
 0x2d4   : > { %v3543_v62 = vadd.f32 %v3493_v43, %v3228_v17  ;;  %v4175_v23 = vpop.f32.mrf.mxu3 }
 0x2d5   : > { %v3180_v8 = vpop.f32.mrf.mxu1 }
 0x2d6   : > { %v4225_v9 = vadd.f32 %v4175_v23, %v3543_v62  ;;  %v3229_v33 = vadd.f32 %v3180_v8, %v7168_v14 }
 0x2d7   : > { %v4603_v18 = vpop.f32.mrf.mxu0 }
 0x2d8   : > { %v7609_v54 = vadd.f32 %v4601_v11, %v4225_v9 }
 0x2da   : > { %4683 = vst [vmem:[#allocation2 + $0xe0] sm:$0xff] %v7609_v54 }
 0x2db   : > { %v3495_v22 = vpop.f32.mrf.mxu2 }
 0x2dc   : > { %v3544_v3 = vadd.f32 %v3495_v22, %v3229_v33  ;;  %v4177_v45 = vpop.f32.mrf.mxu3 }
 0x2dd   : > { %v3183_v19 = vpop.f32.mrf.mxu1 }
 0x2de   : > { %v4226_v51 = vadd.f32 %v4177_v45, %v3544_v3  ;;  %v3230_v15 = vadd.f32 %v3183_v19, %v7190_v13 }
 0x2df   : > { %v4606_v31 = vpop.f32.mrf.mxu0 }
 0x2e0   : > { %v7613_v4 = vadd.f32 %v4603_v18, %v4226_v51 }
 0x2e2   : > { %4684 = vst [vmem:[#allocation2 + $0x90] sm:$0xff] %v7613_v4 }
 0x2e3   : > { %v3498_v24 = vpop.f32.mrf.mxu2 }
 0x2e4   : > { %v3545_v30 = vadd.f32 %v3498_v24, %v3230_v15  ;;  %v4180_v59 = vpop.f32.mrf.mxu3 }
 0x2e5   : > { %v3185_v50 = vpop.f32.mrf.mxu1 }
 0x2e6   : > { %v4227_v57 = vadd.f32 %v4180_v59, %v3545_v30  ;;  %v3231_v14 = vadd.f32 %v3185_v50, %v7206_v63 }
 0x2e7   : > { %v4608_v0 = vpop.f32.mrf.mxu0 }
 0x2e8   : > { %v7617_v41 = vadd.f32 %v4606_v31, %v4227_v57 }
 0x2ea   : > { %4685 = vst [vmem:[#allocation2 + $0x70] sm:$0xff] %v7617_v41 }
 0x2eb   : > { %v3500_v28 = vpop.f32.mrf.mxu2 }
 0x2ec   : > { %v3546_v35 = vadd.f32 %v3500_v28, %v3231_v14  ;;  %v4182_v29 = vpop.f32.mrf.mxu3 }
 0x2ed   : > { %v3188_v37 = vpop.f32.mrf.mxu1 }
 0x2ee   : > { %v4228_v40 = vadd.f32 %v4182_v29, %v3546_v35  ;;  %v3232_v13 = vadd.f32 %v3188_v37, %v7228_v2  ;;  %v7817_v35 = vld [vmem:[#allocation13_spill] sm:$0xff] }
 0x2ef   : > { %v4611_v10 = vpop.f32.mrf.mxu0 }
 0x2f0   : > { %v7621_v34 = vadd.f32 %v4608_v0, %v4228_v40 }
 0x2f2   : > { %4686 = vst [vmem:[#allocation2 + $0xc0] sm:$0xff] %v7621_v34 }
 0x2f3   : > { %v3503_v61 = vpop.f32.mrf.mxu2 }
 0x2f4   : > { %v3547_v27 = vadd.f32 %v3503_v61, %v3232_v13  ;;  %v4185_v21 = vpop.f32.mrf.mxu3 }
 0x2f5   : > { %v3190_v25 = vpop.f32.mrf.mxu1 }
 0x2f6   : > { %v4229_v11 = vadd.f32 %v4185_v21, %v3547_v27  ;;  %v3233_v63 = vadd.f32 %v3190_v25, %v7238_v49  ;;  %v7816_v49 = vld [vmem:[#allocation12_spill] sm:$0xff] }
 0x2f7   : > { %v4613_v17 = vpop.f32.mrf.mxu0 }
 0x2f8   : > { %v7625_v43 = vadd.f32 %v4611_v10, %v4229_v11 }
 0x2fa   : > { %4687 = vst [vmem:[#allocation2 + $0xa8] sm:$0xff] %v7625_v43 }
 0x2fb   : > { %v3505_v62 = vpop.f32.mrf.mxu2 }
 0x2fc   : > { %v3548_v23 = vadd.f32 %v3505_v62, %v3233_v63  ;;  %v4187_v8 = vpop.f32.mrf.mxu3 }
 0x2fd   : > { %v3193_v9 = vpop.f32.mrf.mxu1 }
 0x2fe   : > { %v4230_v18 = vadd.f32 %v4187_v8, %v3548_v23  ;;  %v3234_v2 = vadd.f32 %v3193_v9, %v7260_v52 }
 0x2ff   : > { %v4616_v33 = vpop.f32.mrf.mxu0 }
 0x300   : > { %v7629_v22 = vadd.f32 %v4613_v17, %v4230_v18 }
 0x302   : > { %4688 = vst [vmem:[#allocation2 + $0xd0] sm:$0xff] %v7629_v22 }
 0x303   : > { %v3508_v3 = vpop.f32.mrf.mxu2 }
 0x304   : > { %v3549_v45 = vadd.f32 %v3508_v3, %v3234_v2  ;;  %v4190_v19 = vpop.f32.mrf.mxu3 }
 0x305   : > { %v3195_v51 = vpop.f32.mrf.mxu1 }
 0x306   : > { %v4231_v31 = vadd.f32 %v4190_v19, %v3549_v45  ;;  %v3235_v30 = vadd.f32 %v3195_v51, %v7816_v49 }
 0x307   : > { %v4618_v15 = vpop.f32.mrf.mxu0 }
 0x308   : > { %v7633_v24 = vadd.f32 %v4616_v33, %v4231_v31 }
 0x30a   : > { %4689 = vst [vmem:[#allocation2 + $0x10] sm:$0xff] %v7633_v24 }
 0x30b   : > { %v3510_v59 = vpop.f32.mrf.mxu2 }
 0x30c   : > { %v3550_v50 = vadd.f32 %v3510_v59, %v3235_v30  ;;  %v4192_v57 = vpop.f32.mrf.mxu3 }
 0x30d   : > { %v3198_v0 = vpop.f32.mrf.mxu1 }
 0x30e   : > { %v4232_v14 = vadd.f32 %v4192_v57, %v3550_v50  ;;  %v3236_v29 = vadd.f32 %v3198_v0, %v7817_v35 }
 0x30f   : > { %v4621_v52 = vpop.f32.mrf.mxu0 }
 0x310   : > { %v7637_v28 = vadd.f32 %v4618_v15, %v4232_v14 }
 0x312   : > { %4690 = vst [vmem:[#allocation2 + $0x28] sm:$0xff] %v7637_v28 }
 0x313   : > { %v3513_v37 = vpop.f32.mrf.mxu2 }
 0x314   : > { %v3551_v40 = vadd.f32 %v3513_v37, %v3236_v29  ;;  %v4195_v10 = vpop.f32.mrf.mxu3 }
 0x315   : > { %v3200_v13 = vpop.f32.mrf.mxu1 }
 0x316   : > { %v4233_v61 = vadd.f32 %v4195_v10, %v3551_v40  ;;  %v3237_v21 = vadd.f32 %v3200_v13, %v7308_v48 }
 0x317   : > { %v4623_v25 = vpop.f32.mrf.mxu0 }
 0x318   : > { %v7641_v27 = vadd.f32 %v4621_v52, %v4233_v61 }
 0x31a   : > { %4691 = vst [vmem:[#allocation2 + $0xa0] sm:$0xff] %v7641_v27 }
 0x31b   : > { %v3515_v11 = vpop.f32.mrf.mxu2 }
 0x31c   : > { %v3552_v17 = vadd.f32 %v3515_v11, %v3237_v21  ;;  %v4197_v63 = vpop.f32.mrf.mxu3 }
 0x31d   : > { %v3203_v62 = vpop.f32.mrf.mxu1 }
 0x31e   : > { %v4234_v23 = vadd.f32 %v4197_v63, %v3552_v17  ;;  %v3238_v9 = vadd.f32 %v3203_v62, %v7330_v36 }
 0x31f   : > { %v4626_v3 = vpop.f32.mrf.mxu0 }
 0x320   : > { %v7645_v8 = vadd.f32 %v4623_v25, %v4234_v23 }
 0x322   : > { %4692 = vst [vmem:[#allocation2 + $0xf8] sm:$0xff] %v7645_v8 }
 0x323   : > { %v3518_v18 = vpop.f32.mrf.mxu2 }
 0x324   : > { %v3553_v33 = vadd.f32 %v3518_v18, %v3238_v9  ;;  %v4200_v2 = vpop.f32.mrf.mxu3 }
 0x325   : > { %v3205_v19 = vpop.f32.mrf.mxu1 }
 0x326   : > { %v4235_v45 = vadd.f32 %v4200_v2, %v3553_v33  ;;  %v3239_v48 = vadd.f32 %v3205_v19, %v7345_v26 }
 0x327   : > { %v4628_v59 = vpop.f32.mrf.mxu0 }
 0x328   : > { %v7649_v51 = vadd.f32 %v4626_v3, %v4235_v45 }
 0x32a   : > { %4693 = vst [vmem:[#allocation2 + $0x20] sm:$0xff] %v7649_v51 }
 0x32b   : > { %v3520_v31 = vpop.f32.mrf.mxu2 }
 0x32c   : > { %v3554_v15 = vadd.f32 %v3520_v31, %v3239_v48  ;;  %v4202_v49 = vpop.f32.mrf.mxu3 }
 0x32e   : > { %v4236_v30 = vadd.f32 %v4202_v49, %v3554_v15  ;;  %4698 = sbr.rel (%p5754_p5) target bundleno = 854 (0x356), region = 40 }
 0x330   : > { %v7653_v50 = vadd.f32 %v4628_v59, %v4236_v30 }
 0x332   : > { %4694 = vst [vmem:[#allocation2 + $0x98] sm:$0xff] %v7653_v50 }
 0x333   : > { %v6030_v36 = vld [vmem:[%s7778_s2] ss:$0 sm:$0xff]  ;;  %v7818_v26 = vld [vmem:[#allocation14_spill] sm:$0xff] }
 0x334   : > { %v4703_v57 = vadd.f32 %v6030_v36, %v7818_v26  ;;  %v4704_v0 = vadd.f32 %v6030_v36, %v7378_v6  ;;  %v4705_v14 = vadd.f32 %v6030_v36, %v7401_v7  ;;  %v4706_v52 = vadd.f32 %v6030_v36, %v7414_v39 }
 0x335   : > { %v4707_v35 = vadd.f32 %v6030_v36, %v7440_v1  ;;  %v4708_v29 = vadd.f32 %v6030_v36, %v7452_v56  ;;  %v4709_v37 = vadd.f32 %v6030_v36, %v7475_v16  ;;  %v4710_v6 = vadd.f32 %v6030_v36, %v7488_v53 }
 0x336   : > { %4735 = vst [vmem:[%s6270_s18] sm:$0xff] %v4703_v57  ;;  %v4711_v7 = vadd.f32 %v6030_v36, %v7514_v12  ;;  %v4712_v39 = vadd.f32 %v6030_v36, %v7526_v20  ;;  %v4713_v1 = vadd.f32 %v6030_v36, %v7549_v55  ;;  %v4714_v56 = vadd.f32 %v6030_v36, %v7559_v58 }
 0x337   : > { %4736 = vst [vmem:[%s6270_s18 + $0x8] sm:$0xff] %v4704_v0  ;;  %v4715_v16 = vadd.f32 %v6030_v36, %v7576_v32  ;;  %v4716_v53 = vadd.f32 %v6030_v36, %v7581_v46  ;;  %v4717_v12 = vadd.f32 %v6030_v36, %v7585_v60  ;;  %v4718_v20 = vadd.f32 %v6030_v36, %v7589_v44 }
 0x338   : > { %4737 = vst [vmem:[%s6270_s18 + $0x10] sm:$0xff] %v4705_v14  ;;  %v4719_v55 = vadd.f32 %v6030_v36, %v7593_v47  ;;  %v4720_v58 = vadd.f32 %v6030_v36, %v7597_v5  ;;  %v4721_v32 = vadd.f32 %v6030_v36, %v7601_v38  ;;  %v4722_v46 = vadd.f32 %v6030_v36, %v7605_v42 }
 0x339   : > { %4738 = vst [vmem:[%s6270_s18 + $0x18] sm:$0xff] %v4706_v52  ;;  %v4723_v60 = vadd.f32 %v6030_v36, %v7609_v54  ;;  %v4724_v44 = vadd.f32 %v6030_v36, %v7613_v4  ;;  %v4725_v47 = vadd.f32 %v6030_v36, %v7617_v41  ;;  %v4726_v5 = vadd.f32 %v6030_v36, %v7621_v34 }
 0x33a   : > { %4739 = vst [vmem:[%s6270_s18 + $0x20] sm:$0xff] %v4707_v35  ;;  %v4727_v38 = vadd.f32 %v6030_v36, %v7625_v43  ;;  %v4728_v42 = vadd.f32 %v6030_v36, %v7629_v22  ;;  %v4729_v54 = vadd.f32 %v6030_v36, %v7633_v24  ;;  %v4730_v4 = vadd.f32 %v6030_v36, %v7637_v28 }
 0x33b   : > { %4740 = vst [vmem:[%s6270_s18 + $0x28] sm:$0xff] %v4708_v29  ;;  %v4731_v41 = vadd.f32 %v6030_v36, %v7641_v27  ;;  %v4732_v34 = vadd.f32 %v6030_v36, %v7645_v8  ;;  %v4733_v43 = vadd.f32 %v6030_v36, %v7649_v51  ;;  %v4734_v40 = vadd.f32 %v6030_v36, %v7653_v50 }
 0x33c   : > { %4741 = vst [vmem:[%s6270_s18 + $0x30] sm:$0xff] %v4709_v37 }
 0x33d   : > { %4742 = vst [vmem:[%s6270_s18 + $0x38] sm:$0xff] %v4710_v6 }
 0x33e   : > { %4743 = vst [vmem:[%s6270_s18 + $0x40] sm:$0xff] %v4711_v7 }
 0x33f   : > { %4744 = vst [vmem:[%s6270_s18 + $0x48] sm:$0xff] %v4712_v39 }
 0x340   : > { %4745 = vst [vmem:[%s6270_s18 + $0x50] sm:$0xff] %v4713_v1 }
 0x341   : > { %4746 = vst [vmem:[%s6270_s18 + $0x58] sm:$0xff] %v4714_v56 }
 0x342   : > { %4747 = vst [vmem:[%s6270_s18 + $0x60] sm:$0xff] %v4715_v16 }
 0x343   : > { %4748 = vst [vmem:[%s6270_s18 + $0x68] sm:$0xff] %v4716_v53 }
 0x344   : > { %4749 = vst [vmem:[%s6270_s18 + $0x70] sm:$0xff] %v4717_v12 }
 0x345   : > { %4750 = vst [vmem:[%s6270_s18 + $0x78] sm:$0xff] %v4718_v20 }
 0x346   : > { %4751 = vst [vmem:[%s6270_s18 + $0x80] sm:$0xff] %v4719_v55 }
 0x347   : > { %4752 = vst [vmem:[%s6270_s18 + $0x88] sm:$0xff] %v4720_v58 }
 0x348   : > { %4753 = vst [vmem:[%s6270_s18 + $0x90] sm:$0xff] %v4721_v32 }
 0x349   : > { %4754 = vst [vmem:[%s6270_s18 + $0x98] sm:$0xff] %v4722_v46 }
 0x34a   : > { %4755 = vst [vmem:[%s6270_s18 + $0xa0] sm:$0xff] %v4723_v60 }
 0x34b   : > { %4756 = vst [vmem:[%s6270_s18 + $0xa8] sm:$0xff] %v4724_v44 }
 0x34c   : > { %4757 = vst [vmem:[%s6270_s18 + $0xb0] sm:$0xff] %v4725_v47 }
 0x34d   : > { %4758 = vst [vmem:[%s6270_s18 + $0xb8] sm:$0xff] %v4726_v5 }
 0x34e   : > { %4759 = vst [vmem:[%s6270_s18 + $0xc0] sm:$0xff] %v4727_v38 }
 0x34f   : > { %4760 = vst [vmem:[%s6270_s18 + $0xc8] sm:$0xff] %v4728_v42 }
 0x350   : > { %4761 = vst [vmem:[%s6270_s18 + $0xd0] sm:$0xff] %v4729_v54 }
 0x351   : > { %4762 = vst [vmem:[%s6270_s18 + $0xd8] sm:$0xff] %v4730_v4 }
 0x352   : > { %4763 = vst [vmem:[%s6270_s18 + $0xe0] sm:$0xff] %v4731_v41 }
 0x353   : > { %4764 = vst [vmem:[%s6270_s18 + $0xe8] sm:$0xff] %v4732_v34 }
 0x354   : > { %4765 = vst [vmem:[%s6270_s18 + $0xf0] sm:$0xff] %v4733_v43 }
 0x355   : > { %4766 = vst [vmem:[%s6270_s18 + $0xf8] sm:$0xff] %v4734_v40 }
 0x356 PF: > { %s5756_s15 = sshll.u32 %s6121_s16, 5  ;;  %s5757_s24 = sshll.u32 %s6125_s17, 8 }
 0x357   : > { %s4782_s25 = sshll.u32 %s6270_s18, 4  ;;  %s4779_s26 = sadd.s32 %s5757_s24, %s5756_s15  ;;  %s4783_s25 = int_to_ptr.vmem [resolvable:$true] %s4782_s25 }
 0x358   : > { %s5758_s7 = sshll.u32 %s4779_s26, 3  ;;  %s7819_s5 = sand.u32 1, %s6109_s13  }
 0x359   : > { %s4781_s30 = scalar_lea.hbm %s7779_s3, %s5758_s7  ;;  %s4768_s8 = scalar_lea.sflag [#allocation4], %s7819_s5 }
 0x35a   : > { %s4784_s4 = sshll.u32 %s4781_s30, 4  ;;  %s6051_s18 = scalar_lea.hbm %s7779_s3, 4096  ;;  %s4785_s4 = int_to_ptr.hbm [resolvable:$true] %s4784_s4 }
 0x35b   : > { %s6045_s10 = sshra.s32 %s4785_s4, 4  ;;  %s6046_s10 = int_to_ptr.hbm [resolvable:$true] %s6045_s10 }
 0x35c   : > { %s6047_s11 = scalar_lea.hbm %s6046_s10, 256  ;;  %p6052_p11 = scmp.lt.s32.totalorder %s6046_s10, %s7779_s3 }
 0x35d   : > { %p6048_p8 = scmp.ne.s32.totalorder %s6046_s10, %s6047_s11  ;;  %p6053_p12 = scmp.lt.s32.totalorder %s6051_s18, %s6047_s11 }
 0x35f   : > { %p6049_p9 = pnand %p6048_p8, %p6228_p6  ;;  %p6054_p13 = por %p6053_p12, %p6052_p11 }
 0x361   : > { %p6050_p10 = pneg %p6049_p9 }
 0x363   : > { %p6055_p0 = pnand %p6054_p13, %p6050_p10 }
 0x365   : > { %6058 = shalt.err (!%p6055_p0)
}
 0x366   : > { %s6144_s19 = smov 128   ;;  %s6145_s20 = smov 8  }
 0x367   : > { %5908 = dma.vmem_to_hbm [thread:$0]  (%p6228_p6), %s4783_s25, 4096, %s4785_s4, %s4768_s8, %s6144_s19, %s6144_s19, %s6145_s20  }
 0x368 PF: > { %p5914_p1 = scmp.ge.s32.totalorder %s6141_s21, 2  ;;  %s4799_s15 = sand.u32 1, %s6105_s12  }
 0x369   : > { %s4800_s24 = scalar_lea.sflag [#allocation4], %s4799_s15 }
 0x36a   : > { %p5911_p2 = pnand %p5914_p1, %p6235_p7 }
 0x36c   : > { %p5912_p3 = pneg %p5911_p2 }
 0x36e   : > { %6100 = dma.done.wait (%p5912_p3), %s4800_s24, 4096  }
 0x36f   : > { %6102 = vsyncadd (%p5912_p3), %s4800_s24, 4294963200  ;;  %s16_s21 = sadd.s32 1, %s6141_s21   ;;  %s7820_s15 = sld [smem:[#allocation6_spill]] }
 0x370   : > { %p13_p4 = scmp.ge.s32.totalorder %s16_s21, 50   ;;  %s7821_s16 = sld [smem:[#allocation7_spill]] }
 0x371   : > { %s7822_s17 = sld [smem:[#allocation8_spill]]  ;;  %s7826_s12 = smov %s6109_s13 }
 0x372   : > { %s7823_s18 = sld [smem:[#allocation9_spill]]  ;;  %s7827_s13 = smov %s6113_s14 }
 0x373   : > { %s7824_s19 = sld [smem:[#allocation10_spill]]  ;;  %s7828_s14 = smov %s6249_s6 }
 0x374   : > { %s7825_s20 = sld [smem:[#allocation11_spill]]  ;;  %15 = sbr.rel (!%p13_p4) target bundleno = 6 (0x6), region = 88 }
 0x379   :  { %4806 = vsyncpa [#allocation4], 1 }
 0x37a   :  { %4808 = vsyncpa [#allocation4 + $0x1], 1 }

</bundles_post_ra>
